<compile_context>
chip_gen: v7x
topology: tpu7x:2x2x1
jax: 0.10.0
libtpu: 0.0.40
codegen_flags: <defaults>
</compile_context>

<pallas_src>
import jax
import jax.numpy as jnp
import numpy as np
from jax import lax
from jax.experimental import pallas as pl
from jax.experimental.pallas import tpu as pltpu


# ---------------------------------------------------------------------------
# Weight prep: 3x3 conv weight -> 16 tap matrices, one per
# (out-row-parity e, out-col-parity f, row-tap dJ, col-tap dV), K-rows laid out
# as (row-phase A, col-phase B, channel) to match the parity-split conv input.
# ---------------------------------------------------------------------------
def _conv_tap_weights(conv_w, Cc, dtype):
    kx2, kup = [], []
    zero = jnp.zeros((Cc, Cc), dtype)
    for e in range(2):
        for f in range(2):
            for dJ in range(2):
                for dV in range(2):
                    bx, bu = [], []
                    for A in range(2):
                        for B in range(2):
                            dy = 2 * dJ + A - e
                            dx = 2 * dV + B - f
                            if 0 <= dy <= 2 and 0 <= dx <= 2:
                                bx.append(conv_w[:, :Cc, dy, dx].astype(dtype).T)
                                bu.append(conv_w[:, Cc:, dy, dx].astype(dtype).T)
                            else:
                                bx.append(zero)
                                bu.append(zero)
                    kx2.append(jnp.concatenate(bx, axis=0))   # (4*Cc, Cc)
                    kup.append(jnp.concatenate(bu, axis=0))
    return jnp.stack(kx2), jnp.stack(kup)                      # (16, 4*Cc, Cc)


# ---------------------------------------------------------------------------
# Fused kernel body (one batch element x one row-strip per grid step).
# ---------------------------------------------------------------------------
def _make_kernel(th2, T_in, H, W, Cin, Cc):
    Wp = W + 2          # x1 strip width incl. the 1-col zero border
    M = th2 * W
    C2 = 2 * Cc
    C4 = 4 * Cc

    def kernel(x1_ref, x2_ref, wt_ref, bias_ref, kx2_ref, kup_ref,
               out_ref, zs_ref, acc_ref):
        s = pl.program_id(1)

        # ---- 1) ConvTranspose2d(k=2, s=2) on the x1 strip: 2 MXU matmuls ----
        x1f = x1_ref[0, 0].reshape(T_in * Wp, Cin)
        # validity mask: kills the transposed-conv bias where the 3x3 conv's
        # zero padding (image border) lives instead of real upsampled data.
        ir = lax.broadcasted_iota(jnp.int32, (T_in, 1, 1), 0) + (s * th2 - 1)
        ic = lax.broadcasted_iota(jnp.int32, (1, Wp, 1), 1)
        mask = ((ir >= 0) & (ir <= H - 1) &
                (ic >= 1) & (ic <= W)).astype(jnp.float32)
        bias = bias_ref[...]                                       # (1, 1, 2*Cc)
        u0 = (jnp.dot(x1f, wt_ref[0], preferred_element_type=jnp.float32)
              .reshape(T_in, Wp, C2) + bias) * mask                # sub-row a = 0
        u1 = (jnp.dot(x1f, wt_ref[1], preferred_element_type=jnp.float32)
              .reshape(T_in, Wp, C2) + bias) * mask                # sub-row a = 1
        zdt = zs_ref.dtype

        # ---- 2) depth-to-space into the parity-split scratch (up channels) ----
        # zs[J, V, (A, B, m)] = padded-conv-input[r0 + 2J + A, 2V + B, Cc + m]
        zs_ref[:, :, 0 * Cc:1 * Cc] = u1[0:th2 + 1, 0:W + 1, Cc:C2].astype(zdt)
        zs_ref[:, :, 1 * Cc:2 * Cc] = u1[0:th2 + 1, 1:W + 2, 0:Cc].astype(zdt)
        zs_ref[:, :, 2 * Cc:3 * Cc] = u0[1:T_in, 0:W + 1, Cc:C2].astype(zdt)
        zs_ref[:, :, 3 * Cc:4 * Cc] = u0[1:T_in, 1:W + 2, 0:Cc].astype(zdt)

        # ---- 3) 3x3 conv as a 2x2 parity conv: 4 taps x (x2 + up) sources ----
        acc_ref[...] = jnp.zeros_like(acc_ref)
        x2s = x2_ref[0, 0]                                         # (th2+1, W+1, 4*Cc)
        for dJ in range(2):
            for dV in range(2):
                xslab = x2s[dJ:dJ + th2, dV:dV + W, :].reshape(M, C4)
                uslab = zs_ref[dJ:dJ + th2, dV:dV + W, :].reshape(M, C4)
                for e in range(2):
                    for f in range(2):
                        k = ((e * 2 + f) * 2 + dJ) * 2 + dV
                        acc_ref[e, f] += (
                            jnp.dot(xslab, kx2_ref[k],
                                    preferred_element_type=jnp.float32)
                            + jnp.dot(uslab, kup_ref[k],
                                      preferred_element_type=jnp.float32))

        # ---- 4) ReLU + parity-split store (merged back for free in the wrapper) ----
        for e in range(2):
            for f in range(2):
                r = jnp.maximum(acc_ref[e, f], 0.0).reshape(th2, W, Cc)
                out_ref[0, :, e, :, f * Cc:(f + 1) * Cc] = r.astype(out_ref.dtype)

    return kernel


# ---------------------------------------------------------------------------
# Up.forward (external interface NCHW, like PyTorch)
# ---------------------------------------------------------------------------
def up_forward(x1, x2, up_w, up_b, conv_w, *, row_block=None,
               compute_dtype=jnp.float32):
    """x1: (N, Cin, H, W).  x2: (N, Cout, 2H, 2W).  Returns (N, Cout, 2H, 2W)."""
    N, Cin, H, W = x1.shape
    Cc = up_w.shape[1]
    assert up_w.shape == (Cin, Cc, 2, 2)
    assert conv_w.shape == (Cc, 2 * Cc, 3, 3)
    # TODO(synk): x2=None (skip=True) variant, BatchNorm path (use_bn=True), and the
    # F.pad size-mismatch path are not fused here; this covers the exercised config.
    assert x2 is not None and x2.shape == (N, Cc, 2 * H, 2 * W)

    # strip height in x1 rows; each grid step produces 2*row_block output rows.
    if row_block is None:
        row_block = 1
        for cand in (64, 32, 16, 8, 4, 2, 1):
            if cand <= H and H % cand == 0:
                row_block = cand
                break
    th2 = int(row_block)
    assert H % th2 == 0, "row_block must divide H"
    S = H // th2
    T_in = th2 + 2
    C2, C4 = 2 * Cc, 4 * Cc

    # ----------------- XLA-side layout prep (cheap, one pass per input) -----------------
    # x1: NCHW -> NHWC, 1-px zero border, gathered into per-strip slabs (+1-row halo).
    x1n = jnp.transpose(x1, (0, 2, 3, 1)).astype(compute_dtype)
    x1p = jnp.pad(x1n, ((0, 0), (1, 1), (1, 1), (0, 0)))            # (N, H+2, W+2, Cin)
    x1_strips = jnp.stack(
        [x1p[:, s * th2: s * th2 + T_in] for s in range(S)], axis=1)

    # x2: NCHW -> NHWC, 1-px zero pad, rows/cols split by parity -> lanes (A, B, ch).
    x2n = jnp.transpose(x2, (0, 2, 3, 1)).astype(compute_dtype)
    x2p = jnp.pad(x2n, ((0, 0), (1, 1), (1, 1), (0, 0)))            # (N, 2H+2, 2W+2, Cc)
    x2zs = (x2p.reshape(N, H + 1, 2, W + 1, 2, Cc)
                .transpose(0, 1, 3, 2, 4, 5)
                .reshape(N, H + 1, W + 1, C4))
    x2_strips = jnp.stack(
        [x2zs[:, s * th2: s * th2 + th2 + 1] for s in range(S)], axis=1)

    # ConvTranspose weight -> one (Cin, 2*Cc) matrix per sub-row a, columns = (b, ch).
    wt = jnp.transpose(up_w, (2, 0, 3, 1)).reshape(2, Cin, C2).astype(compute_dtype)
    bias2 = jnp.tile(up_b.astype(jnp.float32), 2).reshape(1, 1, C2)
    kx2, kup = _conv_tap_weights(conv_w, Cc, compute_dtype)

    kernel = _make_kernel(th2, T_in, H, W, Cin, Cc)

    out = pl.pallas_call(
        kernel,
        out_shape=jax.ShapeDtypeStruct((N, H, 2, W, C2), jnp.float32),
        grid=(N, S),
        in_specs=[
            pl.BlockSpec((1, 1, T_in, W + 2, Cin), lambda n, s: (n, s, 0, 0, 0)),
            pl.BlockSpec((1, 1, th2 + 1, W + 1, C4), lambda n, s: (n, s, 0, 0, 0)),
            pl.BlockSpec((2, Cin, C2), lambda n, s: (0, 0, 0)),
            pl.BlockSpec((1, 1, C2), lambda n, s: (0, 0, 0)),
            pl.BlockSpec((16, C4, Cc), lambda n, s: (0, 0, 0)),
            pl.BlockSpec((16, C4, Cc), lambda n, s: (0, 0, 0)),
        ],
        out_specs=pl.BlockSpec((1, th2, 2, W, C2), lambda n, s: (n, s, 0, 0, 0)),
        scratch_shapes=[
            pltpu.VMEM((th2 + 1, W + 1, C4), compute_dtype),   # parity-split up tile
            pltpu.VMEM((2, 2, th2 * W, Cc), jnp.float32),      # f32 accumulators
        ],
        compiler_params=pltpu.CompilerParams(
            dimension_semantics=("parallel", "parallel")),
    )(x1_strips, x2_strips, wt, bias2, kx2, kup)

    # (N, H, 2, W, 2*Cc) -> (N, 2H, 2W, Cc) is a pure row-major (free) reshape,
    # then a single boundary transpose back to the external NCHW layout.
    out = out.reshape(N, 2 * H, 2 * W, Cc)
    return jnp.transpose(out, (0, 3, 1, 2))


# ---------------------------------------------------------------------------
# Pure-JAX reference for validation
# ---------------------------------------------------------------------------
def up_ref(x1, x2, up_w, up_b, conv_w):
    N, Cin, H, W = x1.shape
    Cout = up_w.shape[1]
    y = jnp.einsum('ncij,cdab->ndiajb', x1, up_w).reshape(N, Cout, 2 * H, 2 * W)
    y = y + up_b[None, :, None, None]
    if x2 is not None:
        diffY = x2.shape[2] - y.shape[2]
        diffX = x2.shape[3] - y.shape[3]
        y = jnp.pad(y, ((0, 0), (0, 0),
                        (diffY // 2, diffY - diffY // 2),
                        (diffX // 2, diffX - diffX // 2)))
        y = jnp.concatenate([x2, y], axis=1)
    y = lax.conv_general_dilated(y, conv_w, (1, 1), ((1, 1), (1, 1)),
                                 dimension_numbers=('NCHW', 'OIHW', 'NCHW'))
    return jnp.maximum(y, 0.0)


if __name__ == "__main__":
    key = jax.random.PRNGKey(0)
    k1, k2, k3, k4, k5 = jax.random.split(key, 5)

    # small shapes: in_channels=8, out_channels=4, skip tensor x2 present
    N, Cin, H, W = 2, 8, 8, 8
    Cout = 4
    x1 = jax.random.normal(k1, (N, Cin, H, W), jnp.float32)
    x2 = jax.random.normal(k2, (N, Cout, 2 * H, 2 * W), jnp.float32)

    up_w = jax.random.normal(k3, (Cin, Cout, 2, 2), jnp.float32) * 0.2       # ConvTranspose2d.weight
    up_b = jax.random.normal(k4, (Cout,), jnp.float32) * 0.1                 # ConvTranspose2d.bias
    conv_w = jax.random.normal(k5, (Cout, 2 * Cout, 3, 3), jnp.float32) * 0.2  # Conv2d.weight

    # row_block=4 -> 2 row-strips per image: exercises both boundary strips + real halos.
    out = jax.block_until_ready(
        up_forward(x1, x2, up_w, up_b, conv_w, row_block=4))
    ref = up_ref(x1, x2, up_w, up_b, conv_w)

    assert out.shape == (N, Cout, 2 * H, 2 * W), out.shape
    np.testing.assert_allclose(np.asarray(out), np.asarray(ref), rtol=1e-4, atol=1e-4)
    print("KERNEL_OK")
</pallas_src>

<mosaic_0001>
module attributes {stable_mosaic.version = 11 : i64} {
  func.func @kernel(%arg0: i32, %arg1: i32, %arg2: memref<1x1x6x10x8xf32, #tpu.memory_space<vmem>>, %arg3: memref<1x1x5x9x16xf32, #tpu.memory_space<vmem>>, %arg4: memref<2x8x8xf32, #tpu.memory_space<vmem>>, %arg5: memref<1x1x8xf32, #tpu.memory_space<vmem>>, %arg6: memref<16x16x4xf32, #tpu.memory_space<vmem>>, %arg7: memref<16x16x4xf32, #tpu.memory_space<vmem>>, %arg8: memref<1x4x2x8x8xf32, #tpu.memory_space<vmem>>, %arg9: memref<5x9x16xf32, #tpu.memory_space<vmem>>, %arg10: memref<2x2x32x4xf32, #tpu.memory_space<vmem>>) attributes {dimension_semantics = [#tpu.dimension_semantics<parallel>, #tpu.dimension_semantics<parallel>], iteration_bounds = array<i64: 2, 2>, scalar_prefetch = 0 : i64, scratch_operands = 2 : i64, tpu.core_type = #tpu.core_type<tc>, window_params = [{transform_indices = @transform_0, window_bounds = array<i64: 1, 1, 6, 10, 8>}, {transform_indices = @transform_1, window_bounds = array<i64: 1, 1, 5, 9, 16>}, {pipeline_mode = #tpu.pipeline_mode<synchronous>, transform_indices = @transform_2, window_bounds = array<i64: 2, 8, 8>}, {pipeline_mode = #tpu.pipeline_mode<synchronous>, transform_indices = @transform_3, window_bounds = array<i64: 1, 1, 8>}, {pipeline_mode = #tpu.pipeline_mode<synchronous>, transform_indices = @transform_4, window_bounds = array<i64: 16, 16, 4>}, {pipeline_mode = #tpu.pipeline_mode<synchronous>, transform_indices = @transform_5, window_bounds = array<i64: 16, 16, 4>}, {transform_indices = @transform_6, window_bounds = array<i64: 1, 4, 2, 8, 8>}]} {
    %c0 = arith.constant 0 : index
    %c0_0 = arith.constant 0 : index
    %c0_1 = arith.constant 0 : index
    %c0_2 = arith.constant 0 : index
    %c0_3 = arith.constant 0 : index
    %0 = vector.load %arg2[%c0, %c0_0, %c0_1, %c0_2, %c0_3] : memref<1x1x6x10x8xf32, #tpu.memory_space<vmem>>, vector<1x1x6x10x8xf32>
    %1 = vector.shape_cast %0 : vector<1x1x6x10x8xf32> to vector<6x10x8xf32>
    %2 = vector.shape_cast %1 : vector<6x10x8xf32> to vector<60x8xf32>
    %3 = tpu.iota {dimensions = array<i32: 0>} : vector<6x1x1xi32>
    %c4_i32 = arith.constant 4 : i32
    %4 = arith.muli %arg1, %c4_i32 : i32
    %c1_i32 = arith.constant 1 : i32
    %5 = arith.subi %4, %c1_i32 : i32
    %6 = vector.broadcast %5 : i32 to vector<6x1x1xi32>
    %7 = arith.addi %3, %6 : vector<6x1x1xi32>
    %8 = tpu.iota {dimensions = array<i32: 1>} : vector<1x10x1xi32>
    %c0_i32 = arith.constant 0 : i32
    %9 = vector.broadcast %c0_i32 : i32 to vector<6x1x1xi32>
    %10 = arith.cmpi sge, %7, %9 : vector<6x1x1xi32>
    %c7_i32 = arith.constant 7 : i32
    %11 = vector.broadcast %c7_i32 : i32 to vector<6x1x1xi32>
    %12 = arith.cmpi sle, %7, %11 : vector<6x1x1xi32>
    %13 = arith.andi %10, %12 : vector<6x1x1xi1>
    %c1_i32_4 = arith.constant 1 : i32
    %14 = vector.broadcast %c1_i32_4 : i32 to vector<1x10x1xi32>
    %15 = arith.cmpi sge, %8, %14 : vector<1x10x1xi32>
    %16 = vector.broadcast %13 : vector<6x1x1xi1> to vector<6x10x1xi1>
    %17 = vector.broadcast %15 : vector<1x10x1xi1> to vector<6x10x1xi1>
    %18 = arith.andi %16, %17 : vector<6x10x1xi1>
    %c8_i32 = arith.constant 8 : i32
    %19 = vector.broadcast %c8_i32 : i32 to vector<1x10x1xi32>
    %20 = arith.cmpi sle, %8, %19 : vector<1x10x1xi32>
    %21 = vector.broadcast %20 : vector<1x10x1xi1> to vector<6x10x1xi1>
    %22 = arith.andi %18, %21 : vector<6x10x1xi1>
    %23 = arith.extui %22 : vector<6x10x1xi1> to vector<6x10x1xi32>
    %24 = arith.sitofp %23 : vector<6x10x1xi32> to vector<6x10x1xf32>
    %c0_5 = arith.constant 0 : index
    %c0_6 = arith.constant 0 : index
    %c0_7 = arith.constant 0 : index
    %25 = vector.load %arg5[%c0_5, %c0_6, %c0_7] : memref<1x1x8xf32, #tpu.memory_space<vmem>>, vector<1x1x8xf32>
    %c0_8 = arith.constant 0 : index
    %c0_9 = arith.constant 0 : index
    %c0_10 = arith.constant 0 : index
    %26 = vector.load %arg4[%c0_8, %c0_9, %c0_10] : memref<2x8x8xf32, #tpu.memory_space<vmem>>, vector<1x8x8xf32>
    %27 = vector.shape_cast %26 : vector<1x8x8xf32> to vector<8x8xf32>
    %cst = arith.constant dense<0.000000e+00> : vector<60x8xf32>
    %28 = tpu.matmul %2, %27, %cst {dimension_numbers = #tpu.dot_dimension_numbers<[1], [0], [0], [1], [0, 0, 1, 1], [], []>} : vector<60x8xf32>, vector<8x8xf32>, vector<60x8xf32> -> vector<60x8xf32>
    %29 = vector.shape_cast %28 : vector<60x8xf32> to vector<6x10x8xf32>
    %30 = vector.broadcast %25 : vector<1x1x8xf32> to vector<6x10x8xf32>
    %31 = arith.addf %29, %30 : vector<6x10x8xf32>
    %32 = vector.broadcast %24 : vector<6x10x1xf32> to vector<6x10x8xf32>
    %33 = arith.mulf %31, %32 : vector<6x10x8xf32>
    %c1 = arith.constant 1 : index
    %c0_11 = arith.constant 0 : index
    %c0_12 = arith.constant 0 : index
    %34 = vector.load %arg4[%c1, %c0_11, %c0_12] : memref<2x8x8xf32, #tpu.memory_space<vmem>>, vector<1x8x8xf32>
    %35 = vector.shape_cast %34 : vector<1x8x8xf32> to vector<8x8xf32>
    %cst_13 = arith.constant dense<0.000000e+00> : vector<60x8xf32>
    %36 = tpu.matmul %2, %35, %cst_13 {dimension_numbers = #tpu.dot_dimension_numbers<[1], [0], [0], [1], [0, 0, 1, 1], [], []>} : vector<60x8xf32>, vector<8x8xf32>, vector<60x8xf32> -> vector<60x8xf32>
    %37 = vector.shape_cast %36 : vector<60x8xf32> to vector<6x10x8xf32>
    %38 = vector.broadcast %25 : vector<1x1x8xf32> to vector<6x10x8xf32>
    %39 = arith.addf %37, %38 : vector<6x10x8xf32>
    %40 = vector.broadcast %24 : vector<6x10x1xf32> to vector<6x10x8xf32>
    %41 = arith.mulf %39, %40 : vector<6x10x8xf32>
    %42 = vector.extract_strided_slice %41 {offsets = [0, 0, 4], sizes = [5, 9, 4], strides = [1, 1, 1]} : vector<6x10x8xf32> to vector<5x9x4xf32>
    %c0_14 = arith.constant 0 : index
    %c0_15 = arith.constant 0 : index
    %c0_16 = arith.constant 0 : index
    %43 = vector.load %arg9[%c0_14, %c0_15, %c0_16] : memref<5x9x16xf32, #tpu.memory_space<vmem>>, vector<5x9x4xf32>
    tpu.vector_store %arg9[%c0_14, %c0_15, %c0_16], %42 {strides = array<i32>} : memref<5x9x16xf32, #tpu.memory_space<vmem>>, vector<5x9x4xf32>,
    %44 = vector.extract_strided_slice %41 {offsets = [0, 1, 0], sizes = [5, 9, 4], strides = [1, 1, 1]} : vector<6x10x8xf32> to vector<5x9x4xf32>
    %c0_17 = arith.constant 0 : index
    %c0_18 = arith.constant 0 : index
    %c4 = arith.constant 4 : index
    %45 = vector.load %arg9[%c0_17, %c0_18, %c4] : memref<5x9x16xf32, #tpu.memory_space<vmem>>, vector<5x9x4xf32>
    tpu.vector_store %arg9[%c0_17, %c0_18, %c4], %44 {strides = array<i32>} : memref<5x9x16xf32, #tpu.memory_space<vmem>>, vector<5x9x4xf32>,
    %46 = vector.extract_strided_slice %33 {offsets = [1, 0, 4], sizes = [5, 9, 4], strides = [1, 1, 1]} : vector<6x10x8xf32> to vector<5x9x4xf32>
    %c0_19 = arith.constant 0 : index
    %c0_20 = arith.constant 0 : index
    %c8 = arith.constant 8 : index
    %47 = vector.load %arg9[%c0_19, %c0_20, %c8] : memref<5x9x16xf32, #tpu.memory_space<vmem>>, vector<5x9x4xf32>
    tpu.vector_store %arg9[%c0_19, %c0_20, %c8], %46 {strides = array<i32>} : memref<5x9x16xf32, #tpu.memory_space<vmem>>, vector<5x9x4xf32>,
    %48 = vector.extract_strided_slice %33 {offsets = [1, 1, 0], sizes = [5, 9, 4], strides = [1, 1, 1]} : vector<6x10x8xf32> to vector<5x9x4xf32>
    %c0_21 = arith.constant 0 : index
    %c0_22 = arith.constant 0 : index
    %c12 = arith.constant 12 : index
    %49 = vector.load %arg9[%c0_21, %c0_22, %c12] : memref<5x9x16xf32, #tpu.memory_space<vmem>>, vector<5x9x4xf32>
    tpu.vector_store %arg9[%c0_21, %c0_22, %c12], %48 {strides = array<i32>} : memref<5x9x16xf32, #tpu.memory_space<vmem>>, vector<5x9x4xf32>,
    %cst_23 = arith.constant 0.000000e+00 : f32
    %50 = vector.broadcast %cst_23 : f32 to vector<2x2x32x4xf32>
    %c0_24 = arith.constant 0 : index
    %c0_25 = arith.constant 0 : index
    %c0_26 = arith.constant 0 : index
    %c0_27 = arith.constant 0 : index
    %51 = vector.load %arg10[%c0_24, %c0_25, %c0_26, %c0_27] : memref<2x2x32x4xf32, #tpu.memory_space<vmem>>, vector<2x2x32x4xf32>
    tpu.vector_store %arg10[%c0_24, %c0_25, %c0_26, %c0_27], %50 {strides = array<i32>} : memref<2x2x32x4xf32, #tpu.memory_space<vmem>>, vector<2x2x32x4xf32>,
    %c0_28 = arith.constant 0 : index
    %c0_29 = arith.constant 0 : index
    %c0_30 = arith.constant 0 : index
    %c0_31 = arith.constant 0 : index
    %c0_32 = arith.constant 0 : index
    %52 = vector.load %arg3[%c0_28, %c0_29, %c0_30, %c0_31, %c0_32] : memref<1x1x5x9x16xf32, #tpu.memory_space<vmem>>, vector<1x1x5x9x16xf32>
    %53 = vector.shape_cast %52 : vector<1x1x5x9x16xf32> to vector<5x9x16xf32>
    %54 = vector.extract_strided_slice %53 {offsets = [0, 0, 0], sizes = [4, 8, 16], strides = [1, 1, 1]} : vector<5x9x16xf32> to vector<4x8x16xf32>
    %55 = vector.shape_cast %54 : vector<4x8x16xf32> to vector<32x16xf32>
    %c0_33 = arith.constant 0 : index
    %c0_34 = arith.constant 0 : index
    %c0_35 = arith.constant 0 : index
    %56 = vector.load %arg9[%c0_33, %c0_34, %c0_35] : memref<5x9x16xf32, #tpu.memory_space<vmem>>, vector<4x8x16xf32>
    %57 = vector.shape_cast %56 : vector<4x8x16xf32> to vector<32x16xf32>
    %c0_36 = arith.constant 0 : index
    %c0_37 = arith.constant 0 : index
    %c0_38 = arith.constant 0 : index
    %c0_39 = arith.constant 0 : index
    %58 = vector.load %arg10[%c0_36, %c0_37, %c0_38, %c0_39] : memref<2x2x32x4xf32, #tpu.memory_space<vmem>>, vector<1x1x32x4xf32>
    %59 = vector.shape_cast %58 : vector<1x1x32x4xf32> to vector<32x4xf32>
    %c0_40 = arith.constant 0 : index
    %c0_41 = arith.constant 0 : index
    %c0_42 = arith.constant 0 : index
    %60 = vector.load %arg6[%c0_40, %c0_41, %c0_42] : memref<16x16x4xf32, #tpu.memory_space<vmem>>, vector<1x16x4xf32>
    %61 = vector.shape_cast %60 : vector<1x16x4xf32> to vector<16x4xf32>
    %cst_43 = arith.constant dense<0.000000e+00> : vector<32x4xf32>
    %62 = tpu.matmul %55, %61, %cst_43 {dimension_numbers = #tpu.dot_dimension_numbers<[1], [0], [0], [1], [0, 0, 1, 1], [], []>} : vector<32x16xf32>, vector<16x4xf32>, vector<32x4xf32> -> vector<32x4xf32>
    %c0_44 = arith.constant 0 : index
    %c0_45 = arith.constant 0 : index
    %c0_46 = arith.constant 0 : index
    %63 = vector.load %arg7[%c0_44, %c0_45, %c0_46] : memref<16x16x4xf32, #tpu.memory_space<vmem>>, vector<1x16x4xf32>
    %64 = vector.shape_cast %63 : vector<1x16x4xf32> to vector<16x4xf32>
    %cst_47 = arith.constant dense<0.000000e+00> : vector<32x4xf32>
    %65 = tpu.matmul %57, %64, %cst_47 {dimension_numbers = #tpu.dot_dimension_numbers<[1], [0], [0], [1], [0, 0, 1, 1], [], []>} : vector<32x16xf32>, vector<16x4xf32>, vector<32x4xf32> -> vector<32x4xf32>
    %66 = arith.addf %62, %65 : vector<32x4xf32>
    %67 = arith.addf %59, %66 : vector<32x4xf32>
    %c0_48 = arith.constant 0 : index
    %c0_49 = arith.constant 0 : index
    %c0_50 = arith.constant 0 : index
    %c0_51 = arith.constant 0 : index
    %68 = vector.load %arg10[%c0_48, %c0_49, %c0_50, %c0_51] : memref<2x2x32x4xf32, #tpu.memory_space<vmem>>, vector<1x1x32x4xf32>
    %69 = vector.shape_cast %68 : vector<1x1x32x4xf32> to vector<32x4xf32>
    %70 = vector.shape_cast %67 : vector<32x4xf32> to vector<1x1x32x4xf32>
    tpu.vector_store %arg10[%c0_48, %c0_49, %c0_50, %c0_51], %70 {strides = array<i32>} : memref<2x2x32x4xf32, #tpu.memory_space<vmem>>, vector<1x1x32x4xf32>,
    %c0_52 = arith.constant 0 : index
    %c1_53 = arith.constant 1 : index
    %c0_54 = arith.constant 0 : index
    %c0_55 = arith.constant 0 : index
    %71 = vector.load %arg10[%c0_52, %c1_53, %c0_54, %c0_55] : memref<2x2x32x4xf32, #tpu.memory_space<vmem>>, vector<1x1x32x4xf32>
    %72 = vector.shape_cast %71 : vector<1x1x32x4xf32> to vector<32x4xf32>
    %c4_56 = arith.constant 4 : index
    %c0_57 = arith.constant 0 : index
    %c0_58 = arith.constant 0 : index
    %73 = vector.load %arg6[%c4_56, %c0_57, %c0_58] : memref<16x16x4xf32, #tpu.memory_space<vmem>>, vector<1x16x4xf32>
    %74 = vector.shape_cast %73 : vector<1x16x4xf32> to vector<16x4xf32>
    %cst_59 = arith.constant dense<0.000000e+00> : vector<32x4xf32>
    %75 = tpu.matmul %55, %74, %cst_59 {dimension_numbers = #tpu.dot_dimension_numbers<[1], [0], [0], [1], [0, 0, 1, 1], [], []>} : vector<32x16xf32>, vector<16x4xf32>, vector<32x4xf32> -> vector<32x4xf32>
    %c4_60 = arith.constant 4 : index
    %c0_61 = arith.constant 0 : index
    %c0_62 = arith.constant 0 : index
    %76 = vector.load %arg7[%c4_60, %c0_61, %c0_62] : memref<16x16x4xf32, #tpu.memory_space<vmem>>, vector<1x16x4xf32>
    %77 = vector.shape_cast %76 : vector<1x16x4xf32> to vector<16x4xf32>
    %cst_63 = arith.constant dense<0.000000e+00> : vector<32x4xf32>
    %78 = tpu.matmul %57, %77, %cst_63 {dimension_numbers = #tpu.dot_dimension_numbers<[1], [0], [0], [1], [0, 0, 1, 1], [], []>} : vector<32x16xf32>, vector<16x4xf32>, vector<32x4xf32> -> vector<32x4xf32>
    %79 = arith.addf %75, %78 : vector<32x4xf32>
    %80 = arith.addf %72, %79 : vector<32x4xf32>
    %c0_64 = arith.constant 0 : index
    %c1_65 = arith.constant 1 : index
    %c0_66 = arith.constant 0 : index
    %c0_67 = arith.constant 0 : index
    %81 = vector.load %arg10[%c0_64, %c1_65, %c0_66, %c0_67] : memref<2x2x32x4xf32, #tpu.memory_space<vmem>>, vector<1x1x32x4xf32>
    %82 = vector.shape_cast %81 : vector<1x1x32x4xf32> to vector<32x4xf32>
    %83 = vector.shape_cast %80 : vector<32x4xf32> to vector<1x1x32x4xf32>
    tpu.vector_store %arg10[%c0_64, %c1_65, %c0_66, %c0_67], %83 {strides = array<i32>} : memref<2x2x32x4xf32, #tpu.memory_space<vmem>>, vector<1x1x32x4xf32>,
    %c1_68 = arith.constant 1 : index
    %c0_69 = arith.constant 0 : index
    %c0_70 = arith.constant 0 : index
    %c0_71 = arith.constant 0 : index
    %84 = vector.load %arg10[%c1_68, %c0_69, %c0_70, %c0_71] : memref<2x2x32x4xf32, #tpu.memory_space<vmem>>, vector<1x1x32x4xf32>
    %85 = vector.shape_cast %84 : vector<1x1x32x4xf32> to vector<32x4xf32>
    %c8_72 = arith.constant 8 : index
    %c0_73 = arith.constant 0 : index
    %c0_74 = arith.constant 0 : index
    %86 = vector.load %arg6[%c8_72, %c0_73, %c0_74] : memref<16x16x4xf32, #tpu.memory_space<vmem>>, vector<1x16x4xf32>
    %87 = vector.shape_cast %86 : vector<1x16x4xf32> to vector<16x4xf32>
    %cst_75 = arith.constant dense<0.000000e+00> : vector<32x4xf32>
    %88 = tpu.matmul %55, %87, %cst_75 {dimension_numbers = #tpu.dot_dimension_numbers<[1], [0], [0], [1], [0, 0, 1, 1], [], []>} : vector<32x16xf32>, vector<16x4xf32>, vector<32x4xf32> -> vector<32x4xf32>
    %c8_76 = arith.constant 8 : index
    %c0_77 = arith.constant 0 : index
    %c0_78 = arith.constant 0 : index
    %89 = vector.load %arg7[%c8_76, %c0_77, %c0_78] : memref<16x16x4xf32, #tpu.memory_space<vmem>>, vector<1x16x4xf32>
    %90 = vector.shape_cast %89 : vector<1x16x4xf32> to vector<16x4xf32>
    %cst_79 = arith.constant dense<0.000000e+00> : vector<32x4xf32>
    %91 = tpu.matmul %57, %90, %cst_79 {dimension_numbers = #tpu.dot_dimension_numbers<[1], [0], [0], [1], [0, 0, 1, 1], [], []>} : vector<32x16xf32>, vector<16x4xf32>, vector<32x4xf32> -> vector<32x4xf32>
    %92 = arith.addf %88, %91 : vector<32x4xf32>
    %93 = arith.addf %85, %92 : vector<32x4xf32>
    %c1_80 = arith.constant 1 : index
    %c0_81 = arith.constant 0 : index
    %c0_82 = arith.constant 0 : index
    %c0_83 = arith.constant 0 : index
    %94 = vector.load %arg10[%c1_80, %c0_81, %c0_82, %c0_83] : memref<2x2x32x4xf32, #tpu.memory_space<vmem>>, vector<1x1x32x4xf32>
    %95 = vector.shape_cast %94 : vector<1x1x32x4xf32> to vector<32x4xf32>
    %96 = vector.shape_cast %93 : vector<32x4xf32> to vector<1x1x32x4xf32>
    tpu.vector_store %arg10[%c1_80, %c0_81, %c0_82, %c0_83], %96 {strides = array<i32>} : memref<2x2x32x4xf32, #tpu.memory_space<vmem>>, vector<1x1x32x4xf32>,
    %c1_84 = arith.constant 1 : index
    %c1_85 = arith.constant 1 : index
    %c0_86 = arith.constant 0 : index
    %c0_87 = arith.constant 0 : index
    %97 = vector.load %arg10[%c1_84, %c1_85, %c0_86, %c0_87] : memref<2x2x32x4xf32, #tpu.memory_space<vmem>>, vector<1x1x32x4xf32>
    %98 = vector.shape_cast %97 : vector<1x1x32x4xf32> to vector<32x4xf32>
    %c12_88 = arith.constant 12 : index
    %c0_89 = arith.constant 0 : index
    %c0_90 = arith.constant 0 : index
    %99 = vector.load %arg6[%c12_88, %c0_89, %c0_90] : memref<16x16x4xf32, #tpu.memory_space<vmem>>, vector<1x16x4xf32>
    %100 = vector.shape_cast %99 : vector<1x16x4xf32> to vector<16x4xf32>
    %cst_91 = arith.constant dense<0.000000e+00> : vector<32x4xf32>
    %101 = tpu.matmul %55, %100, %cst_91 {dimension_numbers = #tpu.dot_dimension_numbers<[1], [0], [0], [1], [0, 0, 1, 1], [], []>} : vector<32x16xf32>, vector<16x4xf32>, vector<32x4xf32> -> vector<32x4xf32>
    %c12_92 = arith.constant 12 : index
    %c0_93 = arith.constant 0 : index
    %c0_94 = arith.constant 0 : index
    %102 = vector.load %arg7[%c12_92, %c0_93, %c0_94] : memref<16x16x4xf32, #tpu.memory_space<vmem>>, vector<1x16x4xf32>
    %103 = vector.shape_cast %102 : vector<1x16x4xf32> to vector<16x4xf32>
    %cst_95 = arith.constant dense<0.000000e+00> : vector<32x4xf32>
    %104 = tpu.matmul %57, %103, %cst_95 {dimension_numbers = #tpu.dot_dimension_numbers<[1], [0], [0], [1], [0, 0, 1, 1], [], []>} : vector<32x16xf32>, vector<16x4xf32>, vector<32x4xf32> -> vector<32x4xf32>
    %105 = arith.addf %101, %104 : vector<32x4xf32>
    %106 = arith.addf %98, %105 : vector<32x4xf32>
    %c1_96 = arith.constant 1 : index
    %c1_97 = arith.constant 1 : index
    %c0_98 = arith.constant 0 : index
    %c0_99 = arith.constant 0 : index
    %107 = vector.load %arg10[%c1_96, %c1_97, %c0_98, %c0_99] : memref<2x2x32x4xf32, #tpu.memory_space<vmem>>, vector<1x1x32x4xf32>
    %108 = vector.shape_cast %107 : vector<1x1x32x4xf32> to vector<32x4xf32>
    %109 = vector.shape_cast %106 : vector<32x4xf32> to vector<1x1x32x4xf32>
    tpu.vector_store %arg10[%c1_96, %c1_97, %c0_98, %c0_99], %109 {strides = array<i32>} : memref<2x2x32x4xf32, #tpu.memory_space<vmem>>, vector<1x1x32x4xf32>,
    %110 = vector.extract_strided_slice %53 {offsets = [0, 1, 0], sizes = [4, 8, 16], strides = [1, 1, 1]} : vector<5x9x16xf32> to vector<4x8x16xf32>
    %111 = vector.shape_cast %110 : vector<4x8x16xf32> to vector<32x16xf32>
    %c0_100 = arith.constant 0 : index
    %c1_101 = arith.constant 1 : index
    %c0_102 = arith.constant 0 : index
    %112 = vector.load %arg9[%c0_100, %c1_101, %c0_102] : memref<5x9x16xf32, #tpu.memory_space<vmem>>, vector<4x8x16xf32>
    %113 = vector.shape_cast %112 : vector<4x8x16xf32> to vector<32x16xf32>
    %c0_103 = arith.constant 0 : index
    %c0_104 = arith.constant 0 : index
    %c0_105 = arith.constant 0 : index
    %c0_106 = arith.constant 0 : index
    %114 = vector.load %arg10[%c0_103, %c0_104, %c0_105, %c0_106] : memref<2x2x32x4xf32, #tpu.memory_space<vmem>>, vector<1x1x32x4xf32>
    %115 = vector.shape_cast %114 : vector<1x1x32x4xf32> to vector<32x4xf32>
    %c1_107 = arith.constant 1 : index
    %c0_108 = arith.constant 0 : index
    %c0_109 = arith.constant 0 : index
    %116 = vector.load %arg6[%c1_107, %c0_108, %c0_109] : memref<16x16x4xf32, #tpu.memory_space<vmem>>, vector<1x16x4xf32>
    %117 = vector.shape_cast %116 : vector<1x16x4xf32> to vector<16x4xf32>
    %cst_110 = arith.constant dense<0.000000e+00> : vector<32x4xf32>
    %118 = tpu.matmul %111, %117, %cst_110 {dimension_numbers = #tpu.dot_dimension_numbers<[1], [0], [0], [1], [0, 0, 1, 1], [], []>} : vector<32x16xf32>, vector<16x4xf32>, vector<32x4xf32> -> vector<32x4xf32>
    %c1_111 = arith.constant 1 : index
    %c0_112 = arith.constant 0 : index
    %c0_113 = arith.constant 0 : index
    %119 = vector.load %arg7[%c1_111, %c0_112, %c0_113] : memref<16x16x4xf32, #tpu.memory_space<vmem>>, vector<1x16x4xf32>
    %120 = vector.shape_cast %119 : vector<1x16x4xf32> to vector<16x4xf32>
    %cst_114 = arith.constant dense<0.000000e+00> : vector<32x4xf32>
    %121 = tpu.matmul %113, %120, %cst_114 {dimension_numbers = #tpu.dot_dimension_numbers<[1], [0], [0], [1], [0, 0, 1, 1], [], []>} : vector<32x16xf32>, vector<16x4xf32>, vector<32x4xf32> -> vector<32x4xf32>
    %122 = arith.addf %118, %121 : vector<32x4xf32>
    %123 = arith.addf %115, %122 : vector<32x4xf32>
    %c0_115 = arith.constant 0 : index
    %c0_116 = arith.constant 0 : index
    %c0_117 = arith.constant 0 : index
    %c0_118 = arith.constant 0 : index
    %124 = vector.load %arg10[%c0_115, %c0_116, %c0_117, %c0_118] : memref<2x2x32x4xf32, #tpu.memory_space<vmem>>, vector<1x1x32x4xf32>
    %125 = vector.shape_cast %124 : vector<1x1x32x4xf32> to vector<32x4xf32>
    %126 = vector.shape_cast %123 : vector<32x4xf32> to vector<1x1x32x4xf32>
    tpu.vector_store %arg10[%c0_115, %c0_116, %c0_117, %c0_118], %126 {strides = array<i32>} : memref<2x2x32x4xf32, #tpu.memory_space<vmem>>, vector<1x1x32x4xf32>,
    %c0_119 = arith.constant 0 : index
    %c1_120 = arith.constant 1 : index
    %c0_121 = arith.constant 0 : index
    %c0_122 = arith.constant 0 : index
    %127 = vector.load %arg10[%c0_119, %c1_120, %c0_121, %c0_122] : memref<2x2x32x4xf32, #tpu.memory_space<vmem>>, vector<1x1x32x4xf32>
    %128 = vector.shape_cast %127 : vector<1x1x32x4xf32> to vector<32x4xf32>
    %c5 = arith.constant 5 : index
    %c0_123 = arith.constant 0 : index
    %c0_124 = arith.constant 0 : index
    %129 = vector.load %arg6[%c5, %c0_123, %c0_124] : memref<16x16x4xf32, #tpu.memory_space<vmem>>, vector<1x16x4xf32>
    %130 = vector.shape_cast %129 : vector<1x16x4xf32> to vector<16x4xf32>
    %cst_125 = arith.constant dense<0.000000e+00> : vector<32x4xf32>
    %131 = tpu.matmul %111, %130, %cst_125 {dimension_numbers = #tpu.dot_dimension_numbers<[1], [0], [0], [1], [0, 0, 1, 1], [], []>} : vector<32x16xf32>, vector<16x4xf32>, vector<32x4xf32> -> vector<32x4xf32>
    %c5_126 = arith.constant 5 : index
    %c0_127 = arith.constant 0 : index
    %c0_128 = arith.constant 0 : index
    %132 = vector.load %arg7[%c5_126, %c0_127, %c0_128] : memref<16x16x4xf32, #tpu.memory_space<vmem>>, vector<1x16x4xf32>
    %133 = vector.shape_cast %132 : vector<1x16x4xf32> to vector<16x4xf32>
    %cst_129 = arith.constant dense<0.000000e+00> : vector<32x4xf32>
    %134 = tpu.matmul %113, %133, %cst_129 {dimension_numbers = #tpu.dot_dimension_numbers<[1], [0], [0], [1], [0, 0, 1, 1], [], []>} : vector<32x16xf32>, vector<16x4xf32>, vector<32x4xf32> -> vector<32x4xf32>
    %135 = arith.addf %131, %134 : vector<32x4xf32>
    %136 = arith.addf %128, %135 : vector<32x4xf32>
    %c0_130 = arith.constant 0 : index
    %c1_131 = arith.constant 1 : index
    %c0_132 = arith.constant 0 : index
    %c0_133 = arith.constant 0 : index
    %137 = vector.load %arg10[%c0_130, %c1_131, %c0_132, %c0_133] : memref<2x2x32x4xf32, #tpu.memory_space<vmem>>, vector<1x1x32x4xf32>
    %138 = vector.shape_cast %137 : vector<1x1x32x4xf32> to vector<32x4xf32>
    %139 = vector.shape_cast %136 : vector<32x4xf32> to vector<1x1x32x4xf32>
    tpu.vector_store %arg10[%c0_130, %c1_131, %c0_132, %c0_133], %139 {strides = array<i32>} : memref<2x2x32x4xf32, #tpu.memory_space<vmem>>, vector<1x1x32x4xf32>,
    %c1_134 = arith.constant 1 : index
    %c0_135 = arith.constant 0 : index
    %c0_136 = arith.constant 0 : index
    %c0_137 = arith.constant 0 : index
    %140 = vector.load %arg10[%c1_134, %c0_135, %c0_136, %c0_137] : memref<2x2x32x4xf32, #tpu.memory_space<vmem>>, vector<1x1x32x4xf32>
    %141 = vector.shape_cast %140 : vector<1x1x32x4xf32> to vector<32x4xf32>
    %c9 = arith.constant 9 : index
    %c0_138 = arith.constant 0 : index
    %c0_139 = arith.constant 0 : index
    %142 = vector.load %arg6[%c9, %c0_138, %c0_139] : memref<16x16x4xf32, #tpu.memory_space<vmem>>, vector<1x16x4xf32>
    %143 = vector.shape_cast %142 : vector<1x16x4xf32> to vector<16x4xf32>
    %cst_140 = arith.constant dense<0.000000e+00> : vector<32x4xf32>
    %144 = tpu.matmul %111, %143, %cst_140 {dimension_numbers = #tpu.dot_dimension_numbers<[1], [0], [0], [1], [0, 0, 1, 1], [], []>} : vector<32x16xf32>, vector<16x4xf32>, vector<32x4xf32> -> vector<32x4xf32>
    %c9_141 = arith.constant 9 : index
    %c0_142 = arith.constant 0 : index
    %c0_143 = arith.constant 0 : index
    %145 = vector.load %arg7[%c9_141, %c0_142, %c0_143] : memref<16x16x4xf32, #tpu.memory_space<vmem>>, vector<1x16x4xf32>
    %146 = vector.shape_cast %145 : vector<1x16x4xf32> to vector<16x4xf32>
    %cst_144 = arith.constant dense<0.000000e+00> : vector<32x4xf32>
    %147 = tpu.matmul %113, %146, %cst_144 {dimension_numbers = #tpu.dot_dimension_numbers<[1], [0], [0], [1], [0, 0, 1, 1], [], []>} : vector<32x16xf32>, vector<16x4xf32>, vector<32x4xf32> -> vector<32x4xf32>
    %148 = arith.addf %144, %147 : vector<32x4xf32>
    %149 = arith.addf %141, %148 : vector<32x4xf32>
    %c1_145 = arith.constant 1 : index
    %c0_146 = arith.constant 0 : index
    %c0_147 = arith.constant 0 : index
    %c0_148 = arith.constant 0 : index
    %150 = vector.load %arg10[%c1_145, %c0_146, %c0_147, %c0_148] : memref<2x2x32x4xf32, #tpu.memory_space<vmem>>, vector<1x1x32x4xf32>
    %151 = vector.shape_cast %150 : vector<1x1x32x4xf32> to vector<32x4xf32>
    %152 = vector.shape_cast %149 : vector<32x4xf32> to vector<1x1x32x4xf32>
    tpu.vector_store %arg10[%c1_145, %c0_146, %c0_147, %c0_148], %152 {strides = array<i32>} : memref<2x2x32x4xf32, #tpu.memory_space<vmem>>, vector<1x1x32x4xf32>,
    %c1_149 = arith.constant 1 : index
    %c1_150 = arith.constant 1 : index
    %c0_151 = arith.constant 0 : index
    %c0_152 = arith.constant 0 : index
    %153 = vector.load %arg10[%c1_149, %c1_150, %c0_151, %c0_152] : memref<2x2x32x4xf32, #tpu.memory_space<vmem>>, vector<1x1x32x4xf32>
    %154 = vector.shape_cast %153 : vector<1x1x32x4xf32> to vector<32x4xf32>
    %c13 = arith.constant 13 : index
    %c0_153 = arith.constant 0 : index
    %c0_154 = arith.constant 0 : index
    %155 = vector.load %arg6[%c13, %c0_153, %c0_154] : memref<16x16x4xf32, #tpu.memory_space<vmem>>, vector<1x16x4xf32>
    %156 = vector.shape_cast %155 : vector<1x16x4xf32> to vector<16x4xf32>
    %cst_155 = arith.constant dense<0.000000e+00> : vector<32x4xf32>
    %157 = tpu.matmul %111, %156, %cst_155 {dimension_numbers = #tpu.dot_dimension_numbers<[1], [0], [0], [1], [0, 0, 1, 1], [], []>} : vector<32x16xf32>, vector<16x4xf32>, vector<32x4xf32> -> vector<32x4xf32>
    %c13_156 = arith.constant 13 : index
    %c0_157 = arith.constant 0 : index
    %c0_158 = arith.constant 0 : index
    %158 = vector.load %arg7[%c13_156, %c0_157, %c0_158] : memref<16x16x4xf32, #tpu.memory_space<vmem>>, vector<1x16x4xf32>
    %159 = vector.shape_cast %158 : vector<1x16x4xf32> to vector<16x4xf32>
    %cst_159 = arith.constant dense<0.000000e+00> : vector<32x4xf32>
    %160 = tpu.matmul %113, %159, %cst_159 {dimension_numbers = #tpu.dot_dimension_numbers<[1], [0], [0], [1], [0, 0, 1, 1], [], []>} : vector<32x16xf32>, vector<16x4xf32>, vector<32x4xf32> -> vector<32x4xf32>
    %161 = arith.addf %157, %160 : vector<32x4xf32>
    %162 = arith.addf %154, %161 : vector<32x4xf32>
    %c1_160 = arith.constant 1 : index
    %c1_161 = arith.constant 1 : index
    %c0_162 = arith.constant 0 : index
    %c0_163 = arith.constant 0 : index
    %163 = vector.load %arg10[%c1_160, %c1_161, %c0_162, %c0_163] : memref<2x2x32x4xf32, #tpu.memory_space<vmem>>, vector<1x1x32x4xf32>
    %164 = vector.shape_cast %163 : vector<1x1x32x4xf32> to vector<32x4xf32>
    %165 = vector.shape_cast %162 : vector<32x4xf32> to vector<1x1x32x4xf32>
    tpu.vector_store %arg10[%c1_160, %c1_161, %c0_162, %c0_163], %165 {strides = array<i32>} : memref<2x2x32x4xf32, #tpu.memory_space<vmem>>, vector<1x1x32x4xf32>,
    %166 = vector.extract_strided_slice %53 {offsets = [1, 0, 0], sizes = [4, 8, 16], strides = [1, 1, 1]} : vector<5x9x16xf32> to vector<4x8x16xf32>
    %167 = vector.shape_cast %166 : vector<4x8x16xf32> to vector<32x16xf32>
    %c1_164 = arith.constant 1 : index
    %c0_165 = arith.constant 0 : index
    %c0_166 = arith.constant 0 : index
    %168 = vector.load %arg9[%c1_164, %c0_165, %c0_166] : memref<5x9x16xf32, #tpu.memory_space<vmem>>, vector<4x8x16xf32>
    %169 = vector.shape_cast %168 : vector<4x8x16xf32> to vector<32x16xf32>
    %c0_167 = arith.constant 0 : index
    %c0_168 = arith.constant 0 : index
    %c0_169 = arith.constant 0 : index
    %c0_170 = arith.constant 0 : index
    %170 = vector.load %arg10[%c0_167, %c0_168, %c0_169, %c0_170] : memref<2x2x32x4xf32, #tpu.memory_space<vmem>>, vector<1x1x32x4xf32>
    %171 = vector.shape_cast %170 : vector<1x1x32x4xf32> to vector<32x4xf32>
    %c2 = arith.constant 2 : index
    %c0_171 = arith.constant 0 : index
    %c0_172 = arith.constant 0 : index
    %172 = vector.load %arg6[%c2, %c0_171, %c0_172] : memref<16x16x4xf32, #tpu.memory_space<vmem>>, vector<1x16x4xf32>
    %173 = vector.shape_cast %172 : vector<1x16x4xf32> to vector<16x4xf32>
    %cst_173 = arith.constant dense<0.000000e+00> : vector<32x4xf32>
    %174 = tpu.matmul %167, %173, %cst_173 {dimension_numbers = #tpu.dot_dimension_numbers<[1], [0], [0], [1], [0, 0, 1, 1], [], []>} : vector<32x16xf32>, vector<16x4xf32>, vector<32x4xf32> -> vector<32x4xf32>
    %c2_174 = arith.constant 2 : index
    %c0_175 = arith.constant 0 : index
    %c0_176 = arith.constant 0 : index
    %175 = vector.load %arg7[%c2_174, %c0_175, %c0_176] : memref<16x16x4xf32, #tpu.memory_space<vmem>>, vector<1x16x4xf32>
    %176 = vector.shape_cast %175 : vector<1x16x4xf32> to vector<16x4xf32>
    %cst_177 = arith.constant dense<0.000000e+00> : vector<32x4xf32>
    %177 = tpu.matmul %169, %176, %cst_177 {dimension_numbers = #tpu.dot_dimension_numbers<[1], [0], [0], [1], [0, 0, 1, 1], [], []>} : vector<32x16xf32>, vector<16x4xf32>, vector<32x4xf32> -> vector<32x4xf32>
    %178 = arith.addf %174, %177 : vector<32x4xf32>
    %179 = arith.addf %171, %178 : vector<32x4xf32>
    %c0_178 = arith.constant 0 : index
    %c0_179 = arith.constant 0 : index
    %c0_180 = arith.constant 0 : index
    %c0_181 = arith.constant 0 : index
    %180 = vector.load %arg10[%c0_178, %c0_179, %c0_180, %c0_181] : memref<2x2x32x4xf32, #tpu.memory_space<vmem>>, vector<1x1x32x4xf32>
    %181 = vector.shape_cast %180 : vector<1x1x32x4xf32> to vector<32x4xf32>
    %182 = vector.shape_cast %179 : vector<32x4xf32> to vector<1x1x32x4xf32>
    tpu.vector_store %arg10[%c0_178, %c0_179, %c0_180, %c0_181], %182 {strides = array<i32>} : memref<2x2x32x4xf32, #tpu.memory_space<vmem>>, vector<1x1x32x4xf32>,
    %c0_182 = arith.constant 0 : index
    %c1_183 = arith.constant 1 : index
    %c0_184 = arith.constant 0 : index
    %c0_185 = arith.constant 0 : index
    %183 = vector.load %arg10[%c0_182, %c1_183, %c0_184, %c0_185] : memref<2x2x32x4xf32, #tpu.memory_space<vmem>>, vector<1x1x32x4xf32>
    %184 = vector.shape_cast %183 : vector<1x1x32x4xf32> to vector<32x4xf32>
    %c6 = arith.constant 6 : index
    %c0_186 = arith.constant 0 : index
    %c0_187 = arith.constant 0 : index
    %185 = vector.load %arg6[%c6, %c0_186, %c0_187] : memref<16x16x4xf32, #tpu.memory_space<vmem>>, vector<1x16x4xf32>
    %186 = vector.shape_cast %185 : vector<1x16x4xf32> to vector<16x4xf32>
    %cst_188 = arith.constant dense<0.000000e+00> : vector<32x4xf32>
    %187 = tpu.matmul %167, %186, %cst_188 {dimension_numbers = #tpu.dot_dimension_numbers<[1], [0], [0], [1], [0, 0, 1, 1], [], []>} : vector<32x16xf32>, vector<16x4xf32>, vector<32x4xf32> -> vector<32x4xf32>
    %c6_189 = arith.constant 6 : index
    %c0_190 = arith.constant 0 : index
    %c0_191 = arith.constant 0 : index
    %188 = vector.load %arg7[%c6_189, %c0_190, %c0_191] : memref<16x16x4xf32, #tpu.memory_space<vmem>>, vector<1x16x4xf32>
    %189 = vector.shape_cast %188 : vector<1x16x4xf32> to vector<16x4xf32>
    %cst_192 = arith.constant dense<0.000000e+00> : vector<32x4xf32>
    %190 = tpu.matmul %169, %189, %cst_192 {dimension_numbers = #tpu.dot_dimension_numbers<[1], [0], [0], [1], [0, 0, 1, 1], [], []>} : vector<32x16xf32>, vector<16x4xf32>, vector<32x4xf32> -> vector<32x4xf32>
    %191 = arith.addf %187, %190 : vector<32x4xf32>
    %192 = arith.addf %184, %191 : vector<32x4xf32>
    %c0_193 = arith.constant 0 : index
    %c1_194 = arith.constant 1 : index
    %c0_195 = arith.constant 0 : index
    %c0_196 = arith.constant 0 : index
    %193 = vector.load %arg10[%c0_193, %c1_194, %c0_195, %c0_196] : memref<2x2x32x4xf32, #tpu.memory_space<vmem>>, vector<1x1x32x4xf32>
    %194 = vector.shape_cast %193 : vector<1x1x32x4xf32> to vector<32x4xf32>
    %195 = vector.shape_cast %192 : vector<32x4xf32> to vector<1x1x32x4xf32>
    tpu.vector_store %arg10[%c0_193, %c1_194, %c0_195, %c0_196], %195 {strides = array<i32>} : memref<2x2x32x4xf32, #tpu.memory_space<vmem>>, vector<1x1x32x4xf32>,
    %c1_197 = arith.constant 1 : index
    %c0_198 = arith.constant 0 : index
    %c0_199 = arith.constant 0 : index
    %c0_200 = arith.constant 0 : index
    %196 = vector.load %arg10[%c1_197, %c0_198, %c0_199, %c0_200] : memref<2x2x32x4xf32, #tpu.memory_space<vmem>>, vector<1x1x32x4xf32>
    %197 = vector.shape_cast %196 : vector<1x1x32x4xf32> to vector<32x4xf32>
    %c10 = arith.constant 10 : index
    %c0_201 = arith.constant 0 : index
    %c0_202 = arith.constant 0 : index
    %198 = vector.load %arg6[%c10, %c0_201, %c0_202] : memref<16x16x4xf32, #tpu.memory_space<vmem>>, vector<1x16x4xf32>
    %199 = vector.shape_cast %198 : vector<1x16x4xf32> to vector<16x4xf32>
    %cst_203 = arith.constant dense<0.000000e+00> : vector<32x4xf32>
    %200 = tpu.matmul %167, %199, %cst_203 {dimension_numbers = #tpu.dot_dimension_numbers<[1], [0], [0], [1], [0, 0, 1, 1], [], []>} : vector<32x16xf32>, vector<16x4xf32>, vector<32x4xf32> -> vector<32x4xf32>
    %c10_204 = arith.constant 10 : index
    %c0_205 = arith.constant 0 : index
    %c0_206 = arith.constant 0 : index
    %201 = vector.load %arg7[%c10_204, %c0_205, %c0_206] : memref<16x16x4xf32, #tpu.memory_space<vmem>>, vector<1x16x4xf32>
    %202 = vector.shape_cast %201 : vector<1x16x4xf32> to vector<16x4xf32>
    %cst_207 = arith.constant dense<0.000000e+00> : vector<32x4xf32>
    %203 = tpu.matmul %169, %202, %cst_207 {dimension_numbers = #tpu.dot_dimension_numbers<[1], [0], [0], [1], [0, 0, 1, 1], [], []>} : vector<32x16xf32>, vector<16x4xf32>, vector<32x4xf32> -> vector<32x4xf32>
    %204 = arith.addf %200, %203 : vector<32x4xf32>
    %205 = arith.addf %197, %204 : vector<32x4xf32>
    %c1_208 = arith.constant 1 : index
    %c0_209 = arith.constant 0 : index
    %c0_210 = arith.constant 0 : index
    %c0_211 = arith.constant 0 : index
    %206 = vector.load %arg10[%c1_208, %c0_209, %c0_210, %c0_211] : memref<2x2x32x4xf32, #tpu.memory_space<vmem>>, vector<1x1x32x4xf32>
    %207 = vector.shape_cast %206 : vector<1x1x32x4xf32> to vector<32x4xf32>
    %208 = vector.shape_cast %205 : vector<32x4xf32> to vector<1x1x32x4xf32>
    tpu.vector_store %arg10[%c1_208, %c0_209, %c0_210, %c0_211], %208 {strides = array<i32>} : memref<2x2x32x4xf32, #tpu.memory_space<vmem>>, vector<1x1x32x4xf32>,
    %c1_212 = arith.constant 1 : index
    %c1_213 = arith.constant 1 : index
    %c0_214 = arith.constant 0 : index
    %c0_215 = arith.constant 0 : index
    %209 = vector.load %arg10[%c1_212, %c1_213, %c0_214, %c0_215] : memref<2x2x32x4xf32, #tpu.memory_space<vmem>>, vector<1x1x32x4xf32>
    %210 = vector.shape_cast %209 : vector<1x1x32x4xf32> to vector<32x4xf32>
    %c14 = arith.constant 14 : index
    %c0_216 = arith.constant 0 : index
    %c0_217 = arith.constant 0 : index
    %211 = vector.load %arg6[%c14, %c0_216, %c0_217] : memref<16x16x4xf32, #tpu.memory_space<vmem>>, vector<1x16x4xf32>
    %212 = vector.shape_cast %211 : vector<1x16x4xf32> to vector<16x4xf32>
    %cst_218 = arith.constant dense<0.000000e+00> : vector<32x4xf32>
    %213 = tpu.matmul %167, %212, %cst_218 {dimension_numbers = #tpu.dot_dimension_numbers<[1], [0], [0], [1], [0, 0, 1, 1], [], []>} : vector<32x16xf32>, vector<16x4xf32>, vector<32x4xf32> -> vector<32x4xf32>
    %c14_219 = arith.constant 14 : index
    %c0_220 = arith.constant 0 : index
    %c0_221 = arith.constant 0 : index
    %214 = vector.load %arg7[%c14_219, %c0_220, %c0_221] : memref<16x16x4xf32, #tpu.memory_space<vmem>>, vector<1x16x4xf32>
    %215 = vector.shape_cast %214 : vector<1x16x4xf32> to vector<16x4xf32>
    %cst_222 = arith.constant dense<0.000000e+00> : vector<32x4xf32>
    %216 = tpu.matmul %169, %215, %cst_222 {dimension_numbers = #tpu.dot_dimension_numbers<[1], [0], [0], [1], [0, 0, 1, 1], [], []>} : vector<32x16xf32>, vector<16x4xf32>, vector<32x4xf32> -> vector<32x4xf32>
    %217 = arith.addf %213, %216 : vector<32x4xf32>
    %218 = arith.addf %210, %217 : vector<32x4xf32>
    %c1_223 = arith.constant 1 : index
    %c1_224 = arith.constant 1 : index
    %c0_225 = arith.constant 0 : index
    %c0_226 = arith.constant 0 : index
    %219 = vector.load %arg10[%c1_223, %c1_224, %c0_225, %c0_226] : memref<2x2x32x4xf32, #tpu.memory_space<vmem>>, vector<1x1x32x4xf32>
    %220 = vector.shape_cast %219 : vector<1x1x32x4xf32> to vector<32x4xf32>
    %221 = vector.shape_cast %218 : vector<32x4xf32> to vector<1x1x32x4xf32>
    tpu.vector_store %arg10[%c1_223, %c1_224, %c0_225, %c0_226], %221 {strides = array<i32>} : memref<2x2x32x4xf32, #tpu.memory_space<vmem>>, vector<1x1x32x4xf32>,
    %222 = vector.extract_strided_slice %53 {offsets = [1, 1, 0], sizes = [4, 8, 16], strides = [1, 1, 1]} : vector<5x9x16xf32> to vector<4x8x16xf32>
    %223 = vector.shape_cast %222 : vector<4x8x16xf32> to vector<32x16xf32>
    %c1_227 = arith.constant 1 : index
    %c1_228 = arith.constant 1 : index
    %c0_229 = arith.constant 0 : index
    %224 = vector.load %arg9[%c1_227, %c1_228, %c0_229] : memref<5x9x16xf32, #tpu.memory_space<vmem>>, vector<4x8x16xf32>
    %225 = vector.shape_cast %224 : vector<4x8x16xf32> to vector<32x16xf32>
    %c0_230 = arith.constant 0 : index
    %c0_231 = arith.constant 0 : index
    %c0_232 = arith.constant 0 : index
    %c0_233 = arith.constant 0 : index
    %226 = vector.load %arg10[%c0_230, %c0_231, %c0_232, %c0_233] : memref<2x2x32x4xf32, #tpu.memory_space<vmem>>, vector<1x1x32x4xf32>
    %227 = vector.shape_cast %226 : vector<1x1x32x4xf32> to vector<32x4xf32>
    %c3 = arith.constant 3 : index
    %c0_234 = arith.constant 0 : index
    %c0_235 = arith.constant 0 : index
    %228 = vector.load %arg6[%c3, %c0_234, %c0_235] : memref<16x16x4xf32, #tpu.memory_space<vmem>>, vector<1x16x4xf32>
    %229 = vector.shape_cast %228 : vector<1x16x4xf32> to vector<16x4xf32>
    %cst_236 = arith.constant dense<0.000000e+00> : vector<32x4xf32>
    %230 = tpu.matmul %223, %229, %cst_236 {dimension_numbers = #tpu.dot_dimension_numbers<[1], [0], [0], [1], [0, 0, 1, 1], [], []>} : vector<32x16xf32>, vector<16x4xf32>, vector<32x4xf32> -> vector<32x4xf32>
    %c3_237 = arith.constant 3 : index
    %c0_238 = arith.constant 0 : index
    %c0_239 = arith.constant 0 : index
    %231 = vector.load %arg7[%c3_237, %c0_238, %c0_239] : memref<16x16x4xf32, #tpu.memory_space<vmem>>, vector<1x16x4xf32>
    %232 = vector.shape_cast %231 : vector<1x16x4xf32> to vector<16x4xf32>
    %cst_240 = arith.constant dense<0.000000e+00> : vector<32x4xf32>
    %233 = tpu.matmul %225, %232, %cst_240 {dimension_numbers = #tpu.dot_dimension_numbers<[1], [0], [0], [1], [0, 0, 1, 1], [], []>} : vector<32x16xf32>, vector<16x4xf32>, vector<32x4xf32> -> vector<32x4xf32>
    %234 = arith.addf %230, %233 : vector<32x4xf32>
    %235 = arith.addf %227, %234 : vector<32x4xf32>
    %c0_241 = arith.constant 0 : index
    %c0_242 = arith.constant 0 : index
    %c0_243 = arith.constant 0 : index
    %c0_244 = arith.constant 0 : index
    %236 = vector.load %arg10[%c0_241, %c0_242, %c0_243, %c0_244] : memref<2x2x32x4xf32, #tpu.memory_space<vmem>>, vector<1x1x32x4xf32>
    %237 = vector.shape_cast %236 : vector<1x1x32x4xf32> to vector<32x4xf32>
    %238 = vector.shape_cast %235 : vector<32x4xf32> to vector<1x1x32x4xf32>
    tpu.vector_store %arg10[%c0_241, %c0_242, %c0_243, %c0_244], %238 {strides = array<i32>} : memref<2x2x32x4xf32, #tpu.memory_space<vmem>>, vector<1x1x32x4xf32>,
    %c0_245 = arith.constant 0 : index
    %c1_246 = arith.constant 1 : index
    %c0_247 = arith.constant 0 : index
    %c0_248 = arith.constant 0 : index
    %239 = vector.load %arg10[%c0_245, %c1_246, %c0_247, %c0_248] : memref<2x2x32x4xf32, #tpu.memory_space<vmem>>, vector<1x1x32x4xf32>
    %240 = vector.shape_cast %239 : vector<1x1x32x4xf32> to vector<32x4xf32>
    %c7 = arith.constant 7 : index
    %c0_249 = arith.constant 0 : index
    %c0_250 = arith.constant 0 : index
    %241 = vector.load %arg6[%c7, %c0_249, %c0_250] : memref<16x16x4xf32, #tpu.memory_space<vmem>>, vector<1x16x4xf32>
    %242 = vector.shape_cast %241 : vector<1x16x4xf32> to vector<16x4xf32>
    %cst_251 = arith.constant dense<0.000000e+00> : vector<32x4xf32>
    %243 = tpu.matmul %223, %242, %cst_251 {dimension_numbers = #tpu.dot_dimension_numbers<[1], [0], [0], [1], [0, 0, 1, 1], [], []>} : vector<32x16xf32>, vector<16x4xf32>, vector<32x4xf32> -> vector<32x4xf32>
    %c7_252 = arith.constant 7 : index
    %c0_253 = arith.constant 0 : index
    %c0_254 = arith.constant 0 : index
    %244 = vector.load %arg7[%c7_252, %c0_253, %c0_254] : memref<16x16x4xf32, #tpu.memory_space<vmem>>, vector<1x16x4xf32>
    %245 = vector.shape_cast %244 : vector<1x16x4xf32> to vector<16x4xf32>
    %cst_255 = arith.constant dense<0.000000e+00> : vector<32x4xf32>
    %246 = tpu.matmul %225, %245, %cst_255 {dimension_numbers = #tpu.dot_dimension_numbers<[1], [0], [0], [1], [0, 0, 1, 1], [], []>} : vector<32x16xf32>, vector<16x4xf32>, vector<32x4xf32> -> vector<32x4xf32>
    %247 = arith.addf %243, %246 : vector<32x4xf32>
    %248 = arith.addf %240, %247 : vector<32x4xf32>
    %c0_256 = arith.constant 0 : index
    %c1_257 = arith.constant 1 : index
    %c0_258 = arith.constant 0 : index
    %c0_259 = arith.constant 0 : index
    %249 = vector.load %arg10[%c0_256, %c1_257, %c0_258, %c0_259] : memref<2x2x32x4xf32, #tpu.memory_space<vmem>>, vector<1x1x32x4xf32>
    %250 = vector.shape_cast %249 : vector<1x1x32x4xf32> to vector<32x4xf32>
    %251 = vector.shape_cast %248 : vector<32x4xf32> to vector<1x1x32x4xf32>
    tpu.vector_store %arg10[%c0_256, %c1_257, %c0_258, %c0_259], %251 {strides = array<i32>} : memref<2x2x32x4xf32, #tpu.memory_space<vmem>>, vector<1x1x32x4xf32>,
    %c1_260 = arith.constant 1 : index
    %c0_261 = arith.constant 0 : index
    %c0_262 = arith.constant 0 : index
    %c0_263 = arith.constant 0 : index
    %252 = vector.load %arg10[%c1_260, %c0_261, %c0_262, %c0_263] : memref<2x2x32x4xf32, #tpu.memory_space<vmem>>, vector<1x1x32x4xf32>
    %253 = vector.shape_cast %252 : vector<1x1x32x4xf32> to vector<32x4xf32>
    %c11 = arith.constant 11 : index
    %c0_264 = arith.constant 0 : index
    %c0_265 = arith.constant 0 : index
    %254 = vector.load %arg6[%c11, %c0_264, %c0_265] : memref<16x16x4xf32, #tpu.memory_space<vmem>>, vector<1x16x4xf32>
    %255 = vector.shape_cast %254 : vector<1x16x4xf32> to vector<16x4xf32>
    %cst_266 = arith.constant dense<0.000000e+00> : vector<32x4xf32>
    %256 = tpu.matmul %223, %255, %cst_266 {dimension_numbers = #tpu.dot_dimension_numbers<[1], [0], [0], [1], [0, 0, 1, 1], [], []>} : vector<32x16xf32>, vector<16x4xf32>, vector<32x4xf32> -> vector<32x4xf32>
    %c11_267 = arith.constant 11 : index
    %c0_268 = arith.constant 0 : index
    %c0_269 = arith.constant 0 : index
    %257 = vector.load %arg7[%c11_267, %c0_268, %c0_269] : memref<16x16x4xf32, #tpu.memory_space<vmem>>, vector<1x16x4xf32>
    %258 = vector.shape_cast %257 : vector<1x16x4xf32> to vector<16x4xf32>
    %cst_270 = arith.constant dense<0.000000e+00> : vector<32x4xf32>
    %259 = tpu.matmul %225, %258, %cst_270 {dimension_numbers = #tpu.dot_dimension_numbers<[1], [0], [0], [1], [0, 0, 1, 1], [], []>} : vector<32x16xf32>, vector<16x4xf32>, vector<32x4xf32> -> vector<32x4xf32>
    %260 = arith.addf %256, %259 : vector<32x4xf32>
    %261 = arith.addf %253, %260 : vector<32x4xf32>
    %c1_271 = arith.constant 1 : index
    %c0_272 = arith.constant 0 : index
    %c0_273 = arith.constant 0 : index
    %c0_274 = arith.constant 0 : index
    %262 = vector.load %arg10[%c1_271, %c0_272, %c0_273, %c0_274] : memref<2x2x32x4xf32, #tpu.memory_space<vmem>>, vector<1x1x32x4xf32>
    %263 = vector.shape_cast %262 : vector<1x1x32x4xf32> to vector<32x4xf32>
    %264 = vector.shape_cast %261 : vector<32x4xf32> to vector<1x1x32x4xf32>
    tpu.vector_store %arg10[%c1_271, %c0_272, %c0_273, %c0_274], %264 {strides = array<i32>} : memref<2x2x32x4xf32, #tpu.memory_space<vmem>>, vector<1x1x32x4xf32>,
    %c1_275 = arith.constant 1 : index
    %c1_276 = arith.constant 1 : index
    %c0_277 = arith.constant 0 : index
    %c0_278 = arith.constant 0 : index
    %265 = vector.load %arg10[%c1_275, %c1_276, %c0_277, %c0_278] : memref<2x2x32x4xf32, #tpu.memory_space<vmem>>, vector<1x1x32x4xf32>
    %266 = vector.shape_cast %265 : vector<1x1x32x4xf32> to vector<32x4xf32>
    %c15 = arith.constant 15 : index
    %c0_279 = arith.constant 0 : index
    %c0_280 = arith.constant 0 : index
    %267 = vector.load %arg6[%c15, %c0_279, %c0_280] : memref<16x16x4xf32, #tpu.memory_space<vmem>>, vector<1x16x4xf32>
    %268 = vector.shape_cast %267 : vector<1x16x4xf32> to vector<16x4xf32>
    %cst_281 = arith.constant dense<0.000000e+00> : vector<32x4xf32>
    %269 = tpu.matmul %223, %268, %cst_281 {dimension_numbers = #tpu.dot_dimension_numbers<[1], [0], [0], [1], [0, 0, 1, 1], [], []>} : vector<32x16xf32>, vector<16x4xf32>, vector<32x4xf32> -> vector<32x4xf32>
    %c15_282 = arith.constant 15 : index
    %c0_283 = arith.constant 0 : index
    %c0_284 = arith.constant 0 : index
    %270 = vector.load %arg7[%c15_282, %c0_283, %c0_284] : memref<16x16x4xf32, #tpu.memory_space<vmem>>, vector<1x16x4xf32>
    %271 = vector.shape_cast %270 : vector<1x16x4xf32> to vector<16x4xf32>
    %cst_285 = arith.constant dense<0.000000e+00> : vector<32x4xf32>
    %272 = tpu.matmul %225, %271, %cst_285 {dimension_numbers = #tpu.dot_dimension_numbers<[1], [0], [0], [1], [0, 0, 1, 1], [], []>} : vector<32x16xf32>, vector<16x4xf32>, vector<32x4xf32> -> vector<32x4xf32>
    %273 = arith.addf %269, %272 : vector<32x4xf32>
    %274 = arith.addf %266, %273 : vector<32x4xf32>
    %c1_286 = arith.constant 1 : index
    %c1_287 = arith.constant 1 : index
    %c0_288 = arith.constant 0 : index
    %c0_289 = arith.constant 0 : index
    %275 = vector.load %arg10[%c1_286, %c1_287, %c0_288, %c0_289] : memref<2x2x32x4xf32, #tpu.memory_space<vmem>>, vector<1x1x32x4xf32>
    %276 = vector.shape_cast %275 : vector<1x1x32x4xf32> to vector<32x4xf32>
    %277 = vector.shape_cast %274 : vector<32x4xf32> to vector<1x1x32x4xf32>
    tpu.vector_store %arg10[%c1_286, %c1_287, %c0_288, %c0_289], %277 {strides = array<i32>} : memref<2x2x32x4xf32, #tpu.memory_space<vmem>>, vector<1x1x32x4xf32>,
    %c0_290 = arith.constant 0 : index
    %c0_291 = arith.constant 0 : index
    %c0_292 = arith.constant 0 : index
    %c0_293 = arith.constant 0 : index
    %278 = vector.load %arg10[%c0_290, %c0_291, %c0_292, %c0_293] : memref<2x2x32x4xf32, #tpu.memory_space<vmem>>, vector<1x1x32x4xf32>
    %279 = vector.shape_cast %278 : vector<1x1x32x4xf32> to vector<32x4xf32>
    %cst_294 = arith.constant 0.000000e+00 : f32
    %280 = vector.broadcast %cst_294 : f32 to vector<32x4xf32>
    %281 = arith.maximumf %279, %280 : vector<32x4xf32>
    %282 = vector.shape_cast %281 : vector<32x4xf32> to vector<4x8x4xf32>
    %c0_295 = arith.constant 0 : index
    %c0_296 = arith.constant 0 : index
    %c0_297 = arith.constant 0 : index
    %c0_298 = arith.constant 0 : index
    %c0_299 = arith.constant 0 : index
    %283 = vector.load %arg8[%c0_295, %c0_296, %c0_297, %c0_298, %c0_299] : memref<1x4x2x8x8xf32, #tpu.memory_space<vmem>>, vector<1x4x1x8x4xf32>
    %284 = vector.shape_cast %283 : vector<1x4x1x8x4xf32> to vector<4x8x4xf32>
    %285 = vector.shape_cast %282 : vector<4x8x4xf32> to vector<1x4x1x8x4xf32>
    tpu.vector_store %arg8[%c0_295, %c0_296, %c0_297, %c0_298, %c0_299], %285 {strides = array<i32>} : memref<1x4x2x8x8xf32, #tpu.memory_space<vmem>>, vector<1x4x1x8x4xf32>,
    %c0_300 = arith.constant 0 : index
    %c1_301 = arith.constant 1 : index
    %c0_302 = arith.constant 0 : index
    %c0_303 = arith.constant 0 : index
    %286 = vector.load %arg10[%c0_300, %c1_301, %c0_302, %c0_303] : memref<2x2x32x4xf32, #tpu.memory_space<vmem>>, vector<1x1x32x4xf32>
    %287 = vector.shape_cast %286 : vector<1x1x32x4xf32> to vector<32x4xf32>
    %cst_304 = arith.constant 0.000000e+00 : f32
    %288 = vector.broadcast %cst_304 : f32 to vector<32x4xf32>
    %289 = arith.maximumf %287, %288 : vector<32x4xf32>
    %290 = vector.shape_cast %289 : vector<32x4xf32> to vector<4x8x4xf32>
    %c0_305 = arith.constant 0 : index
    %c0_306 = arith.constant 0 : index
    %c0_307 = arith.constant 0 : index
    %c0_308 = arith.constant 0 : index
    %c4_309 = arith.constant 4 : index
    %291 = vector.load %arg8[%c0_305, %c0_306, %c0_307, %c0_308, %c4_309] : memref<1x4x2x8x8xf32, #tpu.memory_space<vmem>>, vector<1x4x1x8x4xf32>
    %292 = vector.shape_cast %291 : vector<1x4x1x8x4xf32> to vector<4x8x4xf32>
    %293 = vector.shape_cast %290 : vector<4x8x4xf32> to vector<1x4x1x8x4xf32>
    tpu.vector_store %arg8[%c0_305, %c0_306, %c0_307, %c0_308, %c4_309], %293 {strides = array<i32>} : memref<1x4x2x8x8xf32, #tpu.memory_space<vmem>>, vector<1x4x1x8x4xf32>,
    %c1_310 = arith.constant 1 : index
    %c0_311 = arith.constant 0 : index
    %c0_312 = arith.constant 0 : index
    %c0_313 = arith.constant 0 : index
    %294 = vector.load %arg10[%c1_310, %c0_311, %c0_312, %c0_313] : memref<2x2x32x4xf32, #tpu.memory_space<vmem>>, vector<1x1x32x4xf32>
    %295 = vector.shape_cast %294 : vector<1x1x32x4xf32> to vector<32x4xf32>
    %cst_314 = arith.constant 0.000000e+00 : f32
    %296 = vector.broadcast %cst_314 : f32 to vector<32x4xf32>
    %297 = arith.maximumf %295, %296 : vector<32x4xf32>
    %298 = vector.shape_cast %297 : vector<32x4xf32> to vector<4x8x4xf32>
    %c0_315 = arith.constant 0 : index
    %c0_316 = arith.constant 0 : index
    %c1_317 = arith.constant 1 : index
    %c0_318 = arith.constant 0 : index
    %c0_319 = arith.constant 0 : index
    %299 = vector.load %arg8[%c0_315, %c0_316, %c1_317, %c0_318, %c0_319] : memref<1x4x2x8x8xf32, #tpu.memory_space<vmem>>, vector<1x4x1x8x4xf32>
    %300 = vector.shape_cast %299 : vector<1x4x1x8x4xf32> to vector<4x8x4xf32>
    %301 = vector.shape_cast %298 : vector<4x8x4xf32> to vector<1x4x1x8x4xf32>
    tpu.vector_store %arg8[%c0_315, %c0_316, %c1_317, %c0_318, %c0_319], %301 {strides = array<i32>} : memref<1x4x2x8x8xf32, #tpu.memory_space<vmem>>, vector<1x4x1x8x4xf32>,
    %c1_320 = arith.constant 1 : index
    %c1_321 = arith.constant 1 : index
    %c0_322 = arith.constant 0 : index
    %c0_323 = arith.constant 0 : index
    %302 = vector.load %arg10[%c1_320, %c1_321, %c0_322, %c0_323] : memref<2x2x32x4xf32, #tpu.memory_space<vmem>>, vector<1x1x32x4xf32>
    %303 = vector.shape_cast %302 : vector<1x1x32x4xf32> to vector<32x4xf32>
    %cst_324 = arith.constant 0.000000e+00 : f32
    %304 = vector.broadcast %cst_324 : f32 to vector<32x4xf32>
    %305 = arith.maximumf %303, %304 : vector<32x4xf32>
    %306 = vector.shape_cast %305 : vector<32x4xf32> to vector<4x8x4xf32>
    %c0_325 = arith.constant 0 : index
    %c0_326 = arith.constant 0 : index
    %c1_327 = arith.constant 1 : index
    %c0_328 = arith.constant 0 : index
    %c4_329 = arith.constant 4 : index
    %307 = vector.load %arg8[%c0_325, %c0_326, %c1_327, %c0_328, %c4_329] : memref<1x4x2x8x8xf32, #tpu.memory_space<vmem>>, vector<1x4x1x8x4xf32>
    %308 = vector.shape_cast %307 : vector<1x4x1x8x4xf32> to vector<4x8x4xf32>
    %309 = vector.shape_cast %306 : vector<4x8x4xf32> to vector<1x4x1x8x4xf32>
    tpu.vector_store %arg8[%c0_325, %c0_326, %c1_327, %c0_328, %c4_329], %309 {strides = array<i32>} : memref<1x4x2x8x8xf32, #tpu.memory_space<vmem>>, vector<1x4x1x8x4xf32>,
    return
  }
  func.func @transform_0(%arg0: i32, %arg1: i32) -> (i32, i32, i32, i32, i32) {
    %c0_i32 = arith.constant 0 : i32
    %c0_i32_0 = arith.constant 0 : i32
    %c0_i32_1 = arith.constant 0 : i32
    %c0_i32_2 = arith.constant 0 : i32
    return %arg0, %arg1, %c0_i32, %c0_i32_0, %c0_i32_1 : i32, i32, i32, i32, i32
  }
  func.func @transform_1(%arg0: i32, %arg1: i32) -> (i32, i32, i32, i32, i32) {
    %c0_i32 = arith.constant 0 : i32
    %c0_i32_0 = arith.constant 0 : i32
    %c0_i32_1 = arith.constant 0 : i32
    %c0_i32_2 = arith.constant 0 : i32
    return %arg0, %arg1, %c0_i32, %c0_i32_0, %c0_i32_1 : i32, i32, i32, i32, i32
  }
  func.func @transform_2(%arg0: i32, %arg1: i32) -> (i32, i32, i32) {
    %c0_i32 = arith.constant 0 : i32
    %c0_i32_0 = arith.constant 0 : i32
    %c0_i32_1 = arith.constant 0 : i32
    %c0_i32_2 = arith.constant 0 : i32
    return %c0_i32, %c0_i32_0, %c0_i32_1 : i32, i32, i32
  }
  func.func @transform_3(%arg0: i32, %arg1: i32) -> (i32, i32, i32) {
    %c0_i32 = arith.constant 0 : i32
    %c0_i32_0 = arith.constant 0 : i32
    %c0_i32_1 = arith.constant 0 : i32
    %c0_i32_2 = arith.constant 0 : i32
    return %c0_i32, %c0_i32_0, %c0_i32_1 : i32, i32, i32
  }
  func.func @transform_4(%arg0: i32, %arg1: i32) -> (i32, i32, i32) {
    %c0_i32 = arith.constant 0 : i32
    %c0_i32_0 = arith.constant 0 : i32
    %c0_i32_1 = arith.constant 0 : i32
    %c0_i32_2 = arith.constant 0 : i32
    return %c0_i32, %c0_i32_0, %c0_i32_1 : i32, i32, i32
  }
  func.func @transform_5(%arg0: i32, %arg1: i32) -> (i32, i32, i32) {
    %c0_i32 = arith.constant 0 : i32
    %c0_i32_0 = arith.constant 0 : i32
    %c0_i32_1 = arith.constant 0 : i32
    %c0_i32_2 = arith.constant 0 : i32
    return %c0_i32, %c0_i32_0, %c0_i32_1 : i32, i32, i32
  }
  func.func @transform_6(%arg0: i32, %arg1: i32) -> (i32, i32, i32, i32, i32) {
    %c0_i32 = arith.constant 0 : i32
    %c0_i32_0 = arith.constant 0 : i32
    %c0_i32_1 = arith.constant 0 : i32
    %c0_i32_2 = arith.constant 0 : i32
    return %arg0, %arg1, %c0_i32, %c0_i32_0, %c0_i32_1 : i32, i32, i32, i32, i32
  }
}

</mosaic_0001>

<bundles_post_ra>
// kernel: tpu_custom_call.1
= control target key start
LH: loop header
LB: loop body
LE: loop exit
PB: predicated region body
PF: predicated region fallthrough
CT: control target
= control target key end

     0   :  { %11 = vsyncpa [#allocation5], 0  ;;  %s8099_s0 = inlined_call_operand.vmem [shape: f32[2,2,6,10,8], index: 0, kind: input, shape index: {}]   ;;  %s8100_s1 = inlined_call_operand.vmem [shape: f32[2,2,5,9,16], index: 1, kind: input, shape index: {}]   ;;  %s8101_s2 = inlined_call_operand.vmem [shape: f32[2,8,8], index: 2, kind: input, shape index: {}]   ;;  %s8102_s3 = inlined_call_operand.vmem [shape: f32[1,1,8], index: 3, kind: input, shape index: {}]   ;;  %s8103_s4 = inlined_call_operand.vmem [shape: f32[16,16,4], index: 4, kind: input, shape index: {}]   ;;  %s8104_s5 = inlined_call_operand.vmem [shape: f32[16,16,4], index: 5, kind: input, shape index: {}]   ;;  %s8105_s6 = inlined_call_operand.hbm [shape: f32[2,8,2,8,8], index: 6, kind: output, shape index: {}]  }
   0x1   :  { %13 = vsyncpa [#allocation5 + $0x1], 0  ;;  %s6644_s21 = smov 0   ;;  %s6646_s22 = smov 0  }
   0x2   :  { %s6648_s23 = smov 0   ;;  %s6650_s24 = smov 0  }
   0x3   :  { %s6652_s25 = smov 0   ;;  %s6654_s26 = smov 0  }
   0x4   :  { %s6656_s27 = smov 0   ;;  %s6658_s28 = smov 0  }
   0x5 LB: > { %s5409_s29 = sadd.s32 4294967295, %s6595_s28   ;;  %s5410_s30 = sadd.s32 4294967294, %s6595_s28   ;;  %s6595_s28 = sphi %s6658_s28, %s19_s28   ;;  %s6591_s27 = sphi %s6656_s27, %s8158_s27   ;;  %s6587_s26 = sphi %s6654_s26, %s8157_s26   ;;  %s6583_s25 = sphi %s6652_s25, %s8156_s25   ;;  %s6579_s24 = sphi %s6650_s24, %s8155_s24   ;;  %s6575_s23 = sphi %s6648_s23, %s8154_s23   ;;  %s6571_s22 = sphi %s6646_s22, %s8153_s22   ;;  %s6567_s21 = sphi %s6644_s21, %s8152_s21  }
   0x6   : > { %s28_s7 = sadd.s32 1, %s6587_s26  ;;  %s31_s8 = sadd.s32 1, %s6591_s27 }
   0x7   : > { %p29_p0 = scmp.ge.s32.totalorder %s28_s7, 2  ;;  %p190_p1 = scmp.ne.s32.totalorder %s6575_s23, %s6571_s22 }
   0x8   : > { %p191_p2 = scmp.eq.s32.totalorder %s5409_s29, 3  ;;  %p196_p5 = scmp.ne.s32.totalorder %s6571_s22, %s6567_s21 }
   0x9   : > { %s8160_s7 = smov (%p29_p0, %s28_s7), 0  ;;  %s8162_s8 = smov (!%p29_p0, %s31_s8), %s6591_s27 }
   0xa   : > { %s176_s9 = ssub.s32 %s6587_s26, %s8160_s7  ;;  %p6695_p3 = por %p191_p2, %p190_p1 }
   0xb   : > { %p33_p4 = scmp.ge.s32.totalorder %s8162_s8, 2  ;;  %p197_p6 = scmp.eq.s32.totalorder %s5410_s30, 3 }
   0xc   : > { %p5413_p7 = scmp.ge.s32.totalorder %s6595_s28, 1  ;;  %p251_p9 = scmp.lt.s32.totalorder %s6595_s28, 5 }
   0xd   : > { %s8164_s8 = smov (%p33_p4, %s8162_s8), 0  ;;  %p6704_p8 = por %p197_p6, %p196_p5 }
   0xe   : > { %s175_s12 = ssub.s32 %s6591_s27, %s8164_s8  ;;  %s180_s13 = sadd.s32 1, %s6575_s23 }
   0xf   : > { %s177_s14 = sor.u32 %s176_s9, %s175_s12  ;;  %p252_p10 = pnand %p5413_p7, %p251_p9 }
  0x10   : > { %p178_p11 = scmp.eq.s32.totalorder %s177_s14, 0 }
  0x11   : > { %255 = sbr.rel (%p252_p10) target bundleno = 948 (0x3b4), region = 44 }
  0x12   : > { %s6713_s15 = scalar_select %p178_p11, %s6575_s23, %s180_s13  }
  0x18   : > { %v583_v0 = vld [vmem:[%s8101_s2] sm:$0xff]  ;;  %v5446_v1 = vld [vmem:[%s8101_s2 + $0x8] sm:$0xff]  ;;  %p294_p12 = scmp.lt.s32.totalorder %s6583_s25, 1  ;;  %p296_p13 = scmp.lt.s32.totalorder %s6579_s24, 1  ;;  %v341_v2 = vlaneseq  ;;  %v6597_v3 = vmov 1983009808  }
  0x19   : > { %5869 = vmatprep.subr.mxu0 %v583_v0  ;;  %5883 = vmatprep.subr.mxu1 %v5446_v1  ;;  %v339_v4 = vunpack.c.l.s4 %v6597_v3  ;;  %vm711_vm0 = vcmask 64512   ;;  %s5423_s18 = sshll.u32 %s6579_s24, 2  ;;  %s6605_s14 = smov 12  }
  0x1a   : > { %5870 = vmatpush3.msra.mxu0 %v583_v0  ;;  %s6724_s20 = scalar_select %p294_p12, %s6583_s25, 1  ;;  %5884 = vmatpush3.msra.mxu1 %v5446_v1  ;;  %v6729_v6 = vshrl.u32 %v341_v2, 7 }
  0x1b   : > { %s6727_s29 = scalar_select %p296_p13, %s6579_s24, 1  ;;  %v340_v5 = vunpack.c.0.s8 %v339_v4 }
  0x1c   : > { %8115 = vst [vmem:[#allocation7_spill] sm:$0xff] %v6729_v6  ;;  %s6410_s30 = smul.u32 24, %s6724_s20  ;;  %s5424_s19 = sadd.s32 4294967295, %s5423_s18  ;;  %vm510_vm8 = vcmp.ge.s32.totalorder %v6729_v6, 1 }
  0x1d   : > { %s6409_s9 = smul.u32 12, %s6727_s29  ;;  %v6734_v7 = vsub.s32 %v340_v5, %v6729_v6 }
  0x1f   : > { %s300_s12 = sadd.s32 %s6410_s30, %s6409_s9 }
  0x20   : > { %s5415_s13 = sshll.u32 %s300_s12, 3  ;;  %s6603_s12 = smov 4  }
  0x21   : > { %s6739_s17 = scalar_lea.vmem %s8099_s0, %s5415_s13  ;;  %s6604_s13 = smov 124  }
  0x22   : > { %v313_v8 = vld [vmem:[%s6739_s17] sm:$0xff]  ;;  %v315_v9 = vld [vmem:[%s6739_s17 + $0x10] sm:$0xff]  ;;  %v5417_v12 = vld.sshfl [vmem:[%s6739_s17 + $0x8] sm:$0x3 pattern:$0x76325410] }
  0x23   : > { %v337_v10 = vcombine.high %v313_v8, %v313_v8  ;;  %v344_v11 = vrot.slane %v313_v8, %v6734_v7  ;;  %v361_v13 = vcombine.high %v315_v9, %v315_v9  ;;  %v368_v14 = vrot.slane %v315_v9, %v6734_v7  ;;  %v317_v15 = vld [vmem:[%s6739_s17 + $0x20] sm:$0xff]  ;;  %v319_v16 = vld [vmem:[%s6739_s17 + $0x30] sm:$0xff]  ;;  %v5419_v18 = vld.sshfl [vmem:[%s6739_s17 + $0x28] sm:$0x3 pattern:$0x76325410] }
  0x24   : > { %v392_v17 = vrot.slane %v317_v15, %v6734_v7  ;;  %v385_v19 = vcombine.high %v317_v15, %v317_v15  ;;  %v416_v20 = vrot.slane %v319_v16, %v6734_v7  ;;  %v409_v21 = vcombine.high %v319_v16, %v319_v16  ;;  %v5418_v27 = vld.sshfl [vmem:[%s6739_s17 + $0x18] sm:$0x3 pattern:$0x76325410]  ;;  %v321_v39 = vld [vmem:[%s6739_s17 + $0x40] sm:$0xff]  ;;  %v323_v48 = vld [vmem:[%s6739_s17 + $0x50] sm:$0xff] }
  0x25   : > { %v351_v22 = vrot.slane %v337_v10, %v6734_v7  ;;  %v352_v23 = vcombine.high %v344_v11, %v344_v11  ;;  %v375_v24 = vrot.slane %v361_v13, %v6734_v7  ;;  %v376_v25 = vcombine.high %v368_v14, %v368_v14  ;;  %v5420_v52 = vld.sshfl [vmem:[%s6739_s17 + $0x38] sm:$0x3 pattern:$0x76325410] }
  0x26   : > { %v601_v26 = vcombine.low %v5417_v12, %v368_v14  ;;  %v400_v28 = vcombine.high %v392_v17, %v392_v17  ;;  %v399_v29 = vrot.slane %v385_v19, %v6734_v7  ;;  %v636_v30 = vcombine.low %v5419_v18, %v416_v20  ;;  %v5421_v1 = vld.sshfl [vmem:[%s6739_s17 + $0x48] sm:$0x3 pattern:$0x76325410] }
  0x27   : > { %v353_v31 = vcombine.high %v351_v22, %v351_v22  ;;  %v584_v32 = vcombine.low %v344_v11, %v352_v23  ;;  %v602_v33 = vcombine.low %v376_v25, %v375_v24  ;;  %v377_v34 = vcombine.high %v375_v24, %v375_v24  ;;  %v5422_v13 = vld.sshfl [vmem:[%s6739_s17 + $0x58] sm:$0x3 pattern:$0x76325410] }
  0x28   : > { %v609_v35 = vrot.slane %v601_v26, %v6734_v7  ;;  %v619_v36 = vcombine.low %v392_v17, %v400_v28  ;;  %v401_v37 = vcombine.high %v399_v29, %v399_v29  ;;  %v650_v38 = vrot.slane %v636_v30, %v6734_v7 }
  0x29   : > { %v585_v40 = vcombine.low %v351_v22, %v353_v31  ;;  %v592_v41 = vrot.slane %v584_v32, %v6734_v7  ;;  %v616_v42 = vrot.slane %v602_v33, %v6734_v7  ;;  %v618_v43 = vcombine.low %v377_v34, %v5418_v27  ;;  %v5445_v34 = vld [vmem:[%s8102_s3] ss:$0 sm:$0xff] }
  0x2a   : > { %v633_v44 = vrot.slane %v619_v36, %v6734_v7  ;;  %v635_v45 = vcombine.low %v399_v29, %v401_v37  ;;  %v423_v46 = vrot.slane %v409_v21, %v6734_v7  ;;  %v424_v47 = vcombine.high %v416_v20, %v416_v20 }
  0x2b   : > { %v599_v49 = vrot.slane %v585_v40, %v6734_v7  ;;  %v617_v50 = vcombine.low %v609_v35, %v616_v42  ;;  %v626_v51 = vrot.slane %v618_v43, %v6734_v7  ;;  %v433_v53 = vcombine.high %v321_v39, %v321_v39 }
  0x2c   : > { %v643_v54 = vrot.slane %v635_v45, %v6734_v7  ;;  %v425_v55 = vcombine.high %v423_v46, %v423_v46  ;;  %v652_v56 = vcombine.low %v424_v47, %v423_v46  ;;  %v440_v57 = vrot.slane %v321_v39, %v6734_v7 }
  0x2d   : > { %v600_v58 = vcombine.low %v592_v41, %v599_v49  ;;  %v634_v59 = vcombine.low %v626_v51, %v633_v44  ;;  %v447_v60 = vrot.slane %v433_v53, %v6734_v7  ;;  %v457_v61 = vcombine.high %v323_v48, %v323_v48 }
  0x2e   : > { %v653_v62 = vcombine.low %v425_v55, %v5420_v52  ;;  %v660_v63 = vrot.slane %v652_v56, %v6734_v7  ;;  %v448_v0 = vcombine.high %v440_v57, %v440_v57  ;;  %v464_v3 = vrot.slane %v323_v48, %v6734_v7 }
  0x2f   : > { %5871 = vmatprep.mubr.msk.f32.mxu0 %vm711_vm0, %v600_v58  ;;  %5885 = vmatprep.mubr.msk.f32.mxu1 %vm711_vm0, %v600_v58  ;;  %v449_v2 = vcombine.high %v447_v60, %v447_v60  ;;  %v471_v4 = vrot.slane %v457_v61, %v6734_v7  ;;  %v651_v5 = vcombine.low %v643_v54, %v650_v38  ;;  %v6797_v25 = vstv %s5424_s19 }
  0x30   : > { %5872 = vmatmul.mubr.msk.f32.vlgmr.msra.gmra.mrb[0].mxu0 %vm711_vm0, %v617_v50  ;;  %5886 = vmatmul.mubr.msk.f32.vlgmr.msra.gmra.mrb[0].mxu1 %vm711_vm0, %v617_v50  ;;  %v667_v8 = vrot.slane %v653_v62, %v6734_v7  ;;  %v669_v9 = vcombine.low %v440_v57, %v448_v0  ;;  %v472_v11 = vcombine.high %v464_v3, %v464_v3  ;;  %v484_v26 = vadd.s32 1, %v6797_v25 }
  0x31   : > { %5874 = vmatprep.mubr.msk.f32.mxu0 %vm711_vm0, %v634_v59  ;;  %5888 = vmatprep.mubr.msk.f32.mxu1 %vm711_vm0, %v634_v59  ;;  %v670_v10 = vcombine.low %v447_v60, %v449_v2  ;;  %v686_v12 = vcombine.low %v5421_v1, %v464_v3  ;;  %v473_v16 = vcombine.high %v471_v4, %v471_v4  ;;  %v485_v27 = vadd.s32 2, %v6797_v25 }
  0x32   : > { %v668_v14 = vcombine.low %v660_v63, %v667_v8  ;;  %v677_v15 = vrot.slane %v669_v9, %v6734_v7  ;;  %v687_v18 = vcombine.low %v472_v11, %v471_v4  ;;  %8116 = vst [vmem:[#allocation8_spill] sm:$0xff] %v6797_v25  ;;  %vm493_vm1 = vcmp.ge.s32.totalorder %v484_v26, 0 }
  0x33   : > { %v684_v17 = vrot.slane %v670_v10, %v6734_v7  ;;  %v694_v19 = vrot.slane %v686_v12, %v6734_v7  ;;  %v703_v20 = vcombine.low %v473_v16, %v5422_v13  ;;  %vm499_vm2 = vcmp.le.s32.totalorder %v484_v26, 7 }
  0x34   : > { %5875 = vmatmul.mubr.msk.f32.gmra.mrb[2].mxu0 %vm711_vm0, %v651_v5  ;;  %5889 = vmatmul.mubr.msk.f32.gmra.mrb[2].mxu1 %vm711_vm0, %v651_v5  ;;  %v701_v22 = vrot.slane %v687_v18, %v6734_v7  ;;  %v6598_v28 = vmov 842150450   ;;  %v6599_v30 = vmov 269488144   ;;  %vm492_vm3 = vcmp.ge.s32.totalorder %v6797_v25, 0  ;;  %vm6809_vm7 = vmand %vm493_vm1, %vm499_vm2 }
  0x35   : > { %5877 = vmatprep.mubr.msk.f32.mxu0 %vm711_vm0, %v668_v14  ;;  %v685_v21 = vcombine.low %v677_v15, %v684_v17  ;;  %5891 = vmatprep.mubr.msk.f32.mxu1 %vm711_vm0, %v668_v14  ;;  %v710_v24 = vrot.slane %v703_v20, %v6734_v7  ;;  %v1043_v29 = vunpack.c.l.s4 %v6598_v28  ;;  %v1036_v31 = vunpack.c.l.s4 %v6599_v30  ;;  %vm6829_vm11 = vmand %vm6809_vm7, %vm510_vm8 }
  0x36   : > { %v702_v23 = vcombine.low %v694_v19, %v701_v22  ;;  %vm498_vm4 = vcmp.le.s32.totalorder %v6797_v25, 7  ;;  %v6600_v32 = vmov 1414812756   ;;  %v6601_v35 = vmov 1987475062  }
  0x37   : > { %v1050_v33 = vunpack.c.l.s4 %v6600_v32  ;;  %v1057_v36 = vunpack.c.l.s4 %v6601_v35  ;;  %vm494_vm5 = vcmp.ge.s32.totalorder %v485_v27, 0  ;;  %vm500_vm6 = vcmp.le.s32.totalorder %v485_v27, 7  ;;  %vm6817_vm9 = vmand %vm492_vm3, %vm498_vm4 }
  0x38   : > { %5878 = vmatmul.mubr.msk.f32.gmra.mrb[4].mxu0 %vm711_vm0, %v685_v21  ;;  %5892 = vmatmul.mubr.msk.f32.gmra.mrb[4].mxu1 %vm711_vm0, %v685_v21  ;;  %v486_v37 = vadd.s32 3, %v6797_v25  ;;  %v6815_v39 = vadd.s32 8, %v6729_v6  ;;  %v1044_v40 = vunpack.c.0.s8 %v1043_v29  ;;  %v986_v42 = vcombine.high %v5445_v34, %v5445_v34  ;;  %vm6821_vm10 = vmand %vm494_vm5, %vm500_vm6 }
  0x39   : > { %5880 = vmatprep.mubr.msk.f32.mxu0 %vm711_vm0, %v702_v23  ;;  %5894 = vmatprep.mubr.msk.f32.mxu1 %vm711_vm0, %v702_v23  ;;  %v1037_v43 = vunpack.c.0.s8 %v1036_v31  ;;  %v1051_v46 = vunpack.c.0.s8 %v1050_v33  ;;  %v1058_v47 = vunpack.c.0.s8 %v1057_v36  ;;  %vm528_vm14 = vmand %vm6817_vm9, %vm510_vm8  ;;  %v6839_v50 = vrot.slane %v5445_v34, %v6734_v7 }
  0x3a   : > { %vm495_vm12 = vcmp.ge.s32.totalorder %v486_v37, 0  ;;  %vm501_vm13 = vcmp.le.s32.totalorder %v486_v37, 7  ;;  %vm541_vm15 = vcmp.le.s32.totalorder %v6815_v39, 8  ;;  %v6842_v51 = vsub.s32 %v1044_v40, %v6729_v6 }
  0x3b   : > { %v8106_v55 = vmov 0.0   ;;  %v6852_v57 = vrot.slane %v986_v42, %v6734_v7  ;;  %v6855_v58 = vsub.s32 %v1037_v43, %v6729_v6  ;;  %vm6859_vm1 = vmand %vm495_vm12, %vm501_vm13  ;;  %v6867_v61 = vsub.s32 %v1051_v46, %v6729_v6 }
  0x3c   : > { %5881 = vmatmul.mubr.msk.f32.gmra.mrb[6].mxu0 %vm711_vm0, %v710_v24  ;;  %5895 = vmatmul.mubr.msk.f32.gmra.mrb[6].mxu1 %vm711_vm0, %v710_v24  ;;  %vm532_vm0 = vmand %vm6821_vm10, %vm510_vm8  ;;  %v5427_v56 = vsel %vm6829_vm11, 1.0, %v8106_v55  ;;  %v6864_v60 = vsel %vm528_vm14, 1.0, %v8106_v55  ;;  %v6870_v62 = vsub.s32 %v1058_v47, %v6729_v6  ;;  %v6891_v4 = vcombine.high %v6839_v50, %v6839_v50 }
  0x3d   : > { %vm6876_vm2 = vmand %vm6817_vm9, %vm541_vm15  ;;  %v5429_v1 = vsel %vm532_vm0, 1.0, %v8106_v55  ;;  %v6894_v5 = vrot.slane %v5427_v56, %v6855_v58  ;;  %v6897_v8 = vrot.slane %v5427_v56, %v6842_v51  ;;  %v6910_v12 = vcombine.high %v6852_v57, %v6852_v57 }
  0x3e   : > { %vm551_vm3 = vmand %vm6821_vm10, %vm541_vm15  ;;  %v6919_v15 = vsel %vm6876_vm2, 1.0, %v8106_v55  ;;  %v6926_v18 = vrot.slane %v5429_v1, %v6867_v61  ;;  %v6938_v29 = vrot.slane %v5429_v1, %v6870_v62  ;;  %v1055_v34 = vrot.slane %v5427_v56, %v6867_v61 }
  0x3f   : > { %vm534_vm4 = vmand %vm6859_vm1, %vm510_vm8  ;;  %v5430_v19 = vsel %vm551_vm3, 1.0, %v8106_v55  ;;  %v1062_v35 = vrot.slane %v5427_v56, %v6870_v62  ;;  %v488_v36 = vadd.s32 5, %v6797_v25  ;;  %v6951_v37 = vrot.slane %v5429_v1, %v6855_v58 }
  0x40   : > { %v5431_v24 = vsel %vm534_vm4, 1.0, %v8106_v55  ;;  %v6954_v40 = vrot.slane %v5429_v1, %v6842_v51  ;;  %v6960_v42 = vrot.slane %v5430_v19, %v6855_v58  ;;  %vm549_vm5 = vmand %vm6809_vm7, %vm541_vm15  ;;  %vm1774_vm11 = vcmask 31744  }
  0x41   : > { %v6957_v41 = vrot.slane %v5431_v24, %v6855_v58  ;;  %v6967_v46 = vrot.slane %v5431_v24, %v6842_v51  ;;  %v6986_v1 = vsel %vm549_vm5, 1.0, %v8106_v55  ;;  %vm497_vm6 = vcmp.ge.s32.totalorder %v488_v36, 0  ;;  %vm553_vm12 = vmand %vm6859_vm1, %vm541_vm15 }
  0x42   : > { %vm503_vm7 = vcmp.le.s32.totalorder %v488_v36, 7  ;;  %vm1818_vm3 = vcmask 58400   ;;  %vm1816_vm4 = vcmask 64545   ;;  %vm2003_vm5 = vcmask 97344  }
  0x43   : > { %vm7038_vm9 = vmand %vm497_vm6, %vm503_vm7  ;;  %vm2045_vm6 = vcmask 130145   ;;  %vm2005_vm7 = vcmask 90176  }
  0x44   : > { %vm7066_vm10 = vmand %vm7038_vm9, %vm510_vm8 }
 0x103   : > { %v5887_v48 = vpop.f32.mrb[0].mxu1  ;;  %v5873_v49 = vpop.f32.mrb[0].mxu0 }
 0x104   : > { %v839_v52 = vcombine.high %v5873_v49, %v5873_v49  ;;  %v1328_v53 = vpop.f32.mrb[1].mxu1  ;;  %v794_v54 = vpop.f32.mrb[1].mxu0  ;;  %v1390_v0 = vcombine.high %v5887_v48, %v5887_v48  ;;  %v1397_v20 = vrot.slane %v5887_v48, %v6734_v7  ;;  %v846_v22 = vrot.slane %v5873_v49, %v6734_v7 }
 0x105   : > { %v1373_v28 = vcombine.high %v1328_v53, %v1328_v53  ;;  %v1380_v33 = vrot.slane %v1328_v53, %v6734_v7  ;;  %v6974_v53 = vrot.slane %v5431_v24, %v6867_v61  ;;  %v6977_v54 = vrot.slane %v5431_v24, %v6870_v62 }
 0x106   : > { %v853_v9 = vrot.slane %v839_v52, %v6734_v7  ;;  %v1404_v21 = vrot.slane %v1390_v0, %v6734_v7  ;;  %v1405_v43 = vcombine.high %v1397_v20, %v1397_v20  ;;  %v854_v45 = vcombine.high %v846_v22, %v846_v22 }
 0x107   : > { %v6881_v2 = vpop.f32.mrb[2].mxu0  ;;  %v6883_v3 = vpop.f32.mrb[2].mxu1  ;;  %v1387_v52 = vrot.slane %v1373_v28, %v6734_v7  ;;  %v1388_v63 = vcombine.high %v1380_v33, %v1380_v33  ;;  %v1511_v19 = vadd.f32 %v1397_v20, %v6839_v50  ;;  %v1507_v22 = vadd.f32 %v1380_v33, %v6839_v50 }
 0x108   : > { %v6900_v10 = vpop.f32.mrb[3].mxu0  ;;  %v6902_v11 = vpop.f32.mrb[3].mxu1  ;;  %v855_v27 = vcombine.high %v853_v9, %v853_v9  ;;  %v1406_v44 = vcombine.high %v1404_v21, %v1404_v21  ;;  %v873_v0 = vcombine.high %v6881_v2, %v6881_v2  ;;  %v1513_v28 = vadd.f32 %v1404_v21, %v6891_v4 }
 0x109   : > { %v6992_v24 = vrot.slane %v6900_v10, %v6734_v7  ;;  %v1000_v17 = vadd.f32 %v6839_v50, %v854_v45  ;;  %v1001_v55 = vadd.f32 %v6891_v4, %v853_v9  ;;  %v1389_v16 = vcombine.high %v1387_v52, %v1387_v52 }
 0x10a   : > { %v1002_v49 = vadd.f32 %v6852_v57, %v855_v27  ;;  %v1512_v27 = vadd.f32 %v1405_v43, %v6839_v50  ;;  %v1508_v13 = vadd.f32 %v1388_v63, %v6891_v4  ;;  %v880_v14 = vrot.slane %v6881_v2, %v6734_v7 }
 0x10b   : > { %v6932_v23 = vpop.f32.mrb[4].mxu0  ;;  %v6935_v26 = vpop.f32.mrb[4].mxu1  ;;  %v1003_v20 = vadd.f32 %v6910_v12, %v6992_v24  ;;  %v887_v43 = vrot.slane %v873_v0, %v6734_v7  ;;  %v7009_v21 = vrot.slane %v6902_v11, %v6734_v7  ;;  %v1424_v9 = vcombine.high %v6883_v3, %v6883_v3 }
 0x10c   : > { %8129 = vst [vmem:[#allocation9_spill] sm:$0xff] %v6932_v23  ;;  %8130 = vst [vmem:[#allocation10_spill] sm:$0xff] %v6935_v26  ;;  %v6942_v31 = vpop.f32.mrb[5].mxu0  ;;  %v6944_v32 = vpop.f32.mrb[5].mxu1  ;;  %v7001_v33 = vmul.f32 %v1055_v34, %v1002_v49  ;;  %v856_v45 = vcombine.high %v6900_v10, %v6900_v10  ;;  %v7020_v63 = vmul.f32 %v1512_v27, %v6894_v5  ;;  %v8132_v27 = vmov 0 }
 0x10d   : > { %v7017_v49 = vmul.f32 %v1062_v35, %v1003_v20  ;;  %v889_v2 = vcombine.high %v887_v43, %v887_v43  ;;  %v1515_v0 = vadd.f32 %v7009_v21, %v6910_v12  ;;  %v7030_v26 = vmul.f32 %v6894_v5, %v1000_v17 }
 0x10e   : > { %v1407_v10 = vcombine.high %v6902_v11, %v6902_v11  ;;  %v8133_v27 = vsel %vm7038_vm9, 4294967295, %v8132_v27  ;;  %v1438_v17 = vrot.slane %v1424_v9, %v6734_v7  ;;  %v8135_v11 = vrot.slane %v6919_v15, %v6855_v58 }
 0x10f   : > { %v6969_v47 = vpop.f32.mrb[6].mxu0  ;;  %v5896_v48 = vpop.f32.mrb[6].mxu1  ;;  %8134 = vst [vmem:[#allocation12_spill] sm:$0xff] %v8133_v27  ;;  %v7046_v5 = vmul.f32 %v1515_v0, %v1062_v35  ;;  %v1510_v23 = vadd.f32 %v1389_v16, %v6910_v12  ;;  %v8139_v15 = vrot.slane %v6864_v60, %v6855_v58  ;;  %v897_v35 = vrot.slane %v6942_v31, %v6734_v7 }
 0x110   : > { %v6979_v38 = vpop.f32.mrb[7].mxu0  ;;  %v6981_v56 = vpop.f32.mrb[7].mxu1  ;;  %v1514_v48 = vadd.f32 %v1406_v44, %v6852_v57  ;;  %v1431_v44 = vrot.slane %v6883_v3, %v6734_v7  ;;  %v870_v3 = vrot.slane %v856_v45, %v6734_v7  ;;  %v1578_v36 = vmul.f32 %v8135_v11, %v1511_v19 }
 0x111   : > { %8131 = vst [vmem:[#allocation11_spill] sm:$0xff] %v6981_v56  ;;  %v7027_v56 = vmul.f32 %v1513_v28, %v6897_v8  ;;  %v1509_v28 = vadd.f32 %v1387_v52, %v6852_v57  ;;  %v1010_v52 = vadd.f32 %v6839_v50, %v889_v2  ;;  %v1574_v16 = vmul.f32 %v8139_v15, %v1507_v22 }
 0x112   : > { %v7024_v30 = vmul.f32 %v1514_v48, %v1055_v34  ;;  %v7043_v34 = vmul.f32 %v6897_v8, %v1001_v55  ;;  %v888_v48 = vcombine.high %v880_v14, %v880_v14  ;;  %v1439_v20 = vcombine.high %v1431_v44, %v1431_v44 }
 0x113   : > { %v8136_v55 = vrot.slane %v6864_v60, %v6842_v51  ;;  %v1440_v19 = vcombine.high %v1438_v17, %v1438_v17  ;;  %v1647_v45 = vrot.slane %v1578_v36, %v6734_v7  ;;  %v8140_v2 = vrot.slane %v6864_v60, %v6867_v61 }
 0x114   : > { %v1007_v11 = vadd.f32 %v6852_v57, %v880_v14  ;;  %v1008_v27 = vadd.f32 %v6910_v12, %v888_v48  ;;  %v1520_v22 = vadd.f32 %v1439_v20, %v6910_v12  ;;  %v872_v15 = vcombine.high %v870_v3, %v870_v3 }
 0x115   : > { %v7057_v8 = vmul.f32 %v8136_v55, %v1508_v13  ;;  %v1421_v13 = vrot.slane %v1407_v10, %v6734_v7  ;;  %v1576_v0 = vmul.f32 %v8140_v2, %v1509_v28  ;;  %v1519_v55 = vadd.f32 %v1431_v44, %v6852_v57  ;;  %1788 = vrot.lane.b32.xlu1 %v1647_v45, %s6603_s12 }
 0x116   : > { %1746 = vrot.lane.b32.xlu0 %v1647_v45, %s6604_s13  ;;  %v8141_v10 = vmov 0.0   ;;  %v8142_v44 = vrot.slane %v6864_v60, %v6870_v62  ;;  %v1011_v20 = vadd.f32 %v6891_v4, %v897_v35  ;;  %v7097_v36 = vmul.f32 %v6957_v41, %v1010_v52 }
 0x117   : > { %v7089_v14 = vsel %vm7066_vm10, 1.0, %v8141_v10  ;;  %v1624_v48 = vcombine.low %v1574_v16, %v7057_v8  ;;  %v1009_v2 = vadd.f32 %v6839_v50, %v887_v43  ;;  %v1522_v45 = vadd.f32 %v1440_v19, %v6839_v50  ;;  %2057 = vst.msk [vmem:[#allocation3] sm:$0xff] %vm1774_vm11, %v8141_v10  ;;  %2058 = vst.msk [vmem:[#allocation3 + $0x8] sm:$0xff] %vm1774_vm11, %v8141_v10 }
 0x118   : > { %v1577_v28 = vmul.f32 %v8142_v44, %v1510_v23  ;;  %v1423_v6 = vcombine.high %v1421_v13, %v1421_v13  ;;  %v890_v9 = vcombine.high %v6942_v31, %v6942_v31  ;;  %v1242_v25 = vmul.f32 %v6926_v18, %v1007_v11  ;;  %2059 = vst.msk [vmem:[#allocation3 + $0x10] sm:$0xff] %vm1774_vm11, %v8141_v10 }
 0x119   : > { %v1521_v60 = vadd.f32 %v1438_v17, %v6839_v50  ;;  %v1586_v23 = vmul.f32 %v1519_v55, %v6926_v18  ;;  %v7107_v8 = vmul.f32 %v6967_v46, %v1011_v20  ;;  %v1243_v52 = vmul.f32 %v6938_v29, %v1008_v27  ;;  %2060 = vst.msk [vmem:[#allocation3 + $0x18] sm:$0xff] %vm1774_vm11, %v8141_v10 }
 0x11a   : > { %v1587_v16 = vmul.f32 %v1520_v22, %v6938_v29  ;;  %v1005_v43 = vadd.f32 %v6839_v50, %v870_v3  ;;  %v1006_v19 = vadd.f32 %v6891_v4, %v872_v15  ;;  %v1422_v31 = vcombine.high %v7009_v21, %v7009_v21  ;;  %2061 = vst.msk [vmem:[#allocation3 + $0x20] sm:$0xff] %vm1774_vm11, %v8141_v10 }
 0x11b   : > { %v1441_v18 = vcombine.high %v6944_v32, %v6944_v32  ;;  %v1448_v17 = vrot.slane %v6944_v32, %v6734_v7  ;;  %v1517_v27 = vadd.f32 %v1421_v13, %v6839_v50  ;;  %v1518_v29 = vadd.f32 %v1423_v6, %v6891_v4  ;;  %2062 = vst.msk [vmem:[#allocation3 + $0x28] sm:$0xff] %vm1774_vm11, %v8141_v10 }
 0x11c   : > { %v7124_v3 = vrot.slane %v890_v9, %v6734_v7  ;;  %v7127_v55 = vmul.f32 %v1522_v45, %v6957_v41  ;;  %v1244_v44 = vmul.f32 %v6960_v42, %v1009_v2  ;;  %v1878_v20 = vcombine.low %v1242_v25, %v1243_v52  ;;  %2063 = vst.msk [vmem:[#allocation3 + $0x30] sm:$0xff] %vm1774_vm11, %v8141_v10 }
 0x11d   : > { %v7130_v21 = vrot.slane %v1441_v18, %v6734_v7  ;;  %v1456_v22 = vcombine.high %v1448_v17, %v1448_v17  ;;  %v1523_v15 = vadd.f32 %v1448_v17, %v6891_v4  ;;  %v1673_v32 = vcombine.low %v1586_v23, %v1587_v16  ;;  %2064 = vst.msk [vmem:[#allocation3 + $0x38] sm:$0xff] %vm1774_vm11, %v8141_v10 }
 0x11e   : > { %v1240_v13 = vmul.f32 %v6951_v37, %v1005_v43  ;;  %v1625_v11 = vcombine.low %v1576_v0, %v1577_v28  ;;  %v1241_v6 = vmul.f32 %v6954_v40, %v1006_v19  ;;  %v7137_v9 = vadd.f32 %v1422_v31, %v6839_v50  ;;  %2065 = vst.msk [vmem:[#allocation3 + $0x40] sm:$0xff] %vm1774_vm11, %v8141_v10 }
 0x11f   : > { %v905_v41 = vcombine.high %v897_v35, %v897_v35  ;;  %v7140_v45 = vmul.f32 %v1523_v15, %v6967_v46  ;;  %v1584_v18 = vmul.f32 %v1517_v27, %v6951_v37  ;;  %v1585_v17 = vmul.f32 %v1518_v29, %v6954_v40  ;;  %2066 = vst.msk [vmem:[#allocation3 + $0x48] sm:$0xff] %vm1774_vm11, %v8141_v10 }
 0x120   : > { %v1524_v2 = vadd.f32 %v1456_v22, %v6852_v57  ;;  %v1900_v25 = vrot.slane %v1244_v44, %v6734_v7  ;;  %v1013_v0 = vadd.f32 %v6910_v12, %v7124_v3  ;;  %v1525_v28 = vadd.f32 %v7130_v21, %v6910_v12  ;;  %2067 = vst.msk [vmem:[#allocation3 + $0x50] sm:$0xff] %vm1774_vm11, %v8141_v10 }
 0x121   : > { %v1696_v35 = vcombine.low %v7127_v55, %v7140_v45  ;;  %v1632_v46 = vrot.slane %v1624_v48, %v6734_v7  ;;  %v1639_v37 = vrot.slane %v1625_v11, %v6734_v7  ;;  %v1588_v40 = vmul.f32 %v1521_v60, %v6960_v42  ;;  %2068 = vst.msk [vmem:[#allocation3 + $0x58] sm:$0xff] %vm1774_vm11, %v8141_v10 }
 0x122   : > { %1979 = vrot.lane.b32.xlu1 %v1900_v25, %s6603_s12  ;;  %v1648_v23 = vcombine.low %v7020_v63, %v7027_v56  ;;  %v8143_v52 = vcombine.low %v7024_v30, %v7046_v5  ;;  %v1012_v43 = vadd.f32 %v6852_v57, %v905_v41  ;;  %v1853_v19 = vcombine.low %v7030_v26, %v7043_v34 }
 0x123   : > { %v8144_v48 = vcombine.low %v7001_v33, %v7017_v49  ;;  %v1877_v11 = vcombine.low %v1240_v13, %v1241_v6  ;;  %v1591_v42 = vmul.f32 %v1524_v2, %v6974_v53  ;;  %v1640_v60 = vcombine.low %v1632_v46, %v1639_v37  ;;  %2069 = vst.msk [vmem:[#allocation3 + $0x60] sm:$0xff] %vm1774_vm11, %v8141_v10 }
 0x124   : > { %v1663_v16 = vrot.slane %v8143_v52, %v6734_v7  ;;  %v1695_v56 = vrot.slane %v1588_v40, %v6734_v7  ;;  %v1656_v63 = vrot.slane %v1648_v23, %v6734_v7  ;;  %v1592_v30 = vmul.f32 %v1525_v28, %v6977_v54  ;;  %2070 = vst.msk [vmem:[#allocation3 + $0x68] sm:$0xff] %vm1774_vm11, %v8141_v10 }
 0x125   : > { %v1868_v31 = vrot.slane %v8144_v48, %v6734_v7  ;;  %v1861_v5 = vrot.slane %v1853_v19, %v6734_v7  ;;  %v1885_v27 = vrot.slane %v1877_v11, %v6734_v7  ;;  %v1892_v26 = vrot.slane %v1878_v20, %v6734_v7  ;;  %1744 = vrot.lane.b32.xlu0 %v1640_v60, %s6604_s13 }
 0x126   : > { %1754 = vrot.lane.b32.xlu1 %v1695_v56, %s6604_s13  ;;  %v7178_v33 = vcombine.low %v1656_v63, %v1663_v16  ;;  %v1672_v49 = vcombine.low %v1584_v18, %v1585_v17  ;;  %v1687_v34 = vrot.slane %v1673_v32, %v6734_v7  ;;  %v1247_v29 = vmul.f32 %v6974_v53, %v1012_v43 }
 0x127   : > { %v1248_v55 = vmul.f32 %v6977_v54, %v1013_v0  ;;  %v7183_v22 = vcombine.low %v1861_v5, %v1868_v31  ;;  %v7185_v15 = vcombine.low %v1885_v27, %v1892_v26  ;;  %2071 = vst.msk [vmem:[#allocation3 + $0x70] sm:$0xff] %vm1774_vm11, %v8141_v10  ;;  %2072 = vst.msk [vmem:[#allocation3 + $0x78] sm:$0xff] %vm1774_vm11, %v8141_v10  ;;  %v5432_v5 = vsel %vm553_vm12, 1.0, %v8141_v10  ;;  %v8146_v26 = vld [vmem:[#allocation8_spill] sm:$0xff] }
 0x128   : > { %v1680_v53 = vrot.slane %v1672_v49, %v6734_v7  ;;  %v7222_v54 = vrot.slane %v6969_v47, %v6734_v7  ;;  %v924_v44 = vcombine.high %v6979_v38, %v6979_v38  ;;  %v7228_v20 = vrot.slane %v6979_v38, %v6734_v7 }
 0x129   : > { %v1069_v32 = vrot.slane %v6986_v1, %v6855_v58  ;;  %v1202_v13 = vrot.slane %v7089_v14, %v6870_v62  ;;  %v1181_v6 = vrot.slane %v7089_v14, %v6855_v58  ;;  %v1697_v41 = vcombine.low %v1591_v42, %v1592_v30  ;;  %1786 = vrot.lane.b32.xlu0 %v1640_v60, %s6603_s12 }
 0x12a   : > { %2021 = vrot.lane.b32.xlu1 %v1900_v25, %s6605_s14  ;;  %v7238_v47 = vcombine.low %v1680_v53, %v1687_v34  ;;  %v1023_v38 = vadd.f32 %v6910_v12, %v7222_v54  ;;  %v1704_v45 = vrot.slane %v1696_v35, %v6734_v7  ;;  %v938_v1 = vrot.slane %v924_v44, %v6734_v7  ;;  %v2094_v53 = vld [vmem:[%s8104_s5 + $0x8] sm:$0xff]  ;;  %v5465_v44 = vld [vmem:[%s8104_s5 + $0x40] sm:$0xff] }
 0x12b   : > { %v939_v18 = vcombine.high %v7228_v20, %v7228_v20  ;;  %v1188_v17 = vrot.slane %v7089_v14, %v6842_v51  ;;  %v1711_v2 = vrot.slane %v1697_v41, %v6734_v7  ;;  %v871_v25 = vcombine.high %v6992_v24, %v6992_v24  ;;  %v5466_v41 = vld [vmem:[%s8104_s5 + $0x48] sm:$0xff] }
 0x12c   : > { %v1583_v0 = vmul.f32 %v7137_v9, %v1069_v32  ;;  %v1902_v28 = vcombine.low %v1247_v29, %v1248_v55  ;;  %v940_v46 = vcombine.high %v938_v1, %v938_v1  ;;  %v1021_v35 = vadd.f32 %v6891_v4, %v938_v1  ;;  %v8147_v29 = vld [vmem:[#allocation9_spill] sm:$0xff] }
 0x12d   : > { %v1020_v37 = vadd.f32 %v6839_v50, %v939_v18  ;;  %v1195_v40 = vrot.slane %v7089_v14, %v6867_v61  ;;  %1790 = vrot.lane.b32.xlu0 %v7178_v33, %s6603_s12  ;;  %v7259_v23 = vcombine.low %v1704_v45, %v1711_v2  ;;  %v8145_v24 = vcombine.low %v7097_v36, %v7107_v8 }
 0x12e   : > { %1796 = vrot.lane.b32.xlu1 %v1695_v56, %s6603_s12  ;;  %v1916_v52 = vrot.slane %v1902_v28, %v6734_v7  ;;  %v1258_v16 = vmul.f32 %v1202_v13, %v1023_v38  ;;  %v1022_v43 = vadd.f32 %v6852_v57, %v940_v46  ;;  %v1256_v48 = vmul.f32 %v1188_v17, %v1021_v35  ;;  %v8149_v28 = vld [vmem:[#allocation10_spill] sm:$0xff] }
 0x12f   : > { %v1909_v9 = vrot.slane %v8145_v24, %v6734_v7  ;;  %v1255_v19 = vmul.f32 %v1181_v6, %v1020_v37  ;;  %v1004_v14 = vadd.f32 %v6839_v50, %v871_v25  ;;  %v1671_v31 = vrot.slane %v1583_v0, %v6734_v7 }
 0x130   : > { %v1257_v42 = vmul.f32 %v1195_v40, %v1022_v43  ;;  %v1457_v30 = vcombine.high %v7130_v21, %v7130_v21  ;;  %v487_v49 = vadd.s32 4, %v8146_v26  ;;  %v1139_v21 = vrot.slane %v5432_v5, %v6855_v58 }
 0x131   : > { %v7269_v11 = vcombine.low %v1909_v9, %v1916_v52  ;;  %1973 = vrot.lane.b32.xlu0 %v7183_v22, %s6603_s12  ;;  %v1949_v36 = vcombine.low %v1255_v19, %v1256_v48  ;;  %v1239_v60 = vmul.f32 %v1069_v32, %v1004_v14  ;;  %v907_v55 = vcombine.high %v8147_v29, %v8147_v29 }
 0x132   : > { %1750 = vrot.lane.b32.xlu1 %v1671_v31, %s6604_s13  ;;  %v1950_v8 = vcombine.low %v1257_v42, %v1258_v16  ;;  %v1526_v34 = vadd.f32 %v1457_v30, %v6839_v50  ;;  %vm496_vm13 = vcmp.ge.s32.totalorder %v487_v49, 0  ;;  %vm502_vm14 = vcmp.le.s32.totalorder %v487_v49, 7 }
 0x133   : > { %v1957_v56 = vrot.slane %v1949_v36, %v6734_v7  ;;  %v1876_v59 = vrot.slane %v1239_v60, %v6734_v7  ;;  %v906_v32 = vcombine.high %v7124_v3, %v7124_v3  ;;  %vm508_vm0 = vmand %vm496_vm13, %vm502_vm14  ;;  %v6225_v38 = vpack.c.bf16 %v5466_v41, %v5465_v44 }
 0x134   : > { %v1964_v63 = vrot.slane %v1950_v8, %v6734_v7  ;;  %v1593_v13 = vmul.f32 %v1526_v34, %v1139_v21  ;;  %v914_v45 = vrot.slane %v8147_v29, %v6734_v7  ;;  %v921_v1 = vrot.slane %v907_v55, %v6734_v7  ;;  %vm555_vm1 = vmand %vm508_vm0, %vm541_vm15 }
 0x135   : > { %2015 = vrot.lane.b32.xlu0 %v7183_v22, %s6605_s14  ;;  %v2093_v22 = vld [vmem:[%s8104_s5] sm:$0xff]  ;;  %6226 = vmatprep.subr.bf16.mxu1 %v6225_v38  ;;  %v1014_v3 = vadd.f32 %v6839_v50, %v906_v32  ;;  %vm536_vm2 = vmand %vm508_vm0, %vm510_vm8  ;;  %v5434_v2 = vsel %vm555_vm1, 1.0, %v8141_v10  ;;  %v1458_v46 = vcombine.high %v8149_v28, %v8149_v28  ;;  %v1465_v24 = vrot.slane %v8149_v28, %v6734_v7 }
 0x136   : > { %1792 = vrot.lane.b32.xlu1 %v1671_v31, %s6603_s12  ;;  %v7286_v27 = vcombine.low %v1957_v56, %v1964_v63  ;;  %v6217_v6 = vpack.c.bf16 %v2094_v53, %v2093_v22  ;;  %v1719_v18 = vrot.slane %v1593_v13, %v6734_v7  ;;  %6228 = vmatpush3.bf16.msra.mxu1 %v6225_v38  ;;  %v5433_v37 = vsel %vm536_vm2, 1.0, %v8141_v10  ;;  %vm557_vm8 = vmand %vm7038_vm9, %vm541_vm15 }
 0x137   : > { %v922_v25 = vcombine.high %v914_v45, %v914_v45  ;;  %v923_v0 = vcombine.high %v921_v1, %v921_v1  ;;  %v1249_v35 = vmul.f32 %v1139_v21, %v1014_v3  ;;  %v1015_v40 = vadd.f32 %v6839_v50, %v914_v45  ;;  %v5464_v21 = vld [vmem:[%s8103_s4 + $0x48] sm:$0xff]  ;;  %v2091_v3 = vld [vmem:[%s8103_s4] sm:$0xff] }
 0x138   : > { %6218 = vmatprep.subr.bf16.mxu0 %v6217_v6  ;;  %v1017_v52 = vadd.f32 %v6852_v57, %v921_v1  ;;  %v1146_v43 = vrot.slane %v5433_v37, %v6855_v58  ;;  %v1160_v19 = vrot.slane %v5433_v37, %v6867_v61  ;;  %v1167_v48 = vrot.slane %v5433_v37, %v6870_v62  ;;  %v8150_v61 = vld [vmem:[#allocation11_spill] sm:$0xff] }
 0x139   : > { %1977 = vrot.lane.b32.xlu0 %v7185_v15, %s6603_s12  ;;  %6220 = vmatpush3.bf16.msra.mxu0 %v6217_v6  ;;  %v1016_v9 = vadd.f32 %v6891_v4, %v922_v25  ;;  %v1018_v16 = vadd.f32 %v6910_v12, %v923_v0  ;;  %v1924_v31 = vrot.slane %v1249_v35, %v6734_v7  ;;  %v5436_v1 = vsel %vm557_vm8, 1.0, %v8141_v10 }
 0x13a   : > { %1975 = vrot.lane.b32.xlu1 %v1876_v59, %s6603_s12  ;;  %v1250_v42 = vmul.f32 %v1146_v43, %v1015_v40  ;;  %v1473_v36 = vcombine.high %v1465_v24, %v1465_v24  ;;  %v1252_v60 = vmul.f32 %v1160_v19, %v1017_v52  ;;  %v1481_v62 = vrot.slane %v8150_v61, %v6734_v7 }
 0x13b   : > { %v1253_v56 = vmul.f32 %v1167_v48, %v1018_v16  ;;  %v1527_v30 = vadd.f32 %v1465_v24, %v6839_v50  ;;  %v948_v41 = vcombine.high %v7222_v54, %v7222_v54  ;;  %vm1776_vm15 = vcmask 24576  }
 0x13c   : > { %v1528_v5 = vadd.f32 %v1473_v36, %v6891_v4  ;;  %v1531_v4 = vadd.f32 %v1481_v62, %v6839_v50  ;;  %vm2047_vm9 = vcmask 124000   ;;  %vm2095_vm10 = vcmask 130048   ;;  %v5489_v36 = vld [vmem:[%s8104_s5 + $0xc0] sm:$0xff] }
 0x13d   : > { %1752 = vrot.lane.b32.xlu0 %v7238_v47, %s6604_s13  ;;  %v1926_v34 = vcombine.low %v1252_v60, %v1253_v56  ;;  %v1024_v54 = vadd.f32 %v6839_v50, %v948_v41  ;;  %v5477_v60 = vld [vmem:[%s8104_s5 + $0x80] sm:$0xff]  ;;  %v5478_v56 = vld [vmem:[%s8104_s5 + $0x88] sm:$0xff]  ;;  %vm2869_vm12 = vcmask 1046528   ;;  %vm5240_vm13 = vcmask 64544  }
 0x13e   : > { %2017 = vrot.lane.b32.xlu1 %v1876_v59, %s6605_s14  ;;  %v7458_v62 = vpack.c.bf16 %v5478_v56, %v5477_v60  ;;  %v5488_v41 = vld [vmem:[%s8103_s4 + $0xc8] sm:$0xff] }
 0x13f   : > { %v1940_v44 = vrot.slane %v1926_v34, %v6734_v7 }
 0x141   : > { %2019 = vrot.lane.b32.xlu0 %v7185_v15, %s6605_s14  ;;  %v1174_v15 = vrot.slane %v5434_v2, %v6855_v58  ;;  %v1209_v2 = vrot.slane %v5436_v1, %v6855_v58 }
 0x142   : > { %1748 = vrot.lane.b32.xlu1 %v7178_v33, %s6604_s13  ;;  %v1019_v33 = vadd.f32 %v6839_v50, %v7228_v20  ;;  %v1153_v20 = vrot.slane %v5433_v37, %v6842_v51 }
 0x143   : > { %v1598_v32 = vmul.f32 %v1531_v4, %v1174_v15  ;;  %v1259_v0 = vmul.f32 %v1209_v2, %v1024_v54  ;;  %v5513_v2 = vld [vmem:[%s8104_s5 + $0x50] sm:$0xff] }
 0x144   : > { %v1254_v14 = vmul.f32 %v1174_v15, %v1019_v33  ;;  %v1251_v8 = vmul.f32 %v1153_v20, %v1016_v9 }
 0x145   : > { %1794 = vrot.lane.b32.xlu0 %v7238_v47, %s6603_s12  ;;  %v1472_v47 = vrot.slane %v1458_v46, %v6734_v7  ;;  %v1743_v39 = vrot.slane %v1598_v32, %v6734_v7  ;;  %v1972_v50 = vrot.slane %v1259_v0, %v6734_v7  ;;  %v5501_v0 = vld [vmem:[%s8104_s5 + $0x10] sm:$0xff] }
 0x146   : > { %1758 = vrot.lane.b32.xlu1 %v1719_v18, %s6604_s13  ;;  %v1948_v51 = vrot.slane %v1254_v14, %v6734_v7  ;;  %v1925_v26 = vcombine.low %v1250_v42, %v1251_v8  ;;  %v5490_v8 = vld [vmem:[%s8104_s5 + $0xc8] sm:$0xff] }
 0x147   : > { %v1474_v63 = vcombine.high %v1472_v47, %v1472_v47  ;;  %v1529_v49 = vadd.f32 %v1472_v47, %v6852_v57  ;;  %v1594_v57 = vmul.f32 %v1527_v30, %v1146_v43  ;;  %v7456_v61 = vpack.c.bf16 %v5490_v8, %v5489_v36 }
 0x148   : > { %v1933_v53 = vrot.slane %v1925_v26, %v6734_v7 }
 0x149   : > { %1756 = vrot.lane.b32.xlu0 %v7259_v23, %s6604_s13  ;;  %v1530_v59 = vadd.f32 %v1474_v63, %v6910_v12  ;;  %v1595_v12 = vmul.f32 %v1528_v5, %v1153_v20  ;;  %v1596_v55 = vmul.f32 %v1529_v49, %v1160_v19 }
 0x14a   : > { %1800 = vrot.lane.b32.xlu1 %v1719_v18, %s6603_s12  ;;  %v1941_v38 = vcombine.low %v1933_v53, %v1940_v44 }
 0x14b   : > { %v1597_v22 = vmul.f32 %v1530_v59, %v1167_v48  ;;  %v1720_v6 = vcombine.low %v1594_v57, %v1595_v12 }
 0x14d   : > { %1798 = vrot.lane.b32.xlu0 %v7259_v23, %s6603_s12  ;;  %v5463_v23 = vld [vmem:[%s8103_s4 + $0x40] sm:$0xff]  ;;  %v1721_v45 = vcombine.low %v1596_v55, %v1597_v22  ;;  %v1728_v10 = vrot.slane %v1720_v6, %v6734_v7 }
 0x14e   : > { %1983 = vrot.lane.b32.xlu1 %v1924_v31, %s6603_s12  ;;  %v7372_v29 = vpack.c.bf16 %v5464_v21, %v5463_v23  ;;  %v5487_v6 = vld [vmem:[%s8103_s4 + $0xc0] sm:$0xff] }
 0x14f   : > { %v1735_v17 = vrot.slane %v1721_v45, %v6734_v7  ;;  %v5476_v45 = vld [vmem:[%s8103_s4 + $0x88] sm:$0xff] }
 0x150   : > { %6230 = vmatprep.subr.bf16.mxu1 %v7372_v29 }
 0x151   : > { %1981 = vrot.lane.b32.xlu0 %v7269_v11, %s6603_s12  ;;  %v1736_v25 = vcombine.low %v1728_v10, %v1735_v17 }
 0x152   : > { %1987 = vrot.lane.b32.xlu1 %v1948_v51, %s6603_s12 }
 0x155   : > { %2023 = vrot.lane.b32.xlu0 %v7269_v11, %s6605_s14  ;;  %v2092_v11 = vld [vmem:[%s8103_s4 + $0x8] sm:$0xff] }
 0x156   : > { %2025 = vrot.lane.b32.xlu1 %v1924_v31, %s6605_s14  ;;  %v7396_v18 = vpack.c.bf16 %v2092_v11, %v2091_v3 }
 0x158   : > { %6222 = vmatprep.subr.bf16.mxu0 %v7396_v18 }
 0x159   : > { %1985 = vrot.lane.b32.xlu0 %v1941_v38, %s6603_s12 }
 0x15a   : > { %2029 = vrot.lane.b32.xlu1 %v1948_v51, %s6605_s14 }
 0x15d   : > { %2027 = vrot.lane.b32.xlu0 %v1941_v38, %s6605_s14  ;;  %v5475_v38 = vld [vmem:[%s8103_s4 + $0x80] sm:$0xff] }
 0x15e   : > { %1762 = vrot.lane.b32.xlu1 %v1743_v39, %s6604_s13  ;;  %v6237_v54 = vpack.c.bf16 %v5476_v45, %v5475_v38  ;;  %v5560_v38 = vld [vmem:[%s8103_s4 + $0x68] sm:$0xff]  ;;  %v5547_v45 = vld [vmem:[%s8103_s4 + $0x20] sm:$0xff] }
 0x161   : > { %1760 = vrot.lane.b32.xlu0 %v1736_v25, %s6604_s13  ;;  %s6411_s13 = smul.u32 10, %s6727_s29  ;;  %s5654_s29 = sshll.u32 %s6583_s25, 4 }
 0x162   : > { %1804 = vrot.lane.b32.xlu1 %v1743_v39, %s6603_s12 }
 0x165   : > { %1802 = vrot.lane.b32.xlu0 %v1736_v25, %s6603_s12  ;;  %v5514_v25 = vld [vmem:[%s8104_s5 + $0x58] sm:$0xff] }
 0x166   : > { %1991 = vrot.lane.b32.xlu1 %v1972_v50, %s6603_s12 }
 0x169   : > { %1989 = vrot.lane.b32.xlu0 %v7286_v27, %s6603_s12 }
 0x16a   : > { %2033 = vrot.lane.b32.xlu1 %v1972_v50, %s6605_s14  ;;  %v5502_v50 = vld [vmem:[%s8104_s5 + $0x18] sm:$0xff] }
 0x16d   : > { %2031 = vrot.lane.b32.xlu0 %v7286_v27, %s6605_s14  ;;  %s6412_s14 = smul.u32 20, %s6724_s20 }
 0x16f   : > { %s309_s30 = sadd.s32 %s6412_s14, %s6411_s13  ;;  %s291_s14 = sand.u32 1, %s6571_s22  }
 0x170   : > { %s5416_s20 = sshll.u32 %s309_s30, 3  ;;  %s5414_s30 = sshll.u32 %s291_s14, 6 }
 0x171   : > { %s7491_s16 = scalar_lea.vmem %s8100_s1, %s5416_s20  ;;  %s7986_s20 = scalar_lea.vmem [#allocation4], %s5414_s30 }
 0x172   : > { %v7496_v53 = vld [vmem:[%s7491_s16] sm:$0xff]  ;;  %v7523_v1 = vld [vmem:[%s7491_s16 + $0x10] sm:$0xff]  ;;  %s5303_s17 = sshll.u32 %s7986_s20, 4  ;;  %s8047_s25 = scalar_lea.sflag [#allocation5], %s291_s14  ;;  %s8034_s17 = int_to_ptr.vmem [resolvable:$true] %s5303_s17 }
 0x173   : > { %v7526_v3 = vld [vmem:[%s7491_s16 + $0x20] sm:$0xff]  ;;  %v7538_v10 = vld [vmem:[%s7491_s16 + $0x30] sm:$0xff]  ;;  %v2873_v36 = vrot.slane %v7523_v1, 1  ;;  %s6501_s13 = scalar_lea.vmem %s8034_s17, 1024  ;;  %s6606_s30 = smov [#allocation4]  }
 0x174   : > { %v2876_v56 = vrot.slane %v7526_v3, 1  ;;  %p6502_p0 = scmp.ne.s32.totalorder %s8034_s17, %s6501_s13 }
 0x176   : > { %p6503_p1 = pnand %p6502_p0, %p6695_p3 }
 0x178   : > { %p6504_p2 = pneg %p6503_p1 }
 0x187   : > { %v1789_v28 = vpop.permute.xlu1 %1788 }
 0x188   : > { %v1747_v58 = vpop.permute.xlu0 %1746 }
 0x189   : > { %1777 = vst.msk [vmem:[#allocation2 + $0x8] sm:$0x1] %vm1776_vm15, %v1747_v58  ;;  %v6257_v58 = vpack.c.bf16 %v5514_v25, %v5513_v2  ;;  %v5573_v2 = vld [vmem:[%s8104_s5 + $0xa0] sm:$0xff]  ;;  %v5574_v25 = vld [vmem:[%s8104_s5 + $0xa8] sm:$0xff] }
 0x194   : > { %v1980_v46 = vpop.permute.xlu1 %1979 }
 0x197   : > { %v1745_v7 = vpop.permute.xlu0 %1744 }
 0x198   : > { %v1755_v37 = vpop.permute.xlu1 %1754  ;;  %1775 = vst.msk [vmem:[#allocation2] sm:$0xff] %vm1774_vm11, %v1745_v7  ;;  %v5512_v7 = vld [vmem:[%s8103_s4 + $0x58] sm:$0xff] }
 0x199   : > { %1781 = vst.msk [vmem:[#allocation2 + $0x28] sm:$0x1] %vm1776_vm15, %v1755_v37  ;;  %v5499_v37 = vld [vmem:[%s8103_s4 + $0x10] sm:$0xff] }
 0x19a   : > { %1819 = vst.msk [vmem:[#allocation2 + $0x7] sm:$0x3] %vm1818_vm3, %v1789_v28  ;;  %v6249_v28 = vpack.c.bf16 %v5502_v50, %v5501_v0  ;;  %v6297_v50 = vpack.c.bf16 %v5574_v25, %v5573_v2  ;;  %v2489_v25 = vld [vmem:[#allocation3 + $0x48] sm:$0xff] }
 0x19b   : > { %v1787_v33 = vpop.permute.xlu0 %1786 }
 0x19c   : > { %v2022_v15 = vpop.permute.xlu1 %2021  ;;  %1817 = vst.msk [vmem:[#allocation2 - $0x1] sm:$0xfe] %vm1816_vm4, %v1787_v33  ;;  %v5500_v33 = vld [vmem:[%s8103_s4 + $0x18] sm:$0xff] }
 0x19f   : > { %v1791_v27 = vpop.permute.xlu0 %1790 }
 0x1a0   : > { %v1797_v35 = vpop.permute.xlu1 %1796 }
 0x1a3   : > { %v1974_v40 = vpop.permute.xlu0 %1973 }
 0x1a4   : > { %v1751_v24 = vpop.permute.xlu1 %1750  ;;  %2004 = vst.msk [vmem:[#allocation2] sm:$0xff] %vm2003_vm5, %v1974_v40  ;;  %v5537_v40 = vld [vmem:[%s8104_s5 + $0xd0] sm:$0xff] }
 0x1a5   : > { %1779 = vst.msk [vmem:[#allocation2 + $0x18] sm:$0x1] %vm1776_vm15, %v1751_v24  ;;  %v5538_v24 = vld [vmem:[%s8104_s5 + $0xd8] sm:$0xff] }
 0x1a7   : > { %v2016_v9 = vpop.permute.xlu0 %2015 }
 0x1a8   : > { %v1793_v52 = vpop.permute.xlu1 %1792  ;;  %2046 = vst.msk [vmem:[#allocation2 - $0x1] sm:$0xfe] %vm2045_vm6, %v2016_v9 }
 0x1ab   : > { %v1978_v16 = vpop.permute.xlu0 %1977 }
 0x1ac   : > { %v1976_v47 = vpop.permute.xlu1 %1975 }
 0x1ad   : > { %2006 = vst.msk [vmem:[#allocation2 + $0x8] sm:$0x1] %vm2005_vm7, %v1976_v47  ;;  %v2870_v47 = vrot.slane %v7496_v53, 1 }
 0x1af   : > { %v1753_v43 = vpop.permute.xlu0 %1752 }
 0x1b0   : > { %v2018_v20 = vpop.permute.xlu1 %2017  ;;  %1780 = vst.msk [vmem:[#allocation2 + $0x20] sm:$0xff] %vm1774_vm11, %v1753_v43 }
 0x1b1   : > { %2048 = vst.msk [vmem:[#allocation2 + $0x7] sm:$0x3] %vm2047_vm9, %v2018_v20  ;;  %v2076_v20 = vld [vmem:[%s7491_s16 + $0x18] sm:$0x1] }
 0x1b2   : > { %1823 = vst.msk [vmem:[#allocation2 + $0x27] sm:$0x3] %vm1818_vm3, %v1797_v35  ;;  %v2074_v35 = vld [vmem:[%s7491_s16 + $0x8] sm:$0x1]  ;;  %v2874_v8 = vrot.slane %v2076_v20, 1 }
 0x1b3   : > { %v2020_v19 = vpop.permute.xlu0 %2019  ;;  %v2871_v43 = vrot.slane %v2074_v35, 1  ;;  %v5609_v35 = vld [vmem:[%s8104_s5 + $0x70] sm:$0xff] }
 0x1b4   : > { %v1749_v48 = vpop.permute.xlu1 %1748 }
 0x1b5   : > { %1778 = vst.msk [vmem:[#allocation2 + $0x10] sm:$0xff] %vm1774_vm11, %v1749_v48  ;;  %v6273_v48 = vpack.c.bf16 %v5538_v24, %v5537_v40  ;;  %v2872_v60 = vsel %vm2869_vm12, %v2870_v47, %v2871_v43  ;;  %v5610_v40 = vld [vmem:[%s8104_s5 + $0x78] sm:$0xff]  ;;  %v5597_v24 = vld [vmem:[%s8104_s5 + $0x30] sm:$0xff] }
 0x1b6   : > { %1820 = vst.msk [vmem:[#allocation2 + $0xf] sm:$0xfe] %vm1816_vm4, %v1791_v27  ;;  %v6253_v27 = vpack.c.bf16 %v5500_v33, %v5499_v37  ;;  %v5572_v37 = vld [vmem:[%s8103_s4 + $0xa8] sm:$0xff]  ;;  %v5595_v47 = vld [vmem:[%s8103_s4 + $0x30] sm:$0xff] }
 0x1b7   : > { %1821 = vst.msk [vmem:[#allocation2 + $0x17] sm:$0x3] %vm1818_vm3, %v1793_v52  ;;  %v1795_v14 = vpop.permute.xlu0 %1794  ;;  %v5525_v52 = vld [vmem:[%s8104_s5 + $0x90] sm:$0xff] }
 0x1b8   : > { %2007 = vst.msk [vmem:[#allocation2 + $0x10] sm:$0xff] %vm2003_vm5, %v1978_v16  ;;  %v1759_v31 = vpop.permute.xlu1 %1758  ;;  %v7434_v42 = vld [vmem:[#allocation2] sm:$0xff]  ;;  %v5526_v16 = vld [vmem:[%s8104_s5 + $0x98] sm:$0xff] }
 0x1b9   : > { %2008 = vst.msk [vmem:[#allocation2 + $0x18] sm:$0x1] %vm2005_vm7, %v1980_v46  ;;  %5901 = vmatprep.mubr.msk.f32.mxu0 %vm2095_vm10, %v7434_v42  ;;  %5921 = vmatprep.mubr.msk.f32.mxu1 %vm2095_vm10, %v7434_v42  ;;  %v5511_v46 = vld [vmem:[%s8103_s4 + $0x50] sm:$0xff]  ;;  %v2882_v9 = vld [vmem:[#allocation2 + $0x1] sm:$0xff] }
 0x1ba   : > { %2049 = vst.msk [vmem:[#allocation2 + $0xf] sm:$0xfe] %vm2045_vm6, %v2020_v19 }
 0x1bb   : > { %2050 = vst.msk [vmem:[#allocation2 + $0x17] sm:$0x3] %vm2047_vm9, %v2022_v15  ;;  %v1757_v63 = vpop.permute.xlu0 %1756  ;;  %v6261_v15 = vpack.c.bf16 %v5512_v7, %v5511_v46  ;;  %v5584_v46 = vld [vmem:[%s8103_s4 + $0xe8] sm:$0xff]  ;;  %v5571_v7 = vld [vmem:[%s8103_s4 + $0xa0] sm:$0xff] }
 0x1bc   : > { %1822 = vst.msk [vmem:[#allocation2 + $0x1f] sm:$0xfe] %vm1816_vm4, %v1795_v14  ;;  %v1801_v51 = vpop.permute.xlu1 %1800  ;;  %v2078_v14 = vld [vmem:[%s7491_s16 + $0x28] sm:$0x1] }
 0x1bd   : > { %1783 = vst.msk [vmem:[#allocation2 + $0x38] sm:$0x1] %vm1776_vm15, %v1759_v31  ;;  %v6265_v31 = vpack.c.bf16 %v5526_v16, %v5525_v52  ;;  %v6321_v52 = vpack.c.bf16 %v5610_v40, %v5609_v35  ;;  %v2491_v40 = vld [vmem:[#allocation3 + $0x58] sm:$0xff] }
 0x1be   : > { %1782 = vst.msk [vmem:[#allocation2 + $0x30] sm:$0xff] %vm1774_vm11, %v1757_v63  ;;  %v2877_v63 = vrot.slane %v2078_v14, 1 }
 0x1bf   : > { %1825 = vst.msk [vmem:[#allocation2 + $0x37] sm:$0x3] %vm1818_vm3, %v1801_v51  ;;  %v1799_v5 = vpop.permute.xlu0 %1798  ;;  %v2080_v51 = vld [vmem:[%s7491_s16 + $0x38] sm:$0x1] }
 0x1c0   : > { %v1984_v26 = vpop.permute.xlu1 %1983  ;;  %1824 = vst.msk [vmem:[#allocation2 + $0x2f] sm:$0xfe] %vm1816_vm4, %v1799_v5  ;;  %v5536_v5 = vld [vmem:[%s8103_s4 + $0xd8] sm:$0xff] }
 0x1c1   : > { %2010 = vst.msk [vmem:[#allocation2 + $0x28] sm:$0x1] %vm2005_vm7, %v1984_v26  ;;  %v5523_v26 = vld [vmem:[%s8103_s4 + $0x90] sm:$0xff] }
 0x1c2   : > { %v7460_v30 = vld [vmem:[#allocation2 + $0x10] sm:$0xff] }
 0x1c3   : > { %5902 = vmatmul.mubr.msk.f32.vlgmr.msra.gmra.mrb[8].mxu0 %vm2095_vm10, %v7460_v30  ;;  %5922 = vmatmul.mubr.msk.f32.vlgmr.msra.gmra.mrb[8].mxu1 %vm2095_vm10, %v7460_v30  ;;  %v1982_v49 = vpop.permute.xlu0 %1981  ;;  %v7621_v19 = vld [vmem:[#allocation2 + $0x11] sm:$0xff] }
 0x1c4   : > { %6232 = vmatpush3.bf16.msra.mxu1 %v7372_v29  ;;  %6224 = vmatpush3.bf16.msra.mxu0 %v7396_v18  ;;  %v1988_v59 = vpop.permute.xlu1 %1987  ;;  %2009 = vst.msk [vmem:[#allocation2 + $0x20] sm:$0xff] %vm2003_vm5, %v1982_v49  ;;  %v6245_v18 = vpack.c.bf16 %v5488_v41, %v5487_v6  ;;  %v5524_v49 = vld [vmem:[%s8103_s4 + $0x98] sm:$0xff]  ;;  %v5559_v41 = vld [vmem:[%s8103_s4 + $0x60] sm:$0xff] }
 0x1c5   : > { %6242 = vmatprep.subr.bf16.mxu1 %v7456_v61  ;;  %6234 = vmatprep.subr.bf16.mxu0 %v7458_v62  ;;  %2012 = vst.msk [vmem:[#allocation2 + $0x38] sm:$0x1] %vm2005_vm7, %v1988_v59  ;;  %v7659_v59 = vsel %vm2869_vm12, %v2873_v36, %v2874_v8  ;;  %v2082_v36 = vld [vmem:[%s7491_s16 + $0x48] sm:$0x1] }
 0x1c7   : > { %v2024_v34 = vpop.permute.xlu0 %2023 }
 0x1c8   : > { %v2026_v23 = vpop.permute.xlu1 %2025  ;;  %2051 = vst.msk [vmem:[#allocation2 + $0x1f] sm:$0xfe] %vm2045_vm6, %v2024_v34  ;;  %v2879_v34 = vrot.slane %v7538_v10, 1 }
 0x1c9   : > { %2052 = vst.msk [vmem:[#allocation2 + $0x27] sm:$0x3] %vm2047_vm9, %v2026_v23  ;;  %v2880_v23 = vrot.slane %v2080_v51, 1  ;;  %v5620_v51 = vld [vmem:[%s8103_s4 + $0xb8] sm:$0xff] }
 0x1cb   : > { %v1986_v21 = vpop.permute.xlu0 %1985 }
 0x1cc   : > { %v2030_v4 = vpop.permute.xlu1 %2029  ;;  %2011 = vst.msk [vmem:[#allocation2 + $0x30] sm:$0xff] %vm2003_vm5, %v1986_v21  ;;  %v7663_v21 = vsel %vm2869_vm12, %v2876_v56, %v2877_v63  ;;  %v5632_v56 = vld [vmem:[%s8103_s4 + $0xf8] sm:$0xff]  ;;  %v5619_v63 = vld [vmem:[%s8103_s4 + $0xb0] sm:$0xff] }
 0x1cd   : > { %2054 = vst.msk [vmem:[#allocation2 + $0x37] sm:$0x3] %vm2047_vm9, %v2030_v4 }
 0x1cf   : > { %v2028_v29 = vpop.permute.xlu0 %2027 }
 0x1d0   : > { %v1763_v57 = vpop.permute.xlu1 %1762  ;;  %v7480_v12 = vld [vmem:[#allocation2 + $0x20] sm:$0xff]  ;;  %2053 = vst.msk [vmem:[#allocation2 + $0x2f] sm:$0xfe] %vm2045_vm6, %v2028_v29  ;;  %v6269_v29 = vpack.c.bf16 %v5524_v49, %v5523_v26  ;;  %v6333_v49 = vpack.c.bf16 %v5620_v51, %v5619_v63 }
 0x1d1   : > { %1785 = vst.msk [vmem:[#allocation2 + $0x48] sm:$0x1] %vm1776_vm15, %v1763_v57  ;;  %5904 = vmatprep.mubr.msk.f32.mxu0 %vm2095_vm10, %v7480_v12  ;;  %5924 = vmatprep.mubr.msk.f32.mxu1 %vm2095_vm10, %v7480_v12  ;;  %v7672_v57 = vsel %vm2869_vm12, %v2879_v34, %v2880_v23 }
 0x1d3   : > { %v1761_v55 = vpop.permute.xlu0 %1760 }
 0x1d4   : > { %v1805_v22 = vpop.permute.xlu1 %1804  ;;  %1784 = vst.msk [vmem:[#allocation2 + $0x40] sm:$0xff] %vm1774_vm11, %v1761_v55  ;;  %v5561_v55 = vld [vmem:[%s8104_s5 + $0x60] sm:$0xff] }
 0x1d5   : > { %1827 = vst.msk [vmem:[#allocation2 + $0x47] sm:$0x3] %vm1818_vm3, %v1805_v22  ;;  %v5562_v22 = vld [vmem:[%s8104_s5 + $0x68] sm:$0xff] }
 0x1d7   : > { %v1803_v44 = vpop.permute.xlu0 %1802  ;;  %v7498_v32 = vld [vmem:[#allocation2 + $0x30] sm:$0xff] }
 0x1d8   : > { %v1992_v13 = vpop.permute.xlu1 %1991  ;;  %1826 = vst.msk [vmem:[#allocation2 + $0x3f] sm:$0xfe] %vm1816_vm4, %v1803_v44  ;;  %5905 = vmatmul.mubr.msk.f32.gmra.mrb[10].mxu0 %vm2095_vm10, %v7498_v32  ;;  %5925 = vmatmul.mubr.msk.f32.gmra.mrb[10].mxu1 %vm2095_vm10, %v7498_v32  ;;  %v5550_v44 = vld [vmem:[%s8104_s5 + $0x28] sm:$0xff] }
 0x1d9   : > { %2014 = vst.msk [vmem:[#allocation2 + $0x48] sm:$0x1] %vm2005_vm7, %v1992_v13  ;;  %5911 = vmatprep.mubr.msk.f32.mxu0 %vm2095_vm10, %v7496_v53  ;;  %5931 = vmatprep.mubr.msk.f32.mxu1 %vm2095_vm10, %v7496_v53  ;;  %v6289_v13 = vpack.c.bf16 %v5562_v22, %v5561_v55 }
 0x1db   : > { %v1990_v11 = vpop.permute.xlu0 %1989 }
 0x1dc   : > { %v2034_v39 = vpop.permute.xlu1 %2033  ;;  %2013 = vst.msk [vmem:[#allocation2 + $0x40] sm:$0xff] %vm2003_vm5, %v1990_v11  ;;  %5912 = vmatmul.mubr.msk.f32.vlgmr.msra.gmra.mrb[8].mxu0 %vm2095_vm10, %v7523_v1  ;;  %5932 = vmatmul.mubr.msk.f32.vlgmr.msra.gmra.mrb[8].mxu1 %vm2095_vm10, %v7523_v1  ;;  %v5548_v11 = vld [vmem:[%s8103_s4 + $0x28] sm:$0xff] }
 0x1dd   : > { %6244 = vmatpush3.bf16.msra.mxu1 %v7456_v61  ;;  %2056 = vst.msk [vmem:[#allocation2 + $0x47] sm:$0x3] %vm2047_vm9, %v2034_v39  ;;  %5914 = vmatprep.mubr.msk.f32.mxu0 %vm2095_vm10, %v7526_v3  ;;  %v7638_v61 = vld [vmem:[#allocation2 + $0x31] sm:$0xff]  ;;  %v6293_v39 = vpack.c.bf16 %v5560_v38, %v5559_v41  ;;  %v2301_v41 = vld [vmem:[#allocation3 + $0x30] sm:$0xff] }
 0x1de   : > { %5934 = vmatprep.mubr.msk.f32.mxu1 %vm2095_vm10, %v7526_v3  ;;  %6236 = vmatpush3.bf16.msra.mxu0 %v7458_v62  ;;  %v5535_v62 = vld [vmem:[%s8103_s4 + $0xd0] sm:$0xff] }
 0x1df   : > { %v2032_v17 = vpop.permute.xlu0 %2031  ;;  %6246 = vmatprep.subr.bf16.mxu1 %v6245_v18  ;;  %6238 = vmatprep.subr.bf16.mxu0 %v6237_v54  ;;  %v6277_v4 = vpack.c.bf16 %v5536_v5, %v5535_v62  ;;  %v4432_v5 = vrot.slane %v2082_v36, 1 }
 0x1e0   : > { %2055 = vst.msk [vmem:[#allocation2 + $0x3f] sm:$0xfe] %vm2045_vm6, %v2032_v17  ;;  %5915 = vmatmul.mubr.msk.f32.gmra.mrb[10].mxu0 %vm2095_vm10, %v7538_v10  ;;  %5935 = vmatmul.mubr.msk.f32.gmra.mrb[10].mxu1 %vm2095_vm10, %v7538_v10  ;;  %v5586_v17 = vld [vmem:[%s8104_s5 + $0xe8] sm:$0xff] }
 0x1e1   : > { %5941 = vmatprep.mubr.msk.f32.mxu0 %vm2095_vm10, %v7434_v42  ;;  %5961 = vmatprep.mubr.msk.f32.mxu1 %vm2095_vm10, %v7434_v42  ;;  %v7628_v42 = vld [vmem:[#allocation2 + $0x21] sm:$0xff] }
 0x1e4   : > { %5942 = vmatmul.mubr.msk.f32.vlgmr.msra.gmra.mrb[12].mxu0 %vm2095_vm10, %v7460_v30  ;;  %5962 = vmatmul.mubr.msk.f32.vlgmr.msra.gmra.mrb[12].mxu1 %vm2095_vm10, %v7460_v30 }
 0x1e5   : > { %6248 = vmatpush3.bf16.msra.mxu1 %v6245_v18  ;;  %5944 = vmatprep.mubr.msk.f32.mxu0 %vm2095_vm10, %v7480_v12  ;;  %v6285_v18 = vpack.c.bf16 %v5548_v11, %v5547_v45 }
 0x1e6   : > { %5964 = vmatprep.mubr.msk.f32.mxu1 %vm2095_vm10, %v7480_v12  ;;  %6240 = vmatpush3.bf16.msra.mxu0 %v6237_v54  ;;  %v5585_v54 = vld [vmem:[%s8104_s5 + $0xe0] sm:$0xff] }
 0x1e7   : > { %6258 = vmatprep.subr.bf16.mxu1 %v6257_v58  ;;  %6250 = vmatprep.subr.bf16.mxu0 %v6249_v28  ;;  %v6305_v0 = vpack.c.bf16 %v5586_v17, %v5585_v54  ;;  %v4437_v8 = vld [vmem:[#allocation2 + $0x41] sm:$0xff] }
 0x1e8   : > { %5945 = vmatmul.mubr.msk.f32.gmra.mrb[14].mxu0 %vm2095_vm10, %v7498_v32  ;;  %5965 = vmatmul.mubr.msk.f32.gmra.mrb[14].mxu1 %vm2095_vm10, %v7498_v32 }
 0x1e9   : > { %5951 = vmatprep.mubr.msk.f32.mxu0 %vm2095_vm10, %v7496_v53  ;;  %5971 = vmatprep.mubr.msk.f32.mxu1 %vm2095_vm10, %v7496_v53  ;;  %v5549_v53 = vld [vmem:[%s8104_s5 + $0x20] sm:$0xff] }
 0x1ea   : > { %v6281_v6 = vpack.c.bf16 %v5550_v44, %v5549_v53 }
 0x1ec   : > { %5952 = vmatmul.mubr.msk.f32.vlgmr.msra.gmra.mrb[12].mxu0 %vm2095_vm10, %v7523_v1  ;;  %5972 = vmatmul.mubr.msk.f32.vlgmr.msra.gmra.mrb[12].mxu1 %vm2095_vm10, %v7523_v1 }
 0x1ed   : > { %6260 = vmatpush3.bf16.msra.mxu1 %v6257_v58  ;;  %5954 = vmatprep.mubr.msk.f32.mxu0 %vm2095_vm10, %v7526_v3  ;;  %v3662_v58 = vld [vmem:[#allocation2 + $0x40] sm:$0xff] }
 0x1ee   : > { %5974 = vmatprep.mubr.msk.f32.mxu1 %vm2095_vm10, %v7526_v3  ;;  %6252 = vmatpush3.bf16.msra.mxu0 %v6249_v28  ;;  %v5583_v28 = vld [vmem:[%s8103_s4 + $0xe0] sm:$0xff] }
 0x1ef   : > { %6262 = vmatprep.subr.bf16.mxu1 %v6261_v15  ;;  %6254 = vmatprep.subr.bf16.mxu0 %v6253_v27  ;;  %v6309_v33 = vpack.c.bf16 %v5584_v46, %v5583_v28 }
 0x1f0   : > { %5955 = vmatmul.mubr.msk.f32.gmra.mrb[14].mxu0 %vm2095_vm10, %v7538_v10  ;;  %5975 = vmatmul.mubr.msk.f32.gmra.mrb[14].mxu1 %vm2095_vm10, %v7538_v10 }
 0x1f1   : > { %5981 = vmatprep.mubr.msk.f32.mxu0 %vm2095_vm10, %v2882_v9  ;;  %6001 = vmatprep.mubr.msk.f32.mxu1 %vm2095_vm10, %v2882_v9 }
 0x1f4   : > { %5982 = vmatmul.mubr.msk.f32.vlgmr.msra.gmra.mrb[16].mxu0 %vm2095_vm10, %v7621_v19  ;;  %6002 = vmatmul.mubr.msk.f32.vlgmr.msra.gmra.mrb[16].mxu1 %vm2095_vm10, %v7621_v19 }
 0x1f5   : > { %6264 = vmatpush3.bf16.msra.mxu1 %v6261_v15  ;;  %5984 = vmatprep.mubr.msk.f32.mxu0 %vm2095_vm10, %v7628_v42  ;;  %v6301_v15 = vpack.c.bf16 %v5572_v37, %v5571_v7 }
 0x1f6   : > { %6004 = vmatprep.mubr.msk.f32.mxu1 %vm2095_vm10, %v7628_v42  ;;  %6256 = vmatpush3.bf16.msra.mxu0 %v6253_v27  ;;  %v7781_v27 = vld [vmem:[%s7491_s16 + $0x40] sm:$0xff] }
 0x1f7   : > { %6274 = vmatprep.subr.bf16.mxu1 %v6273_v48  ;;  %6266 = vmatprep.subr.bf16.mxu0 %v6265_v31  ;;  %v4431_v62 = vrot.slane %v7781_v27, 1 }
 0x1f8   : > { %5985 = vmatmul.mubr.msk.f32.gmra.mrb[18].mxu0 %vm2095_vm10, %v7638_v61  ;;  %6005 = vmatmul.mubr.msk.f32.gmra.mrb[18].mxu1 %vm2095_vm10, %v7638_v61 }
 0x1f9   : > { %5991 = vmatprep.mubr.msk.f32.mxu0 %vm2095_vm10, %v2872_v60  ;;  %6011 = vmatprep.mubr.msk.f32.mxu1 %vm2095_vm10, %v2872_v60  ;;  %v4433_v34 = vsel %vm2869_vm12, %v4431_v62, %v4432_v5 }
 0x1fc   : > { %5992 = vmatmul.mubr.msk.f32.vlgmr.msra.gmra.mrb[16].mxu0 %vm2095_vm10, %v7659_v59  ;;  %6012 = vmatmul.mubr.msk.f32.vlgmr.msra.gmra.mrb[16].mxu1 %vm2095_vm10, %v7659_v59 }
 0x1fd   : > { %6276 = vmatpush3.bf16.msra.mxu1 %v6273_v48  ;;  %5994 = vmatprep.mubr.msk.f32.mxu0 %vm2095_vm10, %v7663_v21  ;;  %v5622_v48 = vld [vmem:[%s8104_s5 + $0xb8] sm:$0xff] }
 0x1fe   : > { %6014 = vmatprep.mubr.msk.f32.mxu1 %vm2095_vm10, %v7663_v21  ;;  %6268 = vmatpush3.bf16.msra.mxu0 %v6265_v31 }
 0x1ff   : > { %6278 = vmatprep.subr.bf16.mxu1 %v6277_v4  ;;  %6270 = vmatprep.subr.bf16.mxu0 %v6269_v29 }
 0x200   : > { %5995 = vmatmul.mubr.msk.f32.gmra.mrb[18].mxu0 %vm2095_vm10, %v7672_v57  ;;  %6015 = vmatmul.mubr.msk.f32.gmra.mrb[18].mxu1 %vm2095_vm10, %v7672_v57 }
 0x201   : > { %6021 = vmatprep.mubr.msk.f32.mxu0 %vm2095_vm10, %v2882_v9  ;;  %6041 = vmatprep.mubr.msk.f32.mxu1 %vm2095_vm10, %v2882_v9  ;;  %v5598_v9 = vld [vmem:[%s8104_s5 + $0x38] sm:$0xff] }
 0x202   : > { %v6313_v16 = vpack.c.bf16 %v5598_v9, %v5597_v24  ;;  %v2680_v24 = vld [vmem:[#allocation3 + $0x78] sm:$0xff]  ;;  %v2490_v9 = vld [vmem:[#allocation3 + $0x50] sm:$0xff] }
 0x204   : > { %6022 = vmatmul.mubr.msk.f32.vlgmr.msra.gmra.mrb[20].mxu0 %vm2095_vm10, %v7621_v19  ;;  %6042 = vmatmul.mubr.msk.f32.vlgmr.msra.gmra.mrb[20].mxu1 %vm2095_vm10, %v7621_v19 }
 0x205   : > { %6280 = vmatpush3.bf16.msra.mxu1 %v6277_v4  ;;  %6024 = vmatprep.mubr.msk.f32.mxu0 %vm2095_vm10, %v7628_v42 }
 0x206   : > { %6044 = vmatprep.mubr.msk.f32.mxu1 %vm2095_vm10, %v7628_v42  ;;  %6272 = vmatpush3.bf16.msra.mxu0 %v6269_v29 }
 0x207   : > { %6290 = vmatprep.subr.bf16.mxu1 %v6289_v13  ;;  %6282 = vmatprep.subr.bf16.mxu0 %v6281_v6 }
 0x208   : > { %6025 = vmatmul.mubr.msk.f32.gmra.mrb[22].mxu0 %vm2095_vm10, %v7638_v61  ;;  %6045 = vmatmul.mubr.msk.f32.gmra.mrb[22].mxu1 %vm2095_vm10, %v7638_v61 }
 0x209   : > { %6031 = vmatprep.mubr.msk.f32.mxu0 %vm2095_vm10, %v2872_v60  ;;  %6051 = vmatprep.mubr.msk.f32.mxu1 %vm2095_vm10, %v2872_v60  ;;  %v5631_v60 = vld [vmem:[%s8103_s4 + $0xf0] sm:$0xff] }
 0x20a   : > { %v6341_v26 = vpack.c.bf16 %v5632_v56, %v5631_v60 }
 0x20c   : > { %6032 = vmatmul.mubr.msk.f32.vlgmr.msra.gmra.mrb[20].mxu0 %vm2095_vm10, %v7659_v59  ;;  %6052 = vmatmul.mubr.msk.f32.vlgmr.msra.gmra.mrb[20].mxu1 %vm2095_vm10, %v7659_v59 }
 0x20d   : > { %6292 = vmatpush3.bf16.msra.mxu1 %v6289_v13  ;;  %6034 = vmatprep.mubr.msk.f32.mxu0 %vm2095_vm10, %v7663_v21  ;;  %v2090_v13 = vld [vmem:[#allocation3 + $0x18] sm:$0xff] }
 0x20e   : > { %6054 = vmatprep.mubr.msk.f32.mxu1 %vm2095_vm10, %v7663_v21  ;;  %6284 = vmatpush3.bf16.msra.mxu0 %v6281_v6  ;;  %v2302_v6 = vld [vmem:[#allocation3 + $0x38] sm:$0xff] }
 0x20f   : > { %6294 = vmatprep.subr.bf16.mxu1 %v6293_v39  ;;  %6286 = vmatprep.subr.bf16.mxu0 %v6285_v18 }
 0x210   : > { %6035 = vmatmul.mubr.msk.f32.gmra.mrb[22].mxu0 %vm2095_vm10, %v7672_v57  ;;  %6055 = vmatmul.mubr.msk.f32.gmra.mrb[22].mxu1 %vm2095_vm10, %v7672_v57 }
 0x211   : > { %6061 = vmatprep.mubr.msk.f32.mxu0 %vm2095_vm10, %v7460_v30  ;;  %6081 = vmatprep.mubr.msk.f32.mxu1 %vm2095_vm10, %v7460_v30 }
 0x214   : > { %6062 = vmatmul.mubr.msk.f32.vlgmr.msra.gmra.mrb[24].mxu0 %vm2095_vm10, %v7480_v12  ;;  %6082 = vmatmul.mubr.msk.f32.vlgmr.msra.gmra.mrb[24].mxu1 %vm2095_vm10, %v7480_v12 }
 0x215   : > { %6296 = vmatpush3.bf16.msra.mxu1 %v6293_v39  ;;  %6064 = vmatprep.mubr.msk.f32.mxu0 %vm2095_vm10, %v7498_v32 }
 0x216   : > { %6084 = vmatprep.mubr.msk.f32.mxu1 %vm2095_vm10, %v7498_v32  ;;  %6288 = vmatpush3.bf16.msra.mxu0 %v6285_v18 }
 0x217   : > { %6306 = vmatprep.subr.bf16.mxu1 %v6305_v0  ;;  %6298 = vmatprep.subr.bf16.mxu0 %v6297_v50 }
 0x218   : > { %6065 = vmatmul.mubr.msk.f32.gmra.mrb[26].mxu0 %vm2095_vm10, %v3662_v58  ;;  %6085 = vmatmul.mubr.msk.f32.gmra.mrb[26].mxu1 %vm2095_vm10, %v3662_v58 }
 0x219   : > { %6071 = vmatprep.mubr.msk.f32.mxu0 %vm2095_vm10, %v7523_v1  ;;  %6091 = vmatprep.mubr.msk.f32.mxu1 %vm2095_vm10, %v7523_v1 }
 0x21c   : > { %6072 = vmatmul.mubr.msk.f32.vlgmr.msra.gmra.mrb[24].mxu0 %vm2095_vm10, %v7526_v3  ;;  %6092 = vmatmul.mubr.msk.f32.vlgmr.msra.gmra.mrb[24].mxu1 %vm2095_vm10, %v7526_v3 }
 0x21d   : > { %6308 = vmatpush3.bf16.msra.mxu1 %v6305_v0  ;;  %6074 = vmatprep.mubr.msk.f32.mxu0 %vm2095_vm10, %v7538_v10  ;;  %v2678_v0 = vld [vmem:[#allocation3 + $0x68] sm:$0xff] }
 0x21e   : > { %6094 = vmatprep.mubr.msk.f32.mxu1 %vm2095_vm10, %v7538_v10  ;;  %6300 = vmatpush3.bf16.msra.mxu0 %v6297_v50  ;;  %v2488_v50 = vld [vmem:[#allocation3 + $0x40] sm:$0xff] }
 0x21f   : > { %6310 = vmatprep.subr.bf16.mxu1 %v6309_v33  ;;  %6302 = vmatprep.subr.bf16.mxu0 %v6301_v15 }
 0x220   : > { %6075 = vmatmul.mubr.msk.f32.gmra.mrb[26].mxu0 %vm2095_vm10, %v7781_v27  ;;  %6095 = vmatmul.mubr.msk.f32.gmra.mrb[26].mxu1 %vm2095_vm10, %v7781_v27 }
 0x221   : > { %6101 = vmatprep.mubr.msk.f32.mxu0 %vm2095_vm10, %v7460_v30  ;;  %6121 = vmatprep.mubr.msk.f32.mxu1 %vm2095_vm10, %v7460_v30  ;;  %v5607_v30 = vld [vmem:[%s8103_s4 + $0x70] sm:$0xff] }
 0x224   : > { %6102 = vmatmul.mubr.msk.f32.vlgmr.msra.gmra.mrb[28].mxu0 %vm2095_vm10, %v7480_v12  ;;  %6122 = vmatmul.mubr.msk.f32.vlgmr.msra.gmra.mrb[28].mxu1 %vm2095_vm10, %v7480_v12  ;;  %v5608_v12 = vld [vmem:[%s8103_s4 + $0x78] sm:$0xff] }
 0x225   : > { %6312 = vmatpush3.bf16.msra.mxu1 %v6309_v33  ;;  %6104 = vmatprep.mubr.msk.f32.mxu0 %vm2095_vm10, %v7498_v32  ;;  %v6325_v43 = vpack.c.bf16 %v5608_v12, %v5607_v30 }
 0x226   : > { %6124 = vmatprep.mubr.msk.f32.mxu1 %vm2095_vm10, %v7498_v32  ;;  %6304 = vmatpush3.bf16.msra.mxu0 %v6301_v15  ;;  %v5596_v32 = vld [vmem:[%s8103_s4 + $0x38] sm:$0xff] }
 0x227   : > { %6322 = vmatprep.subr.bf16.mxu1 %v6321_v52  ;;  %6314 = vmatprep.subr.bf16.mxu0 %v6313_v16  ;;  %v6317_v20 = vpack.c.bf16 %v5596_v32, %v5595_v47 }
 0x228   : > { %6105 = vmatmul.mubr.msk.f32.gmra.mrb[30].mxu0 %vm2095_vm10, %v3662_v58  ;;  %6125 = vmatmul.mubr.msk.f32.gmra.mrb[30].mxu1 %vm2095_vm10, %v3662_v58  ;;  %v2677_v58 = vld [vmem:[#allocation3 + $0x60] sm:$0xff] }
 0x229   : > { %6111 = vmatprep.mubr.msk.f32.mxu0 %vm2095_vm10, %v7523_v1  ;;  %6131 = vmatprep.mubr.msk.f32.mxu1 %vm2095_vm10, %v7523_v1  ;;  %v5633_v1 = vld [vmem:[%s8104_s5 + $0xf0] sm:$0xff] }
 0x22c   : > { %6112 = vmatmul.mubr.msk.f32.vlgmr.msra.gmra.mrb[28].mxu0 %vm2095_vm10, %v7526_v3  ;;  %6132 = vmatmul.mubr.msk.f32.vlgmr.msra.gmra.mrb[28].mxu1 %vm2095_vm10, %v7526_v3  ;;  %v5634_v3 = vld [vmem:[%s8104_s5 + $0xf8] sm:$0xff] }
 0x22d   : > { %6324 = vmatpush3.bf16.msra.mxu1 %v6321_v52  ;;  %6114 = vmatprep.mubr.msk.f32.mxu0 %vm2095_vm10, %v7538_v10  ;;  %v6337_v14 = vpack.c.bf16 %v5634_v3, %v5633_v1  ;;  %v2679_v52 = vld [vmem:[#allocation3 + $0x70] sm:$0xff] }
 0x22e   : > { %6134 = vmatprep.mubr.msk.f32.mxu1 %vm2095_vm10, %v7538_v10  ;;  %6316 = vmatpush3.bf16.msra.mxu0 %v6313_v16  ;;  %v5621_v10 = vld [vmem:[%s8104_s5 + $0xb0] sm:$0xff] }
 0x22f   : > { %6326 = vmatprep.subr.bf16.mxu1 %v6325_v43  ;;  %6318 = vmatprep.subr.bf16.mxu0 %v6317_v20  ;;  %v6329_v31 = vpack.c.bf16 %v5622_v48, %v5621_v10 }
 0x230   : > { %6115 = vmatmul.mubr.msk.f32.gmra.mrb[30].mxu0 %vm2095_vm10, %v7781_v27  ;;  %6135 = vmatmul.mubr.msk.f32.gmra.mrb[30].mxu1 %vm2095_vm10, %v7781_v27 }
 0x231   : > { %6141 = vmatprep.mubr.msk.f32.mxu0 %vm2095_vm10, %v7621_v19  ;;  %6161 = vmatprep.mubr.msk.f32.mxu1 %vm2095_vm10, %v7621_v19 }
 0x234   : > { %6142 = vmatmul.mubr.msk.f32.vlgmr.msra.gmra.mrb[32].mxu0 %vm2095_vm10, %v7628_v42  ;;  %6162 = vmatmul.mubr.msk.f32.vlgmr.msra.gmra.mrb[32].mxu1 %vm2095_vm10, %v7628_v42 }
 0x235   : > { %6328 = vmatpush3.bf16.msra.mxu1 %v6325_v43  ;;  %6144 = vmatprep.mubr.msk.f32.mxu0 %vm2095_vm10, %v7638_v61 }
 0x236   : > { %6164 = vmatprep.mubr.msk.f32.mxu1 %vm2095_vm10, %v7638_v61  ;;  %6320 = vmatpush3.bf16.msra.mxu0 %v6317_v20 }
 0x237   : > { %6338 = vmatprep.subr.bf16.mxu1 %v6337_v14  ;;  %6330 = vmatprep.subr.bf16.mxu0 %v6329_v31 }
 0x238   : > { %6145 = vmatmul.mubr.msk.f32.gmra.mrb[34].mxu0 %vm2095_vm10, %v4437_v8  ;;  %6165 = vmatmul.mubr.msk.f32.gmra.mrb[34].mxu1 %vm2095_vm10, %v4437_v8 }
 0x239   : > { %6151 = vmatprep.mubr.msk.f32.mxu0 %vm2095_vm10, %v7659_v59  ;;  %6171 = vmatprep.mubr.msk.f32.mxu1 %vm2095_vm10, %v7659_v59 }
 0x23c   : > { %6152 = vmatmul.mubr.msk.f32.vlgmr.msra.gmra.mrb[32].mxu0 %vm2095_vm10, %v7663_v21  ;;  %6172 = vmatmul.mubr.msk.f32.vlgmr.msra.gmra.mrb[32].mxu1 %vm2095_vm10, %v7663_v21 }
 0x23d   : > { %6340 = vmatpush3.bf16.msra.mxu1 %v6337_v14  ;;  %6154 = vmatprep.mubr.msk.f32.mxu0 %vm2095_vm10, %v7672_v57 }
 0x23e   : > { %6174 = vmatprep.mubr.msk.f32.mxu1 %vm2095_vm10, %v7672_v57  ;;  %6332 = vmatpush3.bf16.msra.mxu0 %v6329_v31 }
 0x23f   : > { %6342 = vmatprep.subr.bf16.mxu1 %v6341_v26  ;;  %6334 = vmatprep.subr.bf16.mxu0 %v6333_v49 }
 0x240   : > { %6155 = vmatmul.mubr.msk.f32.gmra.mrb[34].mxu0 %vm2095_vm10, %v4433_v34  ;;  %6175 = vmatmul.mubr.msk.f32.gmra.mrb[34].mxu1 %vm2095_vm10, %v4433_v34 }
 0x241   : > { %6181 = vmatprep.mubr.msk.f32.mxu0 %vm2095_vm10, %v7621_v19  ;;  %6201 = vmatprep.mubr.msk.f32.mxu1 %vm2095_vm10, %v7621_v19  ;;  %v2088_v19 = vld [vmem:[#allocation3 + $0x8] sm:$0xff] }
 0x244   : > { %6182 = vmatmul.mubr.msk.f32.vlgmr.msra.gmra.mrb[36].mxu0 %vm2095_vm10, %v7628_v42  ;;  %6202 = vmatmul.mubr.msk.f32.vlgmr.msra.gmra.mrb[36].mxu1 %vm2095_vm10, %v7628_v42  ;;  %v2300_v42 = vld [vmem:[#allocation3 + $0x28] sm:$0xff] }
 0x245   : > { %6344 = vmatpush3.bf16.msra.mxu1 %v6341_v26  ;;  %6184 = vmatprep.mubr.msk.f32.mxu0 %vm2095_vm10, %v7638_v61 }
 0x246   : > { %6204 = vmatprep.mubr.msk.f32.mxu1 %vm2095_vm10, %v7638_v61  ;;  %6336 = vmatpush3.bf16.msra.mxu0 %v6333_v49  ;;  %v2087_v61 = vld [vmem:[#allocation3] sm:$0xff] }
 0x248   : > { %6185 = vmatmul.mubr.msk.f32.gmra.mrb[38].mxu0 %vm2095_vm10, %v4437_v8  ;;  %6205 = vmatmul.mubr.msk.f32.gmra.mrb[38].mxu1 %vm2095_vm10, %v4437_v8 }
 0x249   : > { %6191 = vmatprep.mubr.msk.f32.mxu0 %vm2095_vm10, %v7659_v59  ;;  %6211 = vmatprep.mubr.msk.f32.mxu1 %vm2095_vm10, %v7659_v59  ;;  %v2299_v59 = vld [vmem:[#allocation3 + $0x20] sm:$0xff] }
 0x24c   : > { %6192 = vmatmul.mubr.msk.f32.vlgmr.msra.gmra.mrb[36].mxu0 %vm2095_vm10, %v7663_v21  ;;  %6212 = vmatmul.mubr.msk.f32.vlgmr.msra.gmra.mrb[36].mxu1 %vm2095_vm10, %v7663_v21 }
 0x24d   : > { %6194 = vmatprep.mubr.msk.f32.mxu0 %vm2095_vm10, %v7672_v57  ;;  %6214 = vmatprep.mubr.msk.f32.mxu1 %vm2095_vm10, %v7672_v57  ;;  %v2089_v57 = vld [vmem:[#allocation3 + $0x10] sm:$0xff] }
 0x250   : > { %6195 = vmatmul.mubr.msk.f32.gmra.mrb[38].mxu0 %vm2095_vm10, %v4433_v34  ;;  %6215 = vmatmul.mubr.msk.f32.gmra.mrb[38].mxu1 %vm2095_vm10, %v4433_v34 }
 0x2af   : > { %v5913_v23 = vpop.f32.mrb[8].mxu0  ;;  %v5933_v4 = vpop.f32.mrb[8].mxu1 }
 0x2b0   : > { %v2291_v29 = vadd.f32 %v5913_v23, %v2088_v19  ;;  %v2480_v55 = vadd.f32 %v5933_v4, %v2300_v42  ;;  %v2271_v22 = vpop.f32.mrb[9].mxu0  ;;  %v2460_v21 = vpop.f32.mrb[9].mxu1 }
 0x2b1   : > { %v2290_v53 = vadd.f32 %v2271_v22, %v2087_v61  ;;  %v2479_v44 = vadd.f32 %v2460_v21, %v2299_v59 }
 0x2b2   : > { %2295 = vst.msk [vmem:[#allocation3 + $0x8] sm:$0xff] %vm1774_vm11, %v2291_v29  ;;  %2484 = vst.msk [vmem:[#allocation3 + $0x28] sm:$0xff] %vm1774_vm11, %v2480_v55 }
 0x2b3   : > { %2294 = vst.msk [vmem:[#allocation3] sm:$0xff] %vm1774_vm11, %v2290_v53  ;;  %2483 = vst.msk [vmem:[#allocation3 + $0x20] sm:$0xff] %vm1774_vm11, %v2479_v44  ;;  %v5916_v38 = vpop.f32.mrb[10].mxu0  ;;  %v5936_v45 = vpop.f32.mrb[10].mxu1 }
 0x2b4   : > { %v2293_v11 = vadd.f32 %v5916_v38, %v2090_v13  ;;  %v2482_v39 = vadd.f32 %v5936_v45, %v2302_v6  ;;  %v2281_v18 = vpop.f32.mrb[11].mxu0  ;;  %v2470_v54 = vpop.f32.mrb[11].mxu1 }
 0x2b5   : > { %v2292_v17 = vadd.f32 %v2281_v18, %v2089_v57  ;;  %v2481_v2 = vadd.f32 %v2470_v54, %v2301_v41 }
 0x2b6   : > { %2297 = vst.msk [vmem:[#allocation3 + $0x18] sm:$0xff] %vm1774_vm11, %v2293_v11  ;;  %2486 = vst.msk [vmem:[#allocation3 + $0x38] sm:$0xff] %vm1774_vm11, %v2482_v39 }
 0x2b7   : > { %2296 = vst.msk [vmem:[#allocation3 + $0x10] sm:$0xff] %vm1774_vm11, %v2292_v17  ;;  %2485 = vst.msk [vmem:[#allocation3 + $0x30] sm:$0xff] %vm1774_vm11, %v2481_v2 }
 0x2b9   : > { %v2887_v3 = vld [vmem:[#allocation3 + $0x8] sm:$0xff] }
 0x2ba   : > { %v3095_v48 = vld [vmem:[#allocation3 + $0x28] sm:$0xff]  ;;  %v2886_v8 = vld [vmem:[#allocation3] sm:$0xff] }
 0x2bb   : > { %v3094_v56 = vld [vmem:[#allocation3 + $0x20] sm:$0xff] }
 0x2bd   : > { %v2889_v5 = vld [vmem:[#allocation3 + $0x18] sm:$0xff] }
 0x2be   : > { %v3097_v49 = vld [vmem:[#allocation3 + $0x38] sm:$0xff]  ;;  %v2888_v61 = vld [vmem:[#allocation3 + $0x10] sm:$0xff] }
 0x2bf   : > { %v5953_v28 = vpop.f32.mrb[12].mxu0  ;;  %v5973_v46 = vpop.f32.mrb[12].mxu1  ;;  %v3096_v23 = vld [vmem:[#allocation3 + $0x30] sm:$0xff] }
 0x2c0   : > { %v2669_v7 = vadd.f32 %v5953_v28, %v2489_v25  ;;  %v2858_v37 = vadd.f32 %v5973_v46, %v2678_v0  ;;  %v2649_v33 = vpop.f32.mrb[13].mxu0  ;;  %v2838_v15 = vpop.f32.mrb[13].mxu1 }
 0x2c1   : > { %v2668_v27 = vadd.f32 %v2649_v33, %v2488_v50  ;;  %v2857_v35 = vadd.f32 %v2838_v15, %v2677_v58 }
 0x2c2   : > { %2673 = vst.msk [vmem:[#allocation3 + $0x48] sm:$0xff] %vm1774_vm11, %v2669_v7  ;;  %2862 = vst.msk [vmem:[#allocation3 + $0x68] sm:$0xff] %vm1774_vm11, %v2858_v37 }
 0x2c3   : > { %2672 = vst.msk [vmem:[#allocation3 + $0x40] sm:$0xff] %vm1774_vm11, %v2668_v27  ;;  %2861 = vst.msk [vmem:[#allocation3 + $0x60] sm:$0xff] %vm1774_vm11, %v2857_v35  ;;  %v5956_v16 = vpop.f32.mrb[14].mxu0  ;;  %v5976_v30 = vpop.f32.mrb[14].mxu1 }
 0x2c4   : > { %v2671_v12 = vadd.f32 %v5956_v16, %v2491_v40  ;;  %v2860_v47 = vadd.f32 %v5976_v30, %v2680_v24  ;;  %v2659_v32 = vpop.f32.mrb[15].mxu0  ;;  %v2848_v43 = vpop.f32.mrb[15].mxu1 }
 0x2c5   : > { %v2670_v20 = vadd.f32 %v2659_v32, %v2490_v9  ;;  %v2859_v1 = vadd.f32 %v2848_v43, %v2679_v52 }
 0x2c6   : > { %2675 = vst.msk [vmem:[#allocation3 + $0x58] sm:$0xff] %vm1774_vm11, %v2671_v12  ;;  %2864 = vst.msk [vmem:[#allocation3 + $0x78] sm:$0xff] %vm1774_vm11, %v2860_v47 }
 0x2c7   : > { %2674 = vst.msk [vmem:[#allocation3 + $0x50] sm:$0xff] %vm1774_vm11, %v2670_v20  ;;  %2863 = vst.msk [vmem:[#allocation3 + $0x70] sm:$0xff] %vm1774_vm11, %v2859_v1 }
 0x2c9   : > { %v3283_v22 = vld [vmem:[#allocation3 + $0x48] sm:$0xff] }
 0x2ca   : > { %v3471_v53 = vld [vmem:[#allocation3 + $0x68] sm:$0xff]  ;;  %v3282_v57 = vld [vmem:[#allocation3 + $0x40] sm:$0xff] }
 0x2cb   : > { %v3470_v38 = vld [vmem:[#allocation3 + $0x60] sm:$0xff] }
 0x2cd   : > { %v3285_v18 = vld [vmem:[#allocation3 + $0x58] sm:$0xff] }
 0x2ce   : > { %v3473_v17 = vld [vmem:[#allocation3 + $0x78] sm:$0xff]  ;;  %v3284_v50 = vld [vmem:[#allocation3 + $0x50] sm:$0xff] }
 0x2cf   : > { %v5993_v10 = vpop.f32.mrb[16].mxu0  ;;  %v6013_v14 = vpop.f32.mrb[16].mxu1  ;;  %v3472_v28 = vld [vmem:[#allocation3 + $0x70] sm:$0xff] }
 0x2d0   : > { %v3087_v31 = vadd.f32 %v5993_v10, %v2887_v3  ;;  %v3275_v36 = vadd.f32 %v6013_v14, %v3095_v48  ;;  %v3067_v60 = vpop.f32.mrb[17].mxu0  ;;  %v3255_v63 = vpop.f32.mrb[17].mxu1 }
 0x2d1   : > { %v3086_v51 = vadd.f32 %v3067_v60, %v2886_v8  ;;  %v3274_v62 = vadd.f32 %v3255_v63, %v3094_v56 }
 0x2d2   : > { %3091 = vst.msk [vmem:[#allocation3 + $0x8] sm:$0xff] %vm1774_vm11, %v3087_v31  ;;  %3279 = vst.msk [vmem:[#allocation3 + $0x28] sm:$0xff] %vm1774_vm11, %v3275_v36 }
 0x2d3   : > { %3090 = vst.msk [vmem:[#allocation3] sm:$0xff] %vm1774_vm11, %v3086_v51  ;;  %3278 = vst.msk [vmem:[#allocation3 + $0x20] sm:$0xff] %vm1774_vm11, %v3274_v62  ;;  %v5996_v26 = vpop.f32.mrb[18].mxu0  ;;  %v6016_v34 = vpop.f32.mrb[18].mxu1 }
 0x2d4   : > { %v3089_v19 = vadd.f32 %v5996_v26, %v2889_v5  ;;  %v3277_v42 = vadd.f32 %v6016_v34, %v3097_v49  ;;  %v3077_v59 = vpop.f32.mrb[19].mxu0  ;;  %v3265_v4 = vpop.f32.mrb[19].mxu1 }
 0x2d5   : > { %v3088_v29 = vadd.f32 %v3077_v59, %v2888_v61  ;;  %v3276_v55 = vadd.f32 %v3265_v4, %v3096_v23 }
 0x2d6   : > { %3093 = vst.msk [vmem:[#allocation3 + $0x18] sm:$0xff] %vm1774_vm11, %v3089_v19  ;;  %3281 = vst.msk [vmem:[#allocation3 + $0x38] sm:$0xff] %vm1774_vm11, %v3277_v42 }
 0x2d7   : > { %3092 = vst.msk [vmem:[#allocation3 + $0x10] sm:$0xff] %vm1774_vm11, %v3088_v29  ;;  %3280 = vst.msk [vmem:[#allocation3 + $0x30] sm:$0xff] %vm1774_vm11, %v3276_v55 }
 0x2d9   : > { %v3664_v33 = vld [vmem:[#allocation3 + $0x8] sm:$0xff] }
 0x2da   : > { %v3867_v27 = vld [vmem:[#allocation3 + $0x28] sm:$0xff]  ;;  %v3663_v9 = vld [vmem:[#allocation3] sm:$0xff] }
 0x2db   : > { %v3866_v16 = vld [vmem:[#allocation3 + $0x20] sm:$0xff] }
 0x2dd   : > { %v3666_v32 = vld [vmem:[#allocation3 + $0x18] sm:$0xff] }
 0x2de   : > { %v3869_v20 = vld [vmem:[#allocation3 + $0x38] sm:$0xff]  ;;  %v3665_v48 = vld [vmem:[#allocation3 + $0x10] sm:$0xff] }
 0x2df   : > { %v6033_v21 = vpop.f32.mrb[20].mxu0  ;;  %v6053_v44 = vpop.f32.mrb[20].mxu1  ;;  %v3868_v31 = vld [vmem:[#allocation3 + $0x30] sm:$0xff] }
 0x2e0   : > { %v3463_v13 = vadd.f32 %v6033_v21, %v3283_v22  ;;  %v3651_v6 = vadd.f32 %v6053_v44, %v3471_v53  ;;  %v3443_v41 = vpop.f32.mrb[21].mxu0  ;;  %v3631_v45 = vpop.f32.mrb[21].mxu1 }
 0x2e1   : > { %v3462_v11 = vadd.f32 %v3443_v41, %v3282_v57  ;;  %v3650_v39 = vadd.f32 %v3631_v45, %v3470_v38 }
 0x2e2   : > { %3467 = vst.msk [vmem:[#allocation3 + $0x48] sm:$0xff] %vm1774_vm11, %v3463_v13  ;;  %3655 = vst.msk [vmem:[#allocation3 + $0x68] sm:$0xff] %vm1774_vm11, %v3651_v6 }
 0x2e3   : > { %3466 = vst.msk [vmem:[#allocation3 + $0x40] sm:$0xff] %vm1774_vm11, %v3462_v11  ;;  %3654 = vst.msk [vmem:[#allocation3 + $0x60] sm:$0xff] %vm1774_vm11, %v3650_v39  ;;  %v6036_v54 = vpop.f32.mrb[22].mxu0  ;;  %v6056_v2 = vpop.f32.mrb[22].mxu1 }
 0x2e4   : > { %v3465_v25 = vadd.f32 %v6036_v54, %v3285_v18  ;;  %v3653_v0 = vadd.f32 %v6056_v2, %v3473_v17  ;;  %v3453_v58 = vpop.f32.mrb[23].mxu0  ;;  %v3641_v46 = vpop.f32.mrb[23].mxu1 }
 0x2e5   : > { %v3464_v7 = vadd.f32 %v3453_v58, %v3284_v50  ;;  %v3652_v37 = vadd.f32 %v3641_v46, %v3472_v28 }
 0x2e6   : > { %3469 = vst.msk [vmem:[#allocation3 + $0x58] sm:$0xff] %vm1774_vm11, %v3465_v25  ;;  %3657 = vst.msk [vmem:[#allocation3 + $0x78] sm:$0xff] %vm1774_vm11, %v3653_v0 }
 0x2e7   : > { %3468 = vst.msk [vmem:[#allocation3 + $0x50] sm:$0xff] %vm1774_vm11, %v3464_v7  ;;  %3656 = vst.msk [vmem:[#allocation3 + $0x70] sm:$0xff] %vm1774_vm11, %v3652_v37 }
 0x2e9   : > { %v4055_v56 = vld [vmem:[#allocation3 + $0x48] sm:$0xff] }
 0x2ea   : > { %v4243_v51 = vld [vmem:[#allocation3 + $0x68] sm:$0xff]  ;;  %v4054_v49 = vld [vmem:[#allocation3 + $0x40] sm:$0xff] }
 0x2eb   : > { %v4242_v19 = vld [vmem:[#allocation3 + $0x60] sm:$0xff] }
 0x2ed   : > { %v4057_v23 = vld [vmem:[#allocation3 + $0x58] sm:$0xff] }
 0x2ee   : > { %v4245_v29 = vld [vmem:[#allocation3 + $0x78] sm:$0xff]  ;;  %v4056_v53 = vld [vmem:[#allocation3 + $0x50] sm:$0xff] }
 0x2ef   : > { %v6073_v15 = vpop.f32.mrb[24].mxu0  ;;  %v6093_v35 = vpop.f32.mrb[24].mxu1  ;;  %v4244_v13 = vld [vmem:[#allocation3 + $0x70] sm:$0xff] }
 0x2f0   : > { %v3859_v40 = vadd.f32 %v6073_v15, %v3664_v33  ;;  %v4047_v24 = vadd.f32 %v6093_v35, %v3867_v27  ;;  %v3839_v52 = vpop.f32.mrb[25].mxu0  ;;  %v4027_v30 = vpop.f32.mrb[25].mxu1 }
 0x2f1   : > { %v3858_v12 = vadd.f32 %v3839_v52, %v3663_v9  ;;  %v4046_v47 = vadd.f32 %v4027_v30, %v3866_v16 }
 0x2f2   : > { %3863 = vst.msk [vmem:[#allocation3 + $0x8] sm:$0xff] %vm1774_vm11, %v3859_v40  ;;  %4051 = vst.msk [vmem:[#allocation3 + $0x28] sm:$0xff] %vm1774_vm11, %v4047_v24 }
 0x2f3   : > { %3862 = vst.msk [vmem:[#allocation3] sm:$0xff] %vm1774_vm11, %v3858_v12  ;;  %4050 = vst.msk [vmem:[#allocation3 + $0x20] sm:$0xff] %vm1774_vm11, %v4046_v47  ;;  %v6076_v43 = vpop.f32.mrb[26].mxu0  ;;  %v6096_v1 = vpop.f32.mrb[26].mxu1 }
 0x2f4   : > { %v3861_v3 = vadd.f32 %v6076_v43, %v3666_v32  ;;  %v4049_v10 = vadd.f32 %v6096_v1, %v3869_v20  ;;  %v3849_v14 = vpop.f32.mrb[27].mxu0  ;;  %v4037_v36 = vpop.f32.mrb[27].mxu1 }
 0x2f5   : > { %v3860_v8 = vadd.f32 %v3849_v14, %v3665_v48  ;;  %v4048_v60 = vadd.f32 %v4037_v36, %v3868_v31 }
 0x2f6   : > { %3865 = vst.msk [vmem:[#allocation3 + $0x18] sm:$0xff] %vm1774_vm11, %v3861_v3  ;;  %4053 = vst.msk [vmem:[#allocation3 + $0x38] sm:$0xff] %vm1774_vm11, %v4049_v10 }
 0x2f7   : > { %3864 = vst.msk [vmem:[#allocation3 + $0x10] sm:$0xff] %vm1774_vm11, %v3860_v8  ;;  %4052 = vst.msk [vmem:[#allocation3 + $0x30] sm:$0xff] %vm1774_vm11, %v4048_v60 }
 0x2f9   : > { %v4439_v38 = vld [vmem:[#allocation3 + $0x8] sm:$0xff] }
 0x2fa   : > { %v4641_v11 = vld [vmem:[#allocation3 + $0x28] sm:$0xff]  ;;  %v4438_v17 = vld [vmem:[#allocation3] sm:$0xff] }
 0x2fb   : > { %v4640_v25 = vld [vmem:[#allocation3 + $0x20] sm:$0xff] }
 0x2fd   : > { %v4441_v28 = vld [vmem:[#allocation3 + $0x18] sm:$0xff] }
 0x2fe   : > { %v4643_v7 = vld [vmem:[#allocation3 + $0x38] sm:$0xff]  ;;  %v4440_v27 = vld [vmem:[#allocation3 + $0x10] sm:$0xff] }
 0x2ff   : > { %v6113_v63 = vpop.f32.mrb[28].mxu0  ;;  %v6133_v62 = vpop.f32.mrb[28].mxu1  ;;  %v4642_v40 = vld [vmem:[#allocation3 + $0x30] sm:$0xff] }
 0x300   : > { %v4235_v5 = vadd.f32 %v6113_v63, %v4055_v56  ;;  %v4423_v26 = vadd.f32 %v6133_v62, %v4243_v51  ;;  %v4215_v34 = vpop.f32.mrb[29].mxu0  ;;  %v4403_v42 = vpop.f32.mrb[29].mxu1 }
 0x301   : > { %v4234_v61 = vadd.f32 %v4215_v34, %v4054_v49  ;;  %v4422_v59 = vadd.f32 %v4403_v42, %v4242_v19 }
 0x302   : > { %4239 = vst.msk [vmem:[#allocation3 + $0x48] sm:$0xff] %vm1774_vm11, %v4235_v5  ;;  %4427 = vst.msk [vmem:[#allocation3 + $0x68] sm:$0xff] %vm1774_vm11, %v4423_v26 }
 0x303   : > { %4238 = vst.msk [vmem:[#allocation3 + $0x40] sm:$0xff] %vm1774_vm11, %v4234_v61  ;;  %4426 = vst.msk [vmem:[#allocation3 + $0x60] sm:$0xff] %vm1774_vm11, %v4422_v59  ;;  %v6116_v4 = vpop.f32.mrb[30].mxu0  ;;  %v6136_v55 = vpop.f32.mrb[30].mxu1 }
 0x304   : > { %v4237_v22 = vadd.f32 %v6116_v4, %v4057_v23  ;;  %v4425_v21 = vadd.f32 %v6136_v55, %v4245_v29  ;;  %v4225_v44 = vpop.f32.mrb[31].mxu0  ;;  %v4413_v6 = vpop.f32.mrb[31].mxu1 }
 0x305   : > { %v4236_v57 = vadd.f32 %v4225_v44, %v4056_v53  ;;  %v4424_v41 = vadd.f32 %v4413_v6, %v4244_v13 }
 0x306   : > { %4241 = vst.msk [vmem:[#allocation3 + $0x58] sm:$0xff] %vm1774_vm11, %v4237_v22  ;;  %4429 = vst.msk [vmem:[#allocation3 + $0x78] sm:$0xff] %vm1774_vm11, %v4425_v21 }
 0x307   : > { %4240 = vst.msk [vmem:[#allocation3 + $0x50] sm:$0xff] %vm1774_vm11, %v4236_v57  ;;  %4428 = vst.msk [vmem:[#allocation3 + $0x70] sm:$0xff] %vm1774_vm11, %v4424_v41 }
 0x309   : > { %v4829_v8 = vld [vmem:[#allocation3 + $0x48] sm:$0xff] }
 0x30a   : > { %v5017_v56 = vld [vmem:[#allocation3 + $0x68] sm:$0xff]  ;;  %v4828_v49 = vld [vmem:[#allocation3 + $0x40] sm:$0xff] }
 0x30b   : > { %v5016_v19 = vld [vmem:[#allocation3 + $0x60] sm:$0xff] }
 0x30d   : > { %v4831_v23 = vld [vmem:[#allocation3 + $0x58] sm:$0xff] }
 0x30e   : > { %v5019_v29 = vld [vmem:[#allocation3 + $0x78] sm:$0xff]  ;;  %v4830_v53 = vld [vmem:[#allocation3 + $0x50] sm:$0xff] }
 0x30f   : > { %v6153_v45 = vpop.f32.mrb[32].mxu0  ;;  %v6173_v39 = vpop.f32.mrb[32].mxu1  ;;  %v5018_v13 = vld [vmem:[#allocation3 + $0x70] sm:$0xff] }
 0x310   : > { %v4633_v18 = vadd.f32 %v6153_v45, %v4439_v38  ;;  %v4821_v54 = vadd.f32 %v6173_v39, %v4641_v11  ;;  %v4613_v2 = vpop.f32.mrb[33].mxu0  ;;  %v4801_v0 = vpop.f32.mrb[33].mxu1 }
 0x311   : > { %v4632_v50 = vadd.f32 %v4613_v2, %v4438_v17  ;;  %v4820_v58 = vadd.f32 %v4801_v0, %v4640_v25 }
 0x312   : > { %4637 = vst.msk [vmem:[#allocation3 + $0x8] sm:$0xff] %vm1774_vm11, %v4633_v18  ;;  %4825 = vst.msk [vmem:[#allocation3 + $0x28] sm:$0xff] %vm1774_vm11, %v4821_v54 }
 0x313   : > { %4636 = vst.msk [vmem:[#allocation3] sm:$0xff] %vm1774_vm11, %v4632_v50  ;;  %4824 = vst.msk [vmem:[#allocation3 + $0x20] sm:$0xff] %vm1774_vm11, %v4820_v58  ;;  %v6156_v46 = vpop.f32.mrb[34].mxu0  ;;  %v6176_v37 = vpop.f32.mrb[34].mxu1 }
 0x314   : > { %v4635_v33 = vadd.f32 %v6156_v46, %v4441_v28  ;;  %v4823_v15 = vadd.f32 %v6176_v37, %v4643_v7  ;;  %v4623_v35 = vpop.f32.mrb[35].mxu0  ;;  %v4811_v24 = vpop.f32.mrb[35].mxu1 }
 0x315   : > { %v4634_v9 = vadd.f32 %v4623_v35, %v4440_v27  ;;  %v4822_v52 = vadd.f32 %v4811_v24, %v4642_v40 }
 0x316   : > { %4639 = vst.msk [vmem:[#allocation3 + $0x18] sm:$0xff] %vm1774_vm11, %v4635_v33  ;;  %4827 = vst.msk [vmem:[#allocation3 + $0x38] sm:$0xff] %vm1774_vm11, %v4823_v15 }
 0x317   : > { %4638 = vst.msk [vmem:[#allocation3 + $0x10] sm:$0xff] %vm1774_vm11, %v4634_v9  ;;  %4826 = vst.msk [vmem:[#allocation3 + $0x30] sm:$0xff] %vm1774_vm11, %v4822_v52 }
 0x319   : > { %v5217_v16 = vld [vmem:[#allocation3 + $0x28] sm:$0xff] }
 0x31a   : > { %v5205_v30 = vld [vmem:[#allocation3 + $0x8] sm:$0xff]  ;;  %v5221_v12 = vmax.f32 %v5217_v16, 0.0  ;;  %v5216_v47 = vld [vmem:[#allocation3 + $0x20] sm:$0xff] }
 0x31b   : > { %v5209_v32 = vmax.f32 %v5205_v30, 0.0  ;;  %v5204_v43 = vld [vmem:[#allocation3] sm:$0xff]  ;;  %v5220_v20 = vmax.f32 %v5216_v47, 0.0 }
 0x31c   : > { %v5208_v1 = vmax.f32 %v5204_v43, 0.0  ;;  %5230 = vrot.lane.b32.xlu1 %v5221_v12, %s6603_s12 }
 0x31d   : > { %5213 = vst.msk [vmem:[%s7986_s20 + $0x10] sm:$0xff] %vm1774_vm11, %v5209_v32  ;;  %5228 = vrot.lane.b32.xlu0 %v5220_v20, %s6603_s12  ;;  %v5219_v3 = vld [vmem:[#allocation3 + $0x38] sm:$0xff] }
 0x31e   : > { %5212 = vst.msk [vmem:[%s7986_s20] sm:$0xff] %vm1774_vm11, %v5208_v1  ;;  %v5207_v10 = vld [vmem:[#allocation3 + $0x18] sm:$0xff]  ;;  %v5223_v48 = vmax.f32 %v5219_v3, 0.0  ;;  %v5218_v14 = vld [vmem:[#allocation3 + $0x30] sm:$0xff] }
 0x31f   : > { %v5211_v31 = vmax.f32 %v5207_v10, 0.0  ;;  %v5206_v36 = vld [vmem:[#allocation3 + $0x10] sm:$0xff]  ;;  %v6193_v60 = vpop.f32.mrb[36].mxu0  ;;  %v6213_v63 = vpop.f32.mrb[36].mxu1  ;;  %v5222_v51 = vmax.f32 %v5218_v14, 0.0 }
 0x320   : > { %v5210_v62 = vmax.f32 %v5206_v36, 0.0  ;;  %v5009_v5 = vadd.f32 %v6193_v60, %v4829_v8  ;;  %v5197_v26 = vadd.f32 %v6213_v63, %v5017_v56  ;;  %5234 = vrot.lane.b32.xlu1 %v5223_v48, %s6603_s12  ;;  %v4989_v34 = vpop.f32.mrb[37].mxu0  ;;  %v5177_v42 = vpop.f32.mrb[37].mxu1 }
 0x321   : > { %5215 = vst.msk [vmem:[%s7986_s20 + $0x30] sm:$0xff] %vm1774_vm11, %v5211_v31  ;;  %v5008_v61 = vadd.f32 %v4989_v34, %v4828_v49  ;;  %v5196_v59 = vadd.f32 %v5177_v42, %v5016_v19  ;;  %5232 = vrot.lane.b32.xlu0 %v5222_v51, %s6603_s12 }
 0x322   : > { %5214 = vst.msk [vmem:[%s7986_s20 + $0x20] sm:$0xff] %vm1774_vm11, %v5210_v62  ;;  %5013 = vst.msk [vmem:[#allocation3 + $0x48] sm:$0xff] %vm1774_vm11, %v5009_v5 }
 0x323   : > { %5201 = vst.msk [vmem:[#allocation3 + $0x68] sm:$0xff] %vm1774_vm11, %v5197_v26  ;;  %5012 = vst.msk [vmem:[#allocation3 + $0x40] sm:$0xff] %vm1774_vm11, %v5008_v61  ;;  %v6196_v4 = vpop.f32.mrb[38].mxu0  ;;  %v6216_v55 = vpop.f32.mrb[38].mxu1 }
 0x324   : > { %5200 = vst.msk [vmem:[#allocation3 + $0x60] sm:$0xff] %vm1774_vm11, %v5196_v59  ;;  %v5011_v22 = vadd.f32 %v6196_v4, %v4831_v23  ;;  %v5199_v21 = vadd.f32 %v6216_v55, %v5019_v29  ;;  %v4999_v44 = vpop.f32.mrb[39].mxu0  ;;  %v5187_v6 = vpop.f32.mrb[39].mxu1 }
 0x325   : > { %v5010_v57 = vadd.f32 %v4999_v44, %v4830_v53  ;;  %v5198_v41 = vadd.f32 %v5187_v6, %v5018_v13 }
 0x326   : > { %5015 = vst.msk [vmem:[#allocation3 + $0x58] sm:$0xff] %vm1774_vm11, %v5011_v22  ;;  %5203 = vst.msk [vmem:[#allocation3 + $0x78] sm:$0xff] %vm1774_vm11, %v5199_v21 }
 0x327   : > { %5014 = vst.msk [vmem:[#allocation3 + $0x50] sm:$0xff] %vm1774_vm11, %v5010_v57  ;;  %5202 = vst.msk [vmem:[#allocation3 + $0x70] sm:$0xff] %vm1774_vm11, %v5198_v41 }
 0x329   : > { %v5246_v45 = vld [vmem:[#allocation3 + $0x48] sm:$0xff] }
 0x32a   : > { %v5259_v38 = vld [vmem:[#allocation3 + $0x68] sm:$0xff]  ;;  %v5250_v18 = vmax.f32 %v5246_v45, 0.0  ;;  %v5245_v54 = vld [vmem:[#allocation3 + $0x40] sm:$0xff] }
 0x32b   : > { %v5263_v11 = vmax.f32 %v5259_v38, 0.0  ;;  %v5258_v39 = vld [vmem:[#allocation3 + $0x60] sm:$0xff]  ;;  %v5249_v2 = vmax.f32 %v5245_v54, 0.0 }
 0x32c   : > { %v5262_v17 = vmax.f32 %v5258_v39, 0.0  ;;  %5644 = vst.msk [vmem:[%s7986_s20 + $0x18] sm:$0xff] %vm1774_vm11, %v5250_v18 }
 0x32d   : > { %5272 = vrot.lane.b32.xlu1 %v5263_v11, %s6603_s12  ;;  %v5261_v25 = vld [vmem:[#allocation3 + $0x78] sm:$0xff]  ;;  %5643 = vst.msk [vmem:[%s7986_s20 + $0x8] sm:$0xff] %vm1774_vm11, %v5249_v2 }
 0x32e   : > { %5270 = vrot.lane.b32.xlu0 %v5262_v17, %s6603_s12  ;;  %v5248_v0 = vld [vmem:[#allocation3 + $0x58] sm:$0xff]  ;;  %v5265_v50 = vmax.f32 %v5261_v25, 0.0  ;;  %v5260_v58 = vld [vmem:[#allocation3 + $0x70] sm:$0xff] }
 0x32f   : > { %v5252_v28 = vmax.f32 %v5248_v0, 0.0  ;;  %v5247_v46 = vld [vmem:[#allocation3 + $0x50] sm:$0xff]  ;;  %v5264_v7 = vmax.f32 %v5260_v58, 0.0 }
 0x330   : > { %v5251_v37 = vmax.f32 %v5247_v46, 0.0 }
 0x331   : > { %5276 = vrot.lane.b32.xlu1 %v5265_v50, %s6603_s12  ;;  %5646 = vst.msk [vmem:[%s7986_s20 + $0x38] sm:$0xff] %vm1774_vm11, %v5252_v28 }
 0x332   : > { %5274 = vrot.lane.b32.xlu0 %v5264_v7, %s6603_s12  ;;  %5645 = vst.msk [vmem:[%s7986_s20 + $0x28] sm:$0xff] %vm1774_vm11, %v5251_v37  ;;  %s5658_s12 = sshll.u32 %s6579_s24, 3 }
 0x333   : > { %s5300_s9 = sadd.s32 %s5658_s12, %s5654_s29  ;;  %s6505_s12 = sshll.u32 %s6606_s30, 4  ;;  %s6506_s12 = int_to_ptr.vmem [resolvable:$false] %s6505_s12 }
 0x334   : > { %s5655_s18 = sshll.u32 %s5300_s9, 7  ;;  %s6507_s29 = scalar_lea.vmem %s6506_s12, 2048 }
 0x335   : > { %s8039_s24 = scalar_lea.hbm %s8105_s6, %s5655_s18  ;;  %p6508_p4 = scmp.lt.s32.totalorder %s8034_s17, %s6506_s12 }
 0x336   : > { %p6509_p5 = scmp.lt.s32.totalorder %s6507_s29, %s6501_s13 }
 0x338   : > { %p6510_p6 = por %p6509_p5, %p6508_p4 }
 0x33a   : > { %p6511_p7 = pnand %p6510_p6, %p6504_p2 }
 0x38e   : > { %v5231_v33 = vpop.permute.xlu1 %5230 }
 0x38f   : > { %5242 = vst.msk [vmem:[%s7986_s20 + $0x10] sm:$0xff] %vm5240_vm13, %v5231_v33  ;;  %v5229_v15 = vpop.permute.xlu0 %5228 }
 0x390   : > { %5241 = vst.msk [vmem:[%s7986_s20] sm:$0xff] %vm5240_vm13, %v5229_v15 }
 0x392   : > { %v5235_v27 = vpop.permute.xlu1 %5234 }
 0x393   : > { %5244 = vst.msk [vmem:[%s7986_s20 + $0x30] sm:$0xff] %vm5240_vm13, %v5235_v27  ;;  %v5233_v35 = vpop.permute.xlu0 %5232 }
 0x394   : > { %5243 = vst.msk [vmem:[%s7986_s20 + $0x20] sm:$0xff] %vm5240_vm13, %v5233_v35 }
 0x39f   : > { %v5273_v40 = vpop.permute.xlu1 %5272 }
 0x3a0   : > { %5648 = vst.msk [vmem:[%s7986_s20 + $0x18] sm:$0xff] %vm5240_vm13, %v5273_v40  ;;  %v5271_v24 = vpop.permute.xlu0 %5270 }
 0x3a1   : > { %5647 = vst.msk [vmem:[%s7986_s20 + $0x8] sm:$0xff] %vm5240_vm13, %v5271_v24 }
 0x3a3   : > { %v5277_v9 = vpop.permute.xlu1 %5276 }
 0x3a4   : > { %5650 = vst.msk [vmem:[%s7986_s20 + $0x38] sm:$0xff] %vm5240_vm13, %v5277_v9  ;;  %v5275_v52 = vpop.permute.xlu0 %5274 }
 0x3a5   : > { %5649 = vst.msk [vmem:[%s7986_s20 + $0x28] sm:$0xff] %vm5240_vm13, %v5275_v52 }
 0x3a6   : > { %6514 = shalt.err (!%p6511_p7)
}
 0x3a7   : > { %s6515_s14 = scalar_lea.hbm %s8039_s24, 1024  ;;  %s6519_s18 = scalar_lea.hbm %s8105_s6, 4096 }
 0x3a8   : > { %p6516_p9 = scmp.ne.s32.totalorder %s8039_s24, %s6515_s14  ;;  %p6520_p12 = scmp.lt.u32.totalorder %s8039_s24, %s8105_s6 }
 0x3a9   : > { %p6521_p13 = scmp.lt.u32.totalorder %s6519_s18, %s6515_s14  ;;  %p6523_p1 = scmp.lt.u32.totalorder %s6515_s14, %s8039_s24 }
 0x3aa   : > { %p6517_p10 = pnand %p6516_p9, %p6695_p3 }
 0x3ab   : > { %p6522_p0 = por %p6521_p13, %p6520_p12 }
 0x3ac   : > { %p6518_p11 = pneg %p6517_p10 }
 0x3ad   : > { %p6524_p2 = por %p6523_p1, %p6522_p0 }
 0x3af   : > { %p6525_p4 = pnand %p6524_p2, %p6518_p11 }
 0x3b1   : > { %6528 = shalt.err (!%p6525_p4)
}
 0x3b2   : > { %s6607_s13 = smov 128   ;;  %s6608_s30 = smov 8  }
 0x3b3   : > { %6413 = dma.vmem_to_hbm [thread:$0]  (%p6695_p3), %s8034_s17, 1024, %s8039_s24, %s8047_s25, %s6607_s13, %s6607_s13, %s6608_s30  }
 0x3b4 PF: > { %p6419_p5 = scmp.ge.s32.totalorder %s6595_s28, 2  ;;  %s5318_s12 = sand.u32 1, %s6567_s21  }
 0x3b5   : > { %s5319_s29 = scalar_lea.sflag [#allocation5], %s5318_s12 }
 0x3b6   : > { %p6416_p6 = pnand %p6419_p5, %p6704_p8 }
 0x3b8   : > { %6562 = dma.done.wait (!%p6416_p6), %s5319_s29, 1024  }
 0x3b9   : > { %6564 = vsyncadd (!%p6416_p6), %s5319_s29, 4294966272  ;;  %s19_s28 = sadd.s32 1, %s6595_s28   ;;  %s8152_s21 = smov %s6571_s22 }
 0x3ba   : > { %p16_p7 = scmp.ge.s32.totalorder %s19_s28, 6   ;;  %s8153_s22 = smov %s6575_s23 }
 0x3bb   : > { %s8154_s23 = smov %s6713_s15  ;;  %s8155_s24 = smov %s6587_s26 }
 0x3bc   : > { %s8156_s25 = smov %s6591_s27  ;;  %s8157_s26 = smov %s8160_s7 }
 0x3bd   : > { %s8158_s27 = smov %s8164_s8  ;;  %18 = sbr.rel (!%p16_p7) target bundleno = 5 (0x5), region = 118 }
 0x3c4   :  { %5324 = vsyncpa [#allocation5], 1 }
 0x3c5   :  { %5326 = vsyncpa [#allocation5 + $0x1], 1 }

</bundles_post_ra>
